<compile_context>
chip_gen: v6e
topology: v6e:2x2x1
jax: 0.10.0
libtpu: 0.0.40
codegen_flags: <defaults>
</compile_context>

<pallas_src>
import functools

import jax
import jax.numpy as jnp
import numpy as np
from jax.experimental import pallas as pl
from jax.experimental.pallas import tpu as pltpu

LANES = 128  # width every weight / activation / output is padded to


def cvae_kernel(dims, wmap, bmap, data_ref, w_ref, b_ref, out_ref):
    """One batch tile of the full CVAE forward.

    data_ref : (TILE_B, 128) f32, lanes = [X | Y | eps | 0]
    w_ref    : (TOTAL_ROWS, 128) bf16 packed weight slab (VMEM resident)
    b_ref    : (N_BIAS_ROWS, 128) f32 packed bias slab   (VMEM resident)
    out_ref  : (TILE_B, 128) f32 fused output:
               lanes [0:z)=mu, [z:2z)=log_var, [2z:2z+y)=recon, rest 0
    """
    y_dim, x_dim, z_dim = dims
    f32, bf16 = jnp.float32, jnp.bfloat16

    def dense(a, wname, bname=None, relu=True):
        off, rows = wmap[wname]                      # static python ints
        w = w_ref[off:off + rows, :]                 # bf16 (rows, 128), VMEM-resident
        h = jnp.dot(a.astype(w.dtype), w, preferred_element_type=f32)
        if bname is not None:
            h = h + b_ref[bmap[bname]]               # (128,) f32 bias row, broadcast
        if relu:
            # bias-add + ReLU stay in f32 (v5e-safe); carry the activation in bf16 so
            # the next matmul needs no extra cast and the vreg footprint halves.
            h = jnp.maximum(h, 0.0).astype(bf16)
        return h

    data = data_ref[...]                             # f32, 128 lanes
    xy = data[:, :x_dim + y_dim]                     # [X | Y] (fc1 rows reordered to match)

    # ---------------- encoder (dropout = identity / eval mode) ----------------
    h = dense(xy, "fc1", "b1")
    h = dense(h, "fc12", "b12")
    h = dense(h, "fc13", "b13")
    h = dense(h, "fc14", "b14")
    enc = dense(h, "fc2", "b2", relu=False)          # f32, lanes [0:2z) = [mu | log_var]

    # ---------------- sampling: z = eps * exp(0.5*log_var) + mu ----------------
    mu = enc[:, :z_dim]
    log_var = enc[:, z_dim:2 * z_dim]
    eps = data[:, x_dim + y_dim: x_dim + y_dim + z_dim]
    z = eps * jnp.exp(0.5 * log_var) + mu            # f32 elementwise (v5e-safe)

    # ---------------- decoder ----------------
    x_in = data[:, :x_dim]
    h = dense(z, "fc4z", None, relu=False) + dense(x_in, "fc4x", "b4", relu=False)
    h = jnp.maximum(h, 0.0).astype(bf16)
    h = dense(h, "fc42", "b42")
    h = dense(h, "fc43", "b43")
    h = dense(h, "fc44", "b44")
    dec = dense(h, "fc5", "b5", relu=False)          # f32, recon at lanes [2z:2z+y)

    # enc is zero outside [0:2z) and dec is zero outside [2z:2z+y), so one add gives the
    # fused [mu | log_var | recon | 0] slab -> single lane-dense (tile_b, 128) store.
    out_ref[...] = enc + dec


def pack_params(p, y_dim, x_dim, z_dim):
    """Pack all Linear weights/biases into one bf16 weight slab and one f32 bias slab.

    Weights are given as W^T with shape [in, out].  Each segment is zero-padded to 128
    output lanes (with an optional leading lane offset); layers fed by the running 128-lane
    activation are padded to 128 input rows (zero rows are inert).  fc1 rows are reordered
    to [X | Y] to match the packed data layout; fc21/fc22 are fused along the output dim;
    fc5 gets a 2*z_dim leading lane offset so recon lands in the fused output slab.
    """
    def pad_w(w, rows, col_off=0):
        w = jnp.asarray(w, jnp.float32)
        in_d, out_d = w.shape
        assert in_d <= rows and col_off + out_d <= LANES
        return jnp.pad(w, ((0, rows - in_d), (col_off, LANES - out_d - col_off)))

    segs = [
        ("fc1",  jnp.concatenate([p["w1x"], p["w1y"]], axis=0), x_dim + y_dim, 0),
        ("fc12", p["w12"], LANES, 0),
        ("fc13", p["w13"], LANES, 0),
        ("fc14", p["w14"], LANES, 0),
        ("fc2",  jnp.concatenate([p["w21"], p["w22"]], axis=1), LANES, 0),
        ("fc4z", p["w4z"], z_dim, 0),
        ("fc4x", p["w4x"], x_dim, 0),
        ("fc42", p["w42"], LANES, 0),
        ("fc43", p["w43"], LANES, 0),
        ("fc44", p["w44"], LANES, 0),
        ("fc5",  p["w5"], LANES, 2 * z_dim),        # recon lanes [2z : 2z+y)
    ]
    wmap, blocks, off = {}, [], 0
    for name, w, rows, col_off in segs:
        # bf16 sublane tile = 16: each segment's row count (and hence its offset) must be a
        # multiple of 16 so the in-kernel slab slice stays tile-aligned.  This requires
        # x_dim, z_dim and x_dim+y_dim to be multiples of 16 (documented fragility).
        assert rows % 16 == 0 and off % 16 == 0, (
            f"{name}: weight rows ({rows}) / offset ({off}) must be multiples of 16")
        blocks.append(pad_w(w, rows, col_off))
        wmap[name] = (off, rows)
        off += rows
    w_slab = jnp.concatenate(blocks, axis=0).astype(jnp.bfloat16)

    bsegs = [("b1", p["b1"], 0), ("b12", p["b12"], 0), ("b13", p["b13"], 0),
             ("b14", p["b14"], 0),
             ("b2", jnp.concatenate([p["b21"], p["b22"]], axis=1), 0),
             ("b4", p["b4"], 0), ("b42", p["b42"], 0), ("b43", p["b43"], 0),
             ("b44", p["b44"], 0), ("b5", p["b5"], 2 * z_dim)]
    bmap, brows = {}, []
    for i, (name, b, col_off) in enumerate(bsegs):
        b = jnp.asarray(b, jnp.float32).reshape(1, -1)
        brows.append(jnp.pad(b, ((0, 0), (col_off, LANES - b.shape[1] - col_off))))
        bmap[name] = i
    n = len(brows)
    n_pad = ((n + 7) // 8) * 8
    if n_pad > n:
        brows.append(jnp.zeros((n_pad - n, LANES), jnp.float32))
    b_slab = jnp.concatenate(brows, axis=0)
    return w_slab, b_slab, wmap, bmap


def _cdiv(a, b):
    return (a + b - 1) // b


def _round_up(a, b):
    return _cdiv(a, b) * b


def cvae_forward(Y, X, eps, params, *, max_tile_b=2048):
    B, y_dim = Y.shape
    x_dim = X.shape[1]
    z_dim = eps.shape[1]
    assert x_dim + y_dim + z_dim <= LANES, "packed [X|Y|eps] must fit in 128 lanes"
    assert 2 * z_dim + y_dim <= LANES, "fused [mu|log_var|recon] output must fit in 128 lanes"

    # Lane-dense packed data input: [X | Y | eps | 0] padded to 128 lanes.
    data = jnp.concatenate([X, Y, eps], axis=1).astype(jnp.float32)
    data = jnp.pad(data, ((0, 0), (0, LANES - data.shape[1])))

    # Batch tiling: the largest tiles (<= max_tile_b, multiple of 8) that still leave >= 2
    # grid steps when the batch allows, so the "parallel" grid axis can be sharded across
    # v7x's two TensorCores while amortizing per-step pipeline overhead everywhere.
    if B <= 8:
        tile_b = 8
    else:
        n_tiles = max(2, _cdiv(B, max_tile_b))
        tile_b = _round_up(_cdiv(B, n_tiles), 8)
    Bp = _round_up(B, tile_b)
    if Bp != B:
        data = jnp.pad(data, ((0, Bp - B), (0, 0)))

    w_slab, b_slab, wmap, bmap = pack_params(params, y_dim, x_dim, z_dim)
    grid = (Bp // tile_b,)
    kernel = functools.partial(cvae_kernel, (y_dim, x_dim, z_dim), wmap, bmap)

    total_rows = w_slab.shape[0]
    cost = pl.CostEstimate(
        flops=2 * Bp * total_rows * LANES,
        transcendentals=Bp * z_dim,
        bytes_accessed=data.size * 4 + w_slab.size * 2 + b_slab.size * 4 + Bp * LANES * 4,
    )

    out = pl.pallas_call(
        kernel,
        out_shape=jax.ShapeDtypeStruct((Bp, LANES), jnp.float32),  # [mu | log_var | recon | 0]
        grid_spec=pltpu.PrefetchScalarGridSpec(
            num_scalar_prefetch=0,
            grid=grid,
            in_specs=[
                pl.BlockSpec((tile_b, LANES), lambda i: (i, 0)),   # streamed activations
                pl.BlockSpec(w_slab.shape, lambda i: (0, 0)),      # VMEM-resident weights
                pl.BlockSpec(b_slab.shape, lambda i: (0, 0)),      # VMEM-resident biases
            ],
            out_specs=pl.BlockSpec((tile_b, LANES), lambda i: (i, 0)),
        ),
        compiler_params=pltpu.CompilerParams(dimension_semantics=("parallel",)),
        cost_estimate=cost,
    )(data, w_slab, b_slab)

    mu = out[:B, :z_dim]
    log_var = out[:B, z_dim:2 * z_dim]
    recon = out[:B, 2 * z_dim:2 * z_dim + y_dim]
    return recon, mu, log_var


def make_linear(key, in_dim, out_dim, scale=0.1):
    """Deterministic synthetic Linear params; returns W^T [in, out] and b [1, out]."""
    kw, kb = jax.random.split(key)
    w_t = jax.random.normal(kw, (in_dim, out_dim), jnp.float32) * scale
    b = jax.random.normal(kb, (1, out_dim), jnp.float32) * scale
    return w_t, b


def reference_forward(Y, X, eps, p):
    """Pure-JAX reference with the same bf16-weight / f32-accumulate numerics as the kernel."""
    f32, bf16 = jnp.float32, jnp.bfloat16

    def lin(a, w, b=None):
        h = jnp.dot(a.astype(bf16), jnp.asarray(w, f32).astype(bf16),
                    preferred_element_type=f32)
        return h if b is None else h + b

    relu = lambda v: jnp.maximum(v, 0.0)
    h = relu(lin(Y, p["w1y"]) + lin(X, p["w1x"]) + p["b1"])
    h = relu(lin(h, p["w12"], p["b12"]))
    h = relu(lin(h, p["w13"], p["b13"]))
    h = relu(lin(h, p["w14"], p["b14"]))
    mu = lin(h, p["w21"], p["b21"])
    log_var = lin(h, p["w22"], p["b22"])
    z = eps * jnp.exp(0.5 * log_var) + mu
    h = relu(lin(z, p["w4z"]) + lin(X, p["w4x"]) + p["b4"])
    h = relu(lin(h, p["w42"], p["b42"]))
    h = relu(lin(h, p["w43"], p["b43"]))
    h = relu(lin(h, p["w44"], p["b44"]))
    recon = lin(h, p["w5"], p["b5"])
    return recon, mu, log_var


if __name__ == "__main__":
    # Small MLP dims consistent with the module; batch large enough to exercise a 2-step grid.
    B = 512
    y_dim, x_dim = 16, 16
    h_dim1, h_dim2, h_dim3, h_dim4 = 64, 64, 32, 32
    z_dim = 32

    root = jax.random.PRNGKey(0)
    keys = jax.random.split(root, 16)

    Y = jax.random.normal(keys[0], (B, y_dim), jnp.float32)
    X = jax.random.normal(keys[1], (B, x_dim), jnp.float32)
    eps = jax.random.normal(keys[2], (B, z_dim), jnp.float32)  # torch.randn_like(std)

    w1y, _ = make_linear(keys[3], y_dim, h_dim1)
    w1x, b1 = make_linear(keys[4], x_dim, h_dim1)
    w12, b12 = make_linear(keys[5], h_dim1, h_dim2)
    w13, b13 = make_linear(keys[6], h_dim2, h_dim3)
    w14, b14 = make_linear(keys[7], h_dim3, h_dim4)
    w21, b21 = make_linear(keys[8], h_dim4, z_dim)
    w22, b22 = make_linear(keys[9], h_dim4, z_dim)
    w4z, _ = make_linear(keys[10], z_dim, h_dim1)
    w4x, b4 = make_linear(keys[11], x_dim, h_dim1)
    w42, b42 = make_linear(keys[12], h_dim1, h_dim2)
    w43, b43 = make_linear(keys[13], h_dim2, h_dim3)
    w44, b44 = make_linear(keys[14], h_dim3, h_dim4)
    w5, b5 = make_linear(keys[15], h_dim4, y_dim)

    params = dict(w1y=w1y, w1x=w1x, b1=b1, w12=w12, b12=b12, w13=w13, b13=b13,
                  w14=w14, b14=b14, w21=w21, b21=b21, w22=w22, b22=b22,
                  w4z=w4z, w4x=w4x, b4=b4, w42=w42, b42=b42, w43=w43, b43=b43,
                  w44=w44, b44=b44, w5=w5, b5=b5)

    recon, mu, log_var = jax.block_until_ready(cvae_forward(Y, X, eps, params))

    # NOTE: weights are cast to bf16 in the kernel and the reference matches that numerics
    # path; a pure-f32 PyTorch reference would show ~1e-2 relative error from the bf16 cast.
    r_recon, r_mu, r_lv = reference_forward(Y, X, eps, params)
    np.testing.assert_allclose(np.asarray(mu), np.asarray(r_mu), rtol=2e-2, atol=2e-3)
    np.testing.assert_allclose(np.asarray(log_var), np.asarray(r_lv), rtol=2e-2, atol=2e-3)
    np.testing.assert_allclose(np.asarray(recon), np.asarray(r_recon), rtol=2e-2, atol=2e-3)

    print("KERNEL_OK")
</pallas_src>

<mosaic_0001>
module attributes {stable_mosaic.version = 11 : i64} {
  func.func @cvae_kernel(%arg0: i32, %arg1: memref<256x128xf32, #tpu.memory_space<vmem>>, %arg2: memref<1104x128xbf16, #tpu.memory_space<vmem>>, %arg3: memref<16x128xf32, #tpu.memory_space<vmem>>, %arg4: memref<256x128xf32, #tpu.memory_space<vmem>>) attributes {dimension_semantics = [#tpu.dimension_semantics<parallel>], iteration_bounds = array<i64: 2>, scalar_prefetch = 0 : i64, scratch_operands = 0 : i64, tpu.core_type = #tpu.core_type<tc>, window_params = [{transform_indices = @transform_0, window_bounds = array<i64: 256, 128>}, {pipeline_mode = #tpu.pipeline_mode<synchronous>, transform_indices = @transform_1, window_bounds = array<i64: 1104, 128>}, {pipeline_mode = #tpu.pipeline_mode<synchronous>, transform_indices = @transform_2, window_bounds = array<i64: 16, 128>}, {transform_indices = @transform_3, window_bounds = array<i64: 256, 128>}]} {
    %c0 = arith.constant 0 : index
    %c0_0 = arith.constant 0 : index
    %0 = vector.load %arg1[%c0, %c0_0] : memref<256x128xf32, #tpu.memory_space<vmem>>, vector<256x128xf32>
    %1 = vector.extract_strided_slice %0 {offsets = [0, 0], sizes = [256, 32], strides = [1, 1]} : vector<256x128xf32> to vector<256x32xf32>
    %c0_1 = arith.constant 0 : index
    %c0_2 = arith.constant 0 : index
    %2 = vector.load %arg2[%c0_1, %c0_2] : memref<1104x128xbf16, #tpu.memory_space<vmem>>, vector<32x128xbf16>
    %3 = arith.truncf %1 : vector<256x32xf32> to vector<256x32xbf16>
    %cst = arith.constant dense<0.000000e+00> : vector<256x128xf32>
    %4 = tpu.matmul %3, %2, %cst {dimension_numbers = #tpu.dot_dimension_numbers<[1], [0], [0], [1], [0, 0, 1, 1], [], []>} : vector<256x32xbf16>, vector<32x128xbf16>, vector<256x128xf32> -> vector<256x128xf32>
    %c0_3 = arith.constant 0 : index
    %c0_4 = arith.constant 0 : index
    %5 = vector.load %arg3[%c0_3, %c0_4] : memref<16x128xf32, #tpu.memory_space<vmem>>, vector<1x128xf32>
    %6 = vector.shape_cast %5 : vector<1x128xf32> to vector<128xf32>
    %7 = vector.shape_cast %6 : vector<128xf32> to vector<1x128xf32>
    %8 = vector.broadcast %7 : vector<1x128xf32> to vector<256x128xf32>
    %9 = arith.addf %4, %8 : vector<256x128xf32>
    %cst_5 = arith.constant 0.000000e+00 : f32
    %10 = vector.broadcast %cst_5 : f32 to vector<256x128xf32>
    %11 = arith.maximumf %9, %10 : vector<256x128xf32>
    %12 = arith.truncf %11 : vector<256x128xf32> to vector<256x128xbf16>
    %c32 = arith.constant 32 : index
    %c0_6 = arith.constant 0 : index
    %13 = vector.load %arg2[%c32, %c0_6] : memref<1104x128xbf16, #tpu.memory_space<vmem>>, vector<128x128xbf16>
    %cst_7 = arith.constant dense<0.000000e+00> : vector<256x128xf32>
    %14 = tpu.matmul %12, %13, %cst_7 {dimension_numbers = #tpu.dot_dimension_numbers<[1], [0], [0], [1], [0, 0, 1, 1], [], []>} : vector<256x128xbf16>, vector<128x128xbf16>, vector<256x128xf32> -> vector<256x128xf32>
    %c1 = arith.constant 1 : index
    %c0_8 = arith.constant 0 : index
    %15 = vector.load %arg3[%c1, %c0_8] : memref<16x128xf32, #tpu.memory_space<vmem>>, vector<1x128xf32>
    %16 = vector.shape_cast %15 : vector<1x128xf32> to vector<128xf32>
    %17 = vector.shape_cast %16 : vector<128xf32> to vector<1x128xf32>
    %18 = vector.broadcast %17 : vector<1x128xf32> to vector<256x128xf32>
    %19 = arith.addf %14, %18 : vector<256x128xf32>
    %cst_9 = arith.constant 0.000000e+00 : f32
    %20 = vector.broadcast %cst_9 : f32 to vector<256x128xf32>
    %21 = arith.maximumf %19, %20 : vector<256x128xf32>
    %22 = arith.truncf %21 : vector<256x128xf32> to vector<256x128xbf16>
    %c160 = arith.constant 160 : index
    %c0_10 = arith.constant 0 : index
    %23 = vector.load %arg2[%c160, %c0_10] : memref<1104x128xbf16, #tpu.memory_space<vmem>>, vector<128x128xbf16>
    %cst_11 = arith.constant dense<0.000000e+00> : vector<256x128xf32>
    %24 = tpu.matmul %22, %23, %cst_11 {dimension_numbers = #tpu.dot_dimension_numbers<[1], [0], [0], [1], [0, 0, 1, 1], [], []>} : vector<256x128xbf16>, vector<128x128xbf16>, vector<256x128xf32> -> vector<256x128xf32>
    %c2 = arith.constant 2 : index
    %c0_12 = arith.constant 0 : index
    %25 = vector.load %arg3[%c2, %c0_12] : memref<16x128xf32, #tpu.memory_space<vmem>>, vector<1x128xf32>
    %26 = vector.shape_cast %25 : vector<1x128xf32> to vector<128xf32>
    %27 = vector.shape_cast %26 : vector<128xf32> to vector<1x128xf32>
    %28 = vector.broadcast %27 : vector<1x128xf32> to vector<256x128xf32>
    %29 = arith.addf %24, %28 : vector<256x128xf32>
    %cst_13 = arith.constant 0.000000e+00 : f32
    %30 = vector.broadcast %cst_13 : f32 to vector<256x128xf32>
    %31 = arith.maximumf %29, %30 : vector<256x128xf32>
    %32 = arith.truncf %31 : vector<256x128xf32> to vector<256x128xbf16>
    %c288 = arith.constant 288 : index
    %c0_14 = arith.constant 0 : index
    %33 = vector.load %arg2[%c288, %c0_14] : memref<1104x128xbf16, #tpu.memory_space<vmem>>, vector<128x128xbf16>
    %cst_15 = arith.constant dense<0.000000e+00> : vector<256x128xf32>
    %34 = tpu.matmul %32, %33, %cst_15 {dimension_numbers = #tpu.dot_dimension_numbers<[1], [0], [0], [1], [0, 0, 1, 1], [], []>} : vector<256x128xbf16>, vector<128x128xbf16>, vector<256x128xf32> -> vector<256x128xf32>
    %c3 = arith.constant 3 : index
    %c0_16 = arith.constant 0 : index
    %35 = vector.load %arg3[%c3, %c0_16] : memref<16x128xf32, #tpu.memory_space<vmem>>, vector<1x128xf32>
    %36 = vector.shape_cast %35 : vector<1x128xf32> to vector<128xf32>
    %37 = vector.shape_cast %36 : vector<128xf32> to vector<1x128xf32>
    %38 = vector.broadcast %37 : vector<1x128xf32> to vector<256x128xf32>
    %39 = arith.addf %34, %38 : vector<256x128xf32>
    %cst_17 = arith.constant 0.000000e+00 : f32
    %40 = vector.broadcast %cst_17 : f32 to vector<256x128xf32>
    %41 = arith.maximumf %39, %40 : vector<256x128xf32>
    %42 = arith.truncf %41 : vector<256x128xf32> to vector<256x128xbf16>
    %c416 = arith.constant 416 : index
    %c0_18 = arith.constant 0 : index
    %43 = vector.load %arg2[%c416, %c0_18] : memref<1104x128xbf16, #tpu.memory_space<vmem>>, vector<128x128xbf16>
    %cst_19 = arith.constant dense<0.000000e+00> : vector<256x128xf32>
    %44 = tpu.matmul %42, %43, %cst_19 {dimension_numbers = #tpu.dot_dimension_numbers<[1], [0], [0], [1], [0, 0, 1, 1], [], []>} : vector<256x128xbf16>, vector<128x128xbf16>, vector<256x128xf32> -> vector<256x128xf32>
    %c4 = arith.constant 4 : index
    %c0_20 = arith.constant 0 : index
    %45 = vector.load %arg3[%c4, %c0_20] : memref<16x128xf32, #tpu.memory_space<vmem>>, vector<1x128xf32>
    %46 = vector.shape_cast %45 : vector<1x128xf32> to vector<128xf32>
    %47 = vector.shape_cast %46 : vector<128xf32> to vector<1x128xf32>
    %48 = vector.broadcast %47 : vector<1x128xf32> to vector<256x128xf32>
    %49 = arith.addf %44, %48 : vector<256x128xf32>
    %50 = vector.extract_strided_slice %49 {offsets = [0, 0], sizes = [256, 32], strides = [1, 1]} : vector<256x128xf32> to vector<256x32xf32>
    %51 = vector.extract_strided_slice %49 {offsets = [0, 32], sizes = [256, 32], strides = [1, 1]} : vector<256x128xf32> to vector<256x32xf32>
    %52 = vector.extract_strided_slice %0 {offsets = [0, 32], sizes = [256, 32], strides = [1, 1]} : vector<256x128xf32> to vector<256x32xf32>
    %cst_21 = arith.constant 5.000000e-01 : f32
    %53 = vector.broadcast %cst_21 : f32 to vector<256x32xf32>
    %54 = arith.mulf %53, %51 : vector<256x32xf32>
    %55 = math.exp %54 : vector<256x32xf32>
    %56 = arith.mulf %52, %55 : vector<256x32xf32>
    %57 = arith.addf %56, %50 : vector<256x32xf32>
    %58 = vector.extract_strided_slice %0 {offsets = [0, 0], sizes = [256, 16], strides = [1, 1]} : vector<256x128xf32> to vector<256x16xf32>
    %c544 = arith.constant 544 : index
    %c0_22 = arith.constant 0 : index
    %59 = vector.load %arg2[%c544, %c0_22] : memref<1104x128xbf16, #tpu.memory_space<vmem>>, vector<32x128xbf16>
    %60 = arith.truncf %57 : vector<256x32xf32> to vector<256x32xbf16>
    %cst_23 = arith.constant dense<0.000000e+00> : vector<256x128xf32>
    %61 = tpu.matmul %60, %59, %cst_23 {dimension_numbers = #tpu.dot_dimension_numbers<[1], [0], [0], [1], [0, 0, 1, 1], [], []>} : vector<256x32xbf16>, vector<32x128xbf16>, vector<256x128xf32> -> vector<256x128xf32>
    %c576 = arith.constant 576 : index
    %c0_24 = arith.constant 0 : index
    %62 = vector.load %arg2[%c576, %c0_24] : memref<1104x128xbf16, #tpu.memory_space<vmem>>, vector<16x128xbf16>
    %63 = arith.truncf %58 : vector<256x16xf32> to vector<256x16xbf16>
    %cst_25 = arith.constant dense<0.000000e+00> : vector<256x128xf32>
    %64 = tpu.matmul %63, %62, %cst_25 {dimension_numbers = #tpu.dot_dimension_numbers<[1], [0], [0], [1], [0, 0, 1, 1], [], []>} : vector<256x16xbf16>, vector<16x128xbf16>, vector<256x128xf32> -> vector<256x128xf32>
    %c5 = arith.constant 5 : index
    %c0_26 = arith.constant 0 : index
    %65 = vector.load %arg3[%c5, %c0_26] : memref<16x128xf32, #tpu.memory_space<vmem>>, vector<1x128xf32>
    %66 = vector.shape_cast %65 : vector<1x128xf32> to vector<128xf32>
    %67 = vector.shape_cast %66 : vector<128xf32> to vector<1x128xf32>
    %68 = vector.broadcast %67 : vector<1x128xf32> to vector<256x128xf32>
    %69 = arith.addf %64, %68 : vector<256x128xf32>
    %70 = arith.addf %61, %69 : vector<256x128xf32>
    %cst_27 = arith.constant 0.000000e+00 : f32
    %71 = vector.broadcast %cst_27 : f32 to vector<256x128xf32>
    %72 = arith.maximumf %70, %71 : vector<256x128xf32>
    %73 = arith.truncf %72 : vector<256x128xf32> to vector<256x128xbf16>
    %c592 = arith.constant 592 : index
    %c0_28 = arith.constant 0 : index
    %74 = vector.load %arg2[%c592, %c0_28] : memref<1104x128xbf16, #tpu.memory_space<vmem>>, vector<128x128xbf16>
    %cst_29 = arith.constant dense<0.000000e+00> : vector<256x128xf32>
    %75 = tpu.matmul %73, %74, %cst_29 {dimension_numbers = #tpu.dot_dimension_numbers<[1], [0], [0], [1], [0, 0, 1, 1], [], []>} : vector<256x128xbf16>, vector<128x128xbf16>, vector<256x128xf32> -> vector<256x128xf32>
    %c6 = arith.constant 6 : index
    %c0_30 = arith.constant 0 : index
    %76 = vector.load %arg3[%c6, %c0_30] : memref<16x128xf32, #tpu.memory_space<vmem>>, vector<1x128xf32>
    %77 = vector.shape_cast %76 : vector<1x128xf32> to vector<128xf32>
    %78 = vector.shape_cast %77 : vector<128xf32> to vector<1x128xf32>
    %79 = vector.broadcast %78 : vector<1x128xf32> to vector<256x128xf32>
    %80 = arith.addf %75, %79 : vector<256x128xf32>
    %cst_31 = arith.constant 0.000000e+00 : f32
    %81 = vector.broadcast %cst_31 : f32 to vector<256x128xf32>
    %82 = arith.maximumf %80, %81 : vector<256x128xf32>
    %83 = arith.truncf %82 : vector<256x128xf32> to vector<256x128xbf16>
    %c720 = arith.constant 720 : index
    %c0_32 = arith.constant 0 : index
    %84 = vector.load %arg2[%c720, %c0_32] : memref<1104x128xbf16, #tpu.memory_space<vmem>>, vector<128x128xbf16>
    %cst_33 = arith.constant dense<0.000000e+00> : vector<256x128xf32>
    %85 = tpu.matmul %83, %84, %cst_33 {dimension_numbers = #tpu.dot_dimension_numbers<[1], [0], [0], [1], [0, 0, 1, 1], [], []>} : vector<256x128xbf16>, vector<128x128xbf16>, vector<256x128xf32> -> vector<256x128xf32>
    %c7 = arith.constant 7 : index
    %c0_34 = arith.constant 0 : index
    %86 = vector.load %arg3[%c7, %c0_34] : memref<16x128xf32, #tpu.memory_space<vmem>>, vector<1x128xf32>
    %87 = vector.shape_cast %86 : vector<1x128xf32> to vector<128xf32>
    %88 = vector.shape_cast %87 : vector<128xf32> to vector<1x128xf32>
    %89 = vector.broadcast %88 : vector<1x128xf32> to vector<256x128xf32>
    %90 = arith.addf %85, %89 : vector<256x128xf32>
    %cst_35 = arith.constant 0.000000e+00 : f32
    %91 = vector.broadcast %cst_35 : f32 to vector<256x128xf32>
    %92 = arith.maximumf %90, %91 : vector<256x128xf32>
    %93 = arith.truncf %92 : vector<256x128xf32> to vector<256x128xbf16>
    %c848 = arith.constant 848 : index
    %c0_36 = arith.constant 0 : index
    %94 = vector.load %arg2[%c848, %c0_36] : memref<1104x128xbf16, #tpu.memory_space<vmem>>, vector<128x128xbf16>
    %cst_37 = arith.constant dense<0.000000e+00> : vector<256x128xf32>
    %95 = tpu.matmul %93, %94, %cst_37 {dimension_numbers = #tpu.dot_dimension_numbers<[1], [0], [0], [1], [0, 0, 1, 1], [], []>} : vector<256x128xbf16>, vector<128x128xbf16>, vector<256x128xf32> -> vector<256x128xf32>
    %c8 = arith.constant 8 : index
    %c0_38 = arith.constant 0 : index
    %96 = vector.load %arg3[%c8, %c0_38] : memref<16x128xf32, #tpu.memory_space<vmem>>, vector<1x128xf32>
    %97 = vector.shape_cast %96 : vector<1x128xf32> to vector<128xf32>
    %98 = vector.shape_cast %97 : vector<128xf32> to vector<1x128xf32>
    %99 = vector.broadcast %98 : vector<1x128xf32> to vector<256x128xf32>
    %100 = arith.addf %95, %99 : vector<256x128xf32>
    %cst_39 = arith.constant 0.000000e+00 : f32
    %101 = vector.broadcast %cst_39 : f32 to vector<256x128xf32>
    %102 = arith.maximumf %100, %101 : vector<256x128xf32>
    %103 = arith.truncf %102 : vector<256x128xf32> to vector<256x128xbf16>
    %c976 = arith.constant 976 : index
    %c0_40 = arith.constant 0 : index
    %104 = vector.load %arg2[%c976, %c0_40] : memref<1104x128xbf16, #tpu.memory_space<vmem>>, vector<128x128xbf16>
    %cst_41 = arith.constant dense<0.000000e+00> : vector<256x128xf32>
    %105 = tpu.matmul %103, %104, %cst_41 {dimension_numbers = #tpu.dot_dimension_numbers<[1], [0], [0], [1], [0, 0, 1, 1], [], []>} : vector<256x128xbf16>, vector<128x128xbf16>, vector<256x128xf32> -> vector<256x128xf32>
    %c9 = arith.constant 9 : index
    %c0_42 = arith.constant 0 : index
    %106 = vector.load %arg3[%c9, %c0_42] : memref<16x128xf32, #tpu.memory_space<vmem>>, vector<1x128xf32>
    %107 = vector.shape_cast %106 : vector<1x128xf32> to vector<128xf32>
    %108 = vector.shape_cast %107 : vector<128xf32> to vector<1x128xf32>
    %109 = vector.broadcast %108 : vector<1x128xf32> to vector<256x128xf32>
    %110 = arith.addf %105, %109 : vector<256x128xf32>
    %111 = arith.addf %49, %110 : vector<256x128xf32>
    %c0_43 = arith.constant 0 : index
    %c0_44 = arith.constant 0 : index
    %112 = vector.load %arg4[%c0_43, %c0_44] : memref<256x128xf32, #tpu.memory_space<vmem>>, vector<256x128xf32>
    tpu.vector_store %arg4[%c0_43, %c0_44], %111 {strides = array<i32>} : memref<256x128xf32, #tpu.memory_space<vmem>>, vector<256x128xf32>,
    return
  }
  func.func @transform_0(%arg0: i32) -> (i32, i32) {
    %c0_i32 = arith.constant 0 : i32
    %c0_i32_0 = arith.constant 0 : i32
    return %arg0, %c0_i32 : i32, i32
  }
  func.func @transform_1(%arg0: i32) -> (i32, i32) {
    %c0_i32 = arith.constant 0 : i32
    %c0_i32_0 = arith.constant 0 : i32
    %c0_i32_1 = arith.constant 0 : i32
    return %c0_i32, %c0_i32_0 : i32, i32
  }
  func.func @transform_2(%arg0: i32) -> (i32, i32) {
    %c0_i32 = arith.constant 0 : i32
    %c0_i32_0 = arith.constant 0 : i32
    %c0_i32_1 = arith.constant 0 : i32
    return %c0_i32, %c0_i32_0 : i32, i32
  }
  func.func @transform_3(%arg0: i32) -> (i32, i32) {
    %c0_i32 = arith.constant 0 : i32
    %c0_i32_0 = arith.constant 0 : i32
    return %arg0, %c0_i32 : i32, i32
  }
}

</mosaic_0001>

<bundles_post_ra>
// kernel: tpu_custom_call.1
= control target key start
LH: loop header
LB: loop body
LE: loop exit
PB: predicated region body
PF: predicated region fallthrough
CT: control target
= control target key end

     0   :  { %8 = vsyncpa [#allocation3], 0  ;;  %s5990_s0 = inlined_call_operand.hbm [shape: f32[512,128], index: 0, kind: input, shape index: {}]   ;;  %s5991_s1 = inlined_call_operand.hbm [shape: bf16[1104,128], index: 1, kind: input, shape index: {}]   ;;  %s5992_s2 = inlined_call_operand.hbm [shape: f32[16,128], index: 2, kind: input, shape index: {}]   ;;  %s5993_s3 = inlined_call_operand.hbm [shape: f32[512,128], index: 3, kind: output, shape index: {}]  }
   0x1   :  { %10 = vsyncpa [#allocation3 + $0x1], 0 }
   0x2   :  { %11 = vsyncpa [#allocation6], 0 }
   0x3   :  { %12 = vsyncpa [#allocation4], 0 }
   0x4   :  { %14 = vsyncpa [#allocation4 + $0x1], 0  ;;  %s4986_s12 = smov 0   ;;  %s4988_s13 = smov 0  }
   0x5   :  { %s4990_s14 = smov 0   ;;  %s4992_s15 = smov 0  }
   0x6 LB: > { %s5007_s16 = sadd.s32 4294967295, %s4952_s15   ;;  %s3678_s17 = sadd.s32 4294967294, %s4952_s15   ;;  %s4952_s15 = sphi %s4992_s15, %s6033_s15   ;;  %s4948_s14 = sphi %s4990_s14, %s6032_s14   ;;  %s4944_s13 = sphi %s4988_s13, %s6031_s13   ;;  %s4940_s12 = sphi %s4986_s12, %s6030_s12  }
   0x7   : > { %p40_p0 = scmp.ne.s32.totalorder %s4944_s13, %s4940_s12  ;;  %p5994_p1 = scmp.eq.s32.totalorder %s5007_s16, 0 }
   0x8   : > { %p112_p3 = scmp.eq.s32.totalorder %s3678_s17, 1  ;;  %p3679_p5 = scmp.ge.s32.totalorder %s4952_s15, 1 }
   0x9   : > { %p5016_p4 = por %p5994_p1, %p40_p0  ;;  %p119_p7 = scmp.lt.s32.totalorder %s4952_s15, 3 }
   0xa   : > { %p5021_p6 = por %p112_p3, %p40_p0  ;;  %s4954_s21 = smov [#allocation5]  }
   0xb   : > { %s6004_s18 = scalar_select %p5016_p4, 1, 0 }
   0xc   : > { %s6005_s19 = scalar_select %p5021_p6, 1, 0 }
   0xd   : > { %p5026_p8 = pnand %p3679_p5, %p119_p7  ;;  %s131_s22 = sshll.u32 %s4954_s21, 4  ;;  %s132_s22 = int_to_ptr.vmem [resolvable:$true] %s131_s22 }
   0xe   : > { %s4955_s24 = smov [#allocation7]   ;;  %s4815_s26 = scalar_lea.vmem %s132_s22, 8832 }
   0xf   : > { %s6006_s20 = scalar_select %p5026_p8, 1, 0 }
  0x10   : > { %p4576_p9 = pneg %p5026_p8  ;;  %s144_s25 = sshll.u32 %s4955_s24, 4  ;;  %s145_s25 = int_to_ptr.vmem [resolvable:$true] %s144_s25 }
  0x11   : > { %p4816_p13 = scmp.ne.s32.totalorder %s132_s22, %s4815_s26  ;;  %p4823_p5 = scmp.lt.s32.totalorder %s132_s22, %s132_s22 }
  0x12   : > { %p5035_p11 = pnand %p4576_p9, %p5994_p1  ;;  %p4824_p7 = scmp.lt.s32.totalorder %s4815_s26, %s4815_s26 }
  0x14   : > { %p4806_p12 = pneg %p5035_p11  ;;  %p4825_p10 = por %p4824_p7, %p4823_p5 }
  0x16   : > { %p4818_p0 = pnand %p4816_p13, %p4806_p12 }
  0x18   : > { %p4819_p3 = pneg %p4818_p0 }
  0x1a   : > { %p4826_p9 = pnand %p4825_p10, %p4819_p3 }
  0x1c   : > { %4829 = shalt.err (!%p4826_p9)
}
  0x1d   : > { %s4956_s27 = smov 64   ;;  %s4957_s28 = smov 4  }
  0x1e   : > { %4579 = dma.hbm_to_vmem [thread:$0]  (!%p5035_p11), %s5991_s1, 8832, %s132_s22, [#allocation6], %s4956_s27, %s4956_s27, %s4957_s28  }
  0x1f   : > { %s4841_s4 = scalar_lea.vmem %s145_s25, 256  ;;  %p4849_p2 = scmp.lt.s32.totalorder %s145_s25, %s145_s25 }
  0x20   : > { %p4842_p1 = scmp.ne.s32.totalorder %s145_s25, %s4841_s4  ;;  %p4850_p6 = scmp.lt.s32.totalorder %s4841_s4, %s4841_s4 }
  0x22   : > { %p4844_p13 = pnand %p4842_p1, %p4806_p12  ;;  %p4851_p5 = por %p4850_p6, %p4849_p2 }
  0x24   : > { %p4845_p0 = pneg %p4844_p13 }
  0x26   : > { %p4852_p10 = pnand %p4851_p5, %p4845_p0 }
  0x28   : > { %4855 = shalt.err (!%p4852_p10)
}
  0x29   : > { %s4958_s5 = smov 128   ;;  %s4959_s6 = smov 8  }
  0x2a   : > { %4582 = dma.hbm_to_vmem [thread:$0]  (!%p5035_p11), %s5992_s2, 256, %s145_s25, [#allocation6], %s4958_s5, %s4958_s5, %s4959_s6  }
  0x2b   : > { %s5061_s9 = sadd.s32 1, %s4952_s15   ;;  %s27_s11 = sadd.s32 1, %s4948_s14 }
  0x2c   : > { %s24_s10 = ssub.s32 %s4952_s15, %s5061_s9  ;;  %p34_p2 = scmp.ne.s32.totalorder %s4948_s14, %s4944_s13 }
  0x2d   : > { %p25_p1 = scmp.eq.s32.totalorder %s24_s10, 0  ;;  %p35_p6 = scmp.eq.s32.totalorder %s4952_s15, 0 }
  0x2e   : > { %p6008_p3 = scmp.eq.s32.totalorder %s5007_s16, 1  ;;  %p4593_p9 = scmp.lt.s32.totalorder %s4952_s15, 2 }
  0x2f   : > { %s5070_s17 = scalar_select %p25_p1, %s4948_s14, %s27_s11  }
  0x30   : > { %p36_p12 = por %p35_p6, %p34_p2  ;;  %p5074_p7 = por %p6008_p3, %p34_p2 }
  0x31   : > { %s158_s22 = sand.u32 1, %s4948_s14   ;;  %s3823_s24 = sshll.u32 %s4952_s15, 12 }
  0x32   : > { %s6009_s21 = scalar_select %p5074_p7, 1, 0 }
  0x33   : > { %s3683_s23 = sshll.u32 %s158_s22, 8  ;;  %s5084_s27 = scalar_lea.hbm %s5990_s0, %s3823_s24 }
  0x34   : > { %s162_s28 = scalar_lea.vmem [#allocation2], %s3683_s23  ;;  %p5088_p11 = pnand %p4593_p9, %p36_p12 }
  0x35   : > { %s169_s29 = sshll.u32 %s162_s28, 4  ;;  %s5092_s4 = scalar_lea.sflag [#allocation3], %s158_s22  ;;  %s5086_s29 = int_to_ptr.vmem [resolvable:$true] %s169_s29 }
  0x36   : > { %s4856_s7 = scalar_lea.hbm %s5084_s27, 4096  ;;  %p4858_p0 = pneg %p5088_p11 }
  0x37   : > { %p4857_p13 = scmp.ne.s32.totalorder %s5084_s27, %s4856_s7  ;;  %s4861_s11 = scalar_lea.hbm %s5990_s0, 8192 }
  0x38   : > { %p4862_p1 = scmp.lt.s32.totalorder %s5084_s27, %s5990_s0  ;;  %p4863_p2 = scmp.lt.s32.totalorder %s4861_s11, %s4856_s7 }
  0x39   : > { %p4859_p5 = pnand %p4858_p0, %p4857_p13 }
  0x3a   : > { %p4864_p6 = por %p4863_p2, %p4862_p1 }
  0x3b   : > { %p4860_p10 = pneg %p4859_p5 }
  0x3d   : > { %p4865_p12 = pnand %p4864_p6, %p4860_p10 }
  0x3f   : > { %4868 = shalt.err (!%p4865_p12)
}
  0x40   : > { %s4869_s22 = scalar_lea.vmem %s5086_s29, 4096  ;;  %s4960_s25 = smov [#allocation2]  }
  0x41   : > { %p4870_p3 = scmp.ne.s32.totalorder %s5086_s29, %s4869_s22  ;;  %s4874_s26 = sshll.u32 %s4960_s25, 4  ;;  %s4875_s26 = int_to_ptr.vmem [resolvable:$false] %s4874_s26 }
  0x42   : > { %s4876_s28 = scalar_lea.vmem %s4875_s26, 8192  ;;  %p4877_p5 = scmp.lt.s32.totalorder %s5086_s29, %s4875_s26 }
  0x43   : > { %p4872_p9 = pnand %p4870_p3, %p4858_p0  ;;  %p4878_p7 = scmp.lt.s32.totalorder %s4876_s28, %s4869_s22 }
  0x45   : > { %p4873_p13 = pneg %p4872_p9  ;;  %p4879_p4 = por %p4878_p7, %p4877_p5 }
  0x47   : > { %p4880_p8 = pnand %p4879_p4, %p4873_p13 }
  0x49   : > { %4883 = shalt.err (!%p4880_p8)
}
  0x4a   : > { %4586 = dma.hbm_to_vmem [thread:$0]  (!%p5088_p11), %s5084_s27, 4096, %s5086_s29, %s5092_s4, %s4958_s5, %s4958_s5, %s4959_s6  }
  0x4b   : > { %p6011_p0 = scmp.ne.s32.totalorder %s6006_s20, 0 }
  0x4d   : > { %181 = sbr.rel (%p6011_p0) target bundleno = 2458 (0x99a), region = 32 }
  0x52   : > { %s5119_s7 = sand.u32 1, %s4944_s13   ;;  %p6012_p4 = scmp.ne.s32.totalorder %s6004_s18, 0 }
  0x53   : > { %s3687_s8 = sshll.u32 %s5119_s7, 8  ;;  %s184_s10 = scalar_lea.sflag [#allocation3], %s5119_s7 }
  0x54   : > { %s5125_s30 = scalar_lea.vmem [#allocation2], %s3687_s8 }
  0x55   : > { %4927 = dma.done.wait (%p6012_p4), %s184_s10, 4096  }
  0x56   : > { %4929 = vsyncadd (%p6012_p4), %s184_s10, 4294963200  ;;  %p6013_p8 = scmp.eq.s32.totalorder %s5007_s16, 0 }
  0x58   : > { %4931 = dma.done.wait (%p6013_p8), [#allocation6], 9088   ;;  %p6014_p7 = pmov %p6013_p8 }
  0x59   : > { %v4639_v0 = vld [vmem:[#allocation5 + $0x8] sm:$0xff]   ;;  %v4640_v1 = vld [vmem:[#allocation5] sm:$0xff]   ;;  %vm290_vm0 = vcmask 261120   ;;  %v223_v5 = vld [vmem:[%s5125_s30 + $0x10] sm:$0xff]  ;;  %s4961_s18 = smov 32   ;;  %vm1933_vm1 = vcmask 130048  }
  0x5a   : > { %4933 = vsyncadd (%p6014_p7), [#allocation6], 4294958208  ;;  %4070 = vmatprep.subr.bf16.mxu0 %v4639_v0  ;;  %v221_v2 = vld [vmem:[%s5125_s30] sm:$0xff]  ;;  %v222_v3 = vld [vmem:[%s5125_s30 + $0x8] sm:$0xff]  ;;  %4560 = vmatprep.subr.bf16.mxu1 %v4639_v0  ;;  %s4962_s20 = smov 96   ;;  %s5845_s5 = scalar_lea.vmem [#allocation8], %s3687_s8 }
  0x5b   : > { %4071 = vmatpush3.bf16.msra.mxu0 %v4639_v0  ;;  %v5137_v4 = vpack.c.bf16 %v222_v3, %v221_v2  ;;  %v224_v6 = vld [vmem:[%s5125_s30 + $0x18] sm:$0xff]  ;;  %4562 = vmatpush3.bf16.msra.mxu1 %v4639_v0  ;;  %v225_v7 = vld [vmem:[%s5125_s30 + $0x20] sm:$0xff]  ;;  %v226_v8 = vld [vmem:[%s5125_s30 + $0x28] sm:$0xff]  ;;  %s3824_s6 = sshll.u32 %s5007_s16, 12  ;;  %s3586_s27 = sshll.u32 %s5845_s5, 4  ;;  %s5944_s27 = int_to_ptr.vmem [resolvable:$true] %s3586_s27 }
  0x5c   : > { %4072 = vmatprep.subr.bf16.mxu0 %v4640_v1  ;;  %4561 = vmatprep.subr.bf16.mxu1 %v4640_v1  ;;  %v5145_v9 = vpack.c.bf16 %v224_v6, %v223_v5  ;;  %v5147_v10 = vpack.c.bf16 %v226_v8, %v225_v7  ;;  %v237_v11 = vld [vmem:[%s5125_s30 + $0x80] sm:$0xff]  ;;  %v238_v12 = vld [vmem:[%s5125_s30 + $0x88] sm:$0xff]  ;;  %v239_v14 = vld [vmem:[%s5125_s30 + $0x90] sm:$0xff]  ;;  %s5942_s11 = scalar_lea.hbm %s5993_s3, %s3824_s6  ;;  %s3573_s16 = scalar_lea.sflag [#allocation4], %s5119_s7 }
  0x5d   : > { %4074 = vmatprep.mubr.msk.bf16.mxu0 %vm290_vm0, %v5137_v4  ;;  %v5151_v13 = vpack.c.bf16 %v238_v12, %v237_v11  ;;  %v240_v15 = vld [vmem:[%s5125_s30 + $0x98] sm:$0xff]  ;;  %v241_v16 = vld [vmem:[%s5125_s30 + $0xa0] sm:$0xff]  ;;  %v242_v18 = vld [vmem:[%s5125_s30 + $0xa8] sm:$0xff]  ;;  %s4884_s23 = scalar_lea.vmem %s5944_s27, 4096  ;;  %p6027_p10 = scmp.ne.s32.totalorder %s6009_s21, 0 }
  0x5e   : > { %v5156_v17 = vpack.c.bf16 %v240_v15, %v239_v14  ;;  %v227_v19 = vld [vmem:[%s5125_s30 + $0x30] sm:$0xff]  ;;  %v228_v20 = vld [vmem:[%s5125_s30 + $0x38] sm:$0xff]  ;;  %v229_v21 = vld [vmem:[%s5125_s30 + $0x40] sm:$0xff]  ;;  %v5166_v22 = vpack.c.bf16 %v242_v18, %v241_v16  ;;  %p4885_p11 = scmp.ne.s32.totalorder %s5944_s27, %s4884_s23  ;;  %s4963_s24 = smov [#allocation8]  }
  0x5f   : > { %4073 = vmatpush3.bf16.msra.mxu0 %v4640_v1  ;;  %4563 = vmatpush3.bf16.msra.mxu1 %v4640_v1  ;;  %v230_v23 = vld [vmem:[%s5125_s30 + $0x48] sm:$0xff]  ;;  %v243_v24 = vld [vmem:[%s5125_s30 + $0xb0] sm:$0xff]  ;;  %v244_v25 = vld [vmem:[%s5125_s30 + $0xb8] sm:$0xff]  ;;  %v5179_v29 = vpack.c.bf16 %v228_v20, %v227_v19  ;;  %s4888_s22 = sshll.u32 %s4963_s24, 4  ;;  %s4889_s22 = int_to_ptr.vmem [resolvable:$false] %s4888_s22 }
  0x60   : > { %4090 = vmatprep.mubr.msk.bf16.mxu1 %vm290_vm0, %v5151_v13  ;;  %v245_v26 = vld [vmem:[%s5125_s30 + $0xc0] sm:$0xff]  ;;  %v246_v27 = vld [vmem:[%s5125_s30 + $0xc8] sm:$0xff]  ;;  %v5181_v31 = vpack.c.bf16 %v230_v23, %v229_v21  ;;  %v5183_v32 = vpack.c.bf16 %v244_v25, %v243_v24  ;;  %v231_v34 = vld [vmem:[%s5125_s30 + $0x50] sm:$0xff]  ;;  %p4886_p1 = pnand %p4885_p11, %p6027_p10  ;;  %s4890_s25 = scalar_lea.vmem %s4889_s22, 8192 }
  0x61   : > { %v4641_v28 = vld [vmem:[#allocation5 + $0x48] sm:$0xff]   ;;  %v4642_v30 = vld [vmem:[#allocation5 + $0x40] sm:$0xff]   ;;  %v5185_v33 = vpack.c.bf16 %v246_v27, %v245_v26  ;;  %v232_v35 = vld [vmem:[%s5125_s30 + $0x58] sm:$0xff]  ;;  %p4891_p6 = scmp.lt.s32.totalorder %s5944_s27, %s4889_s22  ;;  %p4892_p12 = scmp.lt.s32.totalorder %s4890_s25, %s4884_s23 }
  0x62   : > { %4075 = vmatmul.mubr.msk.bf16.vlgmr.msra.gmra.mxu0 %vm290_vm0, %v5145_v9  ;;  %4091 = vmatmul.mubr.msk.bf16.vlgmr.msra.gmra.mxu1 %vm290_vm0, %v5156_v17  ;;  %v4643_v36 = vld [vmem:[#allocation5 + $0x38] sm:$0xff]   ;;  %v233_v37 = vld [vmem:[%s5125_s30 + $0x60] sm:$0xff]  ;;  %v234_v38 = vld [vmem:[%s5125_s30 + $0x68] sm:$0xff]  ;;  %v5203_v44 = vpack.c.bf16 %v232_v35, %v231_v34  ;;  %p4887_p2 = pneg %p4886_p1 }
  0x63   : > { %4078 = vmatprep.mubr.msk.bf16.mxu0 %vm290_vm0, %v5147_v10  ;;  %4094 = vmatprep.mubr.msk.bf16.mxu1 %vm290_vm0, %v5166_v22  ;;  %v247_v39 = vld [vmem:[%s5125_s30 + $0xd0] sm:$0xff]  ;;  %v248_v40 = vld [vmem:[%s5125_s30 + $0xd8] sm:$0xff]  ;;  %v249_v41 = vld [vmem:[%s5125_s30 + $0xe0] sm:$0xff]  ;;  %v5205_v45 = vpack.c.bf16 %v234_v38, %v233_v37  ;;  %p4893_p3 = por %p4892_p12, %p4891_p6 }
  0x64   : > { %4106 = vmatprep.subr.bf16.mxu1 %v4641_v28  ;;  %v250_v42 = vld [vmem:[%s5125_s30 + $0xe8] sm:$0xff]  ;;  %v4644_v43 = vld [vmem:[#allocation5 + $0x30] sm:$0xff]   ;;  %v5207_v46 = vpack.c.bf16 %v248_v40, %v247_v39  ;;  %v236_v50 = vld [vmem:[%s5125_s30 + $0x78] sm:$0xff] }
  0x65   : > { %4107 = vmatpush3.bf16.msra.mxu1 %v4641_v28  ;;  %v4645_v47 = vld [vmem:[#allocation5 + $0x28] sm:$0xff]   ;;  %v5209_v48 = vpack.c.bf16 %v250_v42, %v249_v41  ;;  %v235_v49 = vld [vmem:[%s5125_s30 + $0x70] sm:$0xff]  ;;  %v252_v52 = vld [vmem:[%s5125_s30 + $0xf8] sm:$0xff]  ;;  %p4894_p9 = pnand %p4893_p3, %p4887_p2 }
  0x66   : > { %4108 = vmatprep.subr.bf16.mxu1 %v4642_v30  ;;  %v251_v51 = vld [vmem:[%s5125_s30 + $0xf0] sm:$0xff]  ;;  %v5223_v53 = vpack.c.bf16 %v236_v50, %v235_v49  ;;  %v4646_v55 = vld [vmem:[#allocation5 + $0x20] sm:$0xff]   ;;  %v4647_v56 = vld [vmem:[#allocation5 + $0x18] sm:$0xff]  }
  0x67   : > { %v5225_v54 = vpack.c.bf16 %v252_v52, %v251_v51  ;;  %v4648_v57 = vld [vmem:[#allocation5 + $0x10] sm:$0xff]   ;;  %v4649_v58 = vld [vmem:[#allocation5 + $0x88] sm:$0xff]   ;;  %v4650_v59 = vld [vmem:[#allocation5 + $0x80] sm:$0xff]  }
  0x68   : > { %4154 = vmatprep.subr.bf16.mxu0 %v4649_v58  ;;  %v4651_v60 = vld [vmem:[#allocation5 + $0x78] sm:$0xff]   ;;  %v4652_v61 = vld [vmem:[#allocation5 + $0x70] sm:$0xff]   ;;  %v4653_v62 = vld [vmem:[#allocation5 + $0x68] sm:$0xff]  }
  0x69   : > { %4109 = vmatpush3.bf16.msra.mxu1 %v4642_v30  ;;  %4155 = vmatpush3.bf16.msra.mxu0 %v4649_v58  ;;  %v5233_v2 = vld [vmem:[#allocation7] ss:$0 sm:$0xff] }
  0x6a   : > { %4079 = vmatmul.mubr.msk.bf16.gmra.mxu0 %vm290_vm0, %v5179_v29  ;;  %4095 = vmatmul.mubr.msk.bf16.gmra.mxu1 %vm290_vm0, %v5183_v32 }
  0x6b   : > { %4082 = vmatprep.mubr.msk.bf16.mxu0 %vm290_vm0, %v5181_v31  ;;  %4098 = vmatprep.mubr.msk.bf16.mxu1 %vm290_vm0, %v5185_v33 }
  0x6c   : > { %4110 = vmatprep.subr.bf16.mxu1 %v4643_v36  ;;  %4156 = vmatprep.subr.bf16.mxu0 %v4650_v59 }
  0x6d   : > { %4111 = vmatpush3.bf16.msra.mxu1 %v4643_v36  ;;  %4157 = vmatpush3.bf16.msra.mxu0 %v4650_v59 }
  0x6e   : > { %4112 = vmatprep.subr.bf16.mxu1 %v4644_v43  ;;  %4158 = vmatprep.subr.bf16.mxu0 %v4651_v60 }
  0x71   : > { %4113 = vmatpush3.bf16.msra.mxu1 %v4644_v43  ;;  %4159 = vmatpush3.bf16.msra.mxu0 %v4651_v60 }
  0x72   : > { %4083 = vmatmul.mubr.msk.bf16.gmra.mxu0 %vm290_vm0, %v5203_v44  ;;  %4099 = vmatmul.mubr.msk.bf16.gmra.mxu1 %vm290_vm0, %v5207_v46 }
  0x73   : > { %4086 = vmatprep.mubr.msk.bf16.mxu0 %vm290_vm0, %v5205_v45  ;;  %4102 = vmatprep.mubr.msk.bf16.mxu1 %vm290_vm0, %v5209_v48 }
  0x74   : > { %4114 = vmatprep.subr.bf16.mxu1 %v4645_v47  ;;  %4160 = vmatprep.subr.bf16.mxu0 %v4652_v61 }
  0x75   : > { %4115 = vmatpush3.bf16.msra.mxu1 %v4645_v47  ;;  %4161 = vmatpush3.bf16.msra.mxu0 %v4652_v61 }
  0x76   : > { %4116 = vmatprep.subr.bf16.mxu1 %v4646_v55  ;;  %4162 = vmatprep.subr.bf16.mxu0 %v4653_v62 }
  0x79   : > { %4117 = vmatpush3.bf16.msra.mxu1 %v4646_v55  ;;  %4163 = vmatpush3.bf16.msra.mxu0 %v4653_v62 }
  0x7a   : > { %4087 = vmatmul.mubr.msk.bf16.gmra.mxu0 %vm290_vm0, %v5223_v53  ;;  %4103 = vmatmul.mubr.msk.bf16.gmra.mxu1 %vm290_vm0, %v5225_v54 }
  0x7b   : > { %4118 = vmatprep.subr.bf16.mxu1 %v4647_v56 }
  0x7d   : > { %4119 = vmatpush3.bf16.msra.mxu1 %v4647_v56 }
  0x7e   : > { %4120 = vmatprep.subr.bf16.mxu1 %v4648_v57 }
  0x81   : > { %4121 = vmatpush3.bf16.msra.mxu1 %v4648_v57 }
 0x122   : > { %v4076_v63 = vpop.f32.mrf.mxu0  ;;  %v5231_v0 = vpop.f32.mrf.mxu1 }
 0x123   : > { %v382_v11 = vadd.f32 %v4076_v63, %v5233_v2 }
 0x124   : > { %v373_v1 = vpop.f32.mrf.mxu0  ;;  %v437_v3 = vpop.f32.mrf.mxu1 }
 0x125   : > { %v374_v6 = vadd.f32 %v5233_v2, %v373_v1  ;;  %v502_v23 = vmax.f32 %v382_v11, 0.0  ;;  %v438_v11 = vadd.f32 %v5233_v2, %v437_v3 }
 0x126   : > { %v4077_v5 = vpop.f32.mrf.mxu0  ;;  %v5237_v8 = vpop.f32.mrf.mxu1 }
 0x127   : > { %v385_v7 = vadd.f32 %v4077_v5, %v5233_v2  ;;  %v500_v19 = vmax.f32 %v374_v6, 0.0 }
 0x128   : > { %v376_v12 = vpop.f32.mrf.mxu0  ;;  %v440_v15 = vpop.f32.mrf.mxu1 }
 0x129   : > { %v377_v14 = vadd.f32 %v5233_v2, %v376_v12  ;;  %v503_v16 = vmax.f32 %v385_v7, 0.0 }
 0x12a   : > { %v4080_v18 = vpop.f32.mrf.mxu0  ;;  %v5241_v21 = vpop.f32.mrf.mxu1 }
 0x12b   : > { %v501_v20 = vmax.f32 %v377_v14, 0.0  ;;  %v533_v27 = vpack.c.bf16 %v503_v16, %v502_v23  ;;  %v398_v36 = vadd.f32 %v4080_v18, %v5233_v2  ;;  %v441_v14 = vadd.f32 %v5233_v2, %v440_v15 }
 0x12c   : > { %v389_v24 = vpop.f32.mrf.mxu0  ;;  %v453_v26 = vpop.f32.mrf.mxu1 }
 0x12d   : > { %v532_v25 = vpack.c.bf16 %v501_v20, %v500_v19  ;;  %v390_v30 = vadd.f32 %v5233_v2, %v389_v24  ;;  %v506_v47 = vmax.f32 %v398_v36, 0.0 }
 0x12e   : > { %v4081_v28 = vpop.f32.mrf.mxu0  ;;  %v5245_v35 = vpop.f32.mrf.mxu1 }
 0x12f   : > { %v401_v34 = vadd.f32 %v4081_v28, %v5233_v2  ;;  %4122 = vmatprep.mubr.bf16.mxu1 %v532_v25  ;;  %v504_v42 = vmax.f32 %v390_v30, 0.0  ;;  %v517_v30 = vmax.f32 %v441_v14, 0.0 }
 0x130   : > { %v392_v37 = vpop.f32.mrf.mxu0  ;;  %4123 = vmatmul.mubr.bf16.vlgmr.msra.gmra.mxu1 %v533_v27  ;;  %v456_v41 = vpop.f32.mrf.mxu1  ;;  %v516_v27 = vmax.f32 %v438_v11, 0.0 }
 0x131   : > { %v393_v38 = vadd.f32 %v5233_v2, %v392_v37  ;;  %v507_v39 = vmax.f32 %v401_v34, 0.0 }
 0x132   : > { %v4084_v40 = vpop.f32.mrf.mxu0  ;;  %v5249_v55 = vpop.f32.mrf.mxu1 }
 0x133   : > { %v505_v43 = vmax.f32 %v393_v38, 0.0  ;;  %v535_v51 = vpack.c.bf16 %v507_v39, %v506_v47  ;;  %v414_v58 = vadd.f32 %v4084_v40, %v5233_v2  ;;  %v454_v38 = vadd.f32 %v5233_v2, %v453_v26 }
 0x134   : > { %v405_v49 = vpop.f32.mrf.mxu0  ;;  %v469_v63 = vpop.f32.mrf.mxu1  ;;  %v540_v40 = vpack.c.bf16 %v517_v30, %v516_v27 }
 0x135   : > { %v534_v50 = vpack.c.bf16 %v505_v43, %v504_v42  ;;  %v406_v56 = vadd.f32 %v5233_v2, %v405_v49  ;;  %v510_v6 = vmax.f32 %v414_v58, 0.0  ;;  %v457_v42 = vadd.f32 %v5233_v2, %v456_v41 }
 0x136   : > { %v4085_v52 = vpop.f32.mrf.mxu0  ;;  %v4101_v19 = vpop.f32.mrf.mxu1  ;;  %v446_v43 = vadd.f32 %v5231_v0, %v5233_v2  ;;  %v449_v49 = vadd.f32 %v5237_v8, %v5233_v2  ;;  %v470_v58 = vadd.f32 %v5233_v2, %v469_v63  ;;  %v462_v0 = vadd.f32 %v5241_v21, %v5233_v2 }
 0x137   : > { %v417_v57 = vadd.f32 %v4085_v52, %v5233_v2  ;;  %4126 = vmatprep.mubr.bf16.mxu1 %v534_v50  ;;  %v508_v1 = vmax.f32 %v406_v56, 0.0  ;;  %v521_v52 = vmax.f32 %v457_v42, 0.0  ;;  %v465_v8 = vadd.f32 %v5245_v35, %v5233_v2  ;;  %v4663_v42 = vld [vmem:[#allocation5 + $0x98] sm:$0xff]  }
 0x138   : > { %v408_v59 = vpop.f32.mrf.mxu0  ;;  %4127 = vmatmul.mubr.bf16.gmra.mxu1 %v535_v51  ;;  %v472_v34 = vpop.f32.mrf.mxu1  ;;  %v520_v51 = vmax.f32 %v454_v38, 0.0  ;;  %v518_v56 = vmax.f32 %v446_v43, 0.0  ;;  %v478_v21 = vadd.f32 %v5249_v55, %v5233_v2  ;;  %v4654_v55 = vld [vmem:[#allocation5 + $0x60] sm:$0xff]   ;;  %v4660_v38 = vld [vmem:[#allocation5 + $0xb0] sm:$0xff]  }
 0x139   : > { %v409_v60 = vadd.f32 %v5233_v2, %v408_v59  ;;  %v511_v61 = vmax.f32 %v417_v57, 0.0  ;;  %v519_v57 = vmax.f32 %v449_v49, 0.0  ;;  %v473_v41 = vadd.f32 %v5233_v2, %v472_v34  ;;  %4164 = vmatprep.subr.bf16.mxu0 %v4654_v55  ;;  %v5280_v49 = vld [vmem:[#allocation7 + $0x1] ss:$0 sm:$0xff] }
 0x13a   : > { %v4088_v62 = vpop.f32.mrf.mxu0  ;;  %v4104_v50 = vpop.f32.mrf.mxu1  ;;  %v542_v59 = vpack.c.bf16 %v521_v52, %v520_v51  ;;  %4165 = vmatpush3.bf16.msra.mxu0 %v4654_v55 }
 0x13b   : > { %v509_v5 = vmax.f32 %v409_v60, 0.0  ;;  %v537_v16 = vpack.c.bf16 %v511_v61, %v510_v6  ;;  %v430_v24 = vadd.f32 %v4088_v62, %v5233_v2  ;;  %v541_v60 = vpack.c.bf16 %v519_v57, %v518_v56 }
 0x13c   : > { %v421_v7 = vpop.f32.mrf.mxu0  ;;  %v485_v26 = vpop.f32.mrf.mxu1  ;;  %v524_v62 = vmax.f32 %v470_v58, 0.0  ;;  %v523_v6 = vmax.f32 %v465_v8, 0.0  ;;  %v494_v27 = vadd.f32 %v4104_v50, %v5233_v2 }
 0x13d   : > { %v536_v12 = vpack.c.bf16 %v509_v5, %v508_v1  ;;  %v422_v20 = vadd.f32 %v5233_v2, %v421_v7  ;;  %v514_v37 = vmax.f32 %v430_v24, 0.0  ;;  %v525_v1 = vmax.f32 %v473_v41, 0.0 }
 0x13e   : > { %v4089_v18 = vpop.f32.mrf.mxu0  ;;  %v4105_v61 = vpop.f32.mrf.mxu1  ;;  %v522_v5 = vmax.f32 %v462_v0, 0.0  ;;  %v486_v63 = vadd.f32 %v5233_v2, %v485_v26  ;;  %v530_v30 = vmax.f32 %v494_v27, 0.0 }
 0x13f   : > { %v433_v23 = vadd.f32 %v4089_v18, %v5233_v2  ;;  %4130 = vmatprep.mubr.bf16.mxu1 %v536_v12  ;;  %v512_v36 = vmax.f32 %v422_v20, 0.0  ;;  %v544_v11 = vpack.c.bf16 %v525_v1, %v524_v62  ;;  %v526_v20 = vmax.f32 %v478_v21, 0.0 }
 0x140   : > { %v424_v25 = vpop.f32.mrf.mxu0  ;;  %4131 = vmatmul.mubr.bf16.gmra.mxu1 %v537_v16  ;;  %v488_v7 = vpop.f32.mrf.mxu1  ;;  %v543_v14 = vpack.c.bf16 %v523_v6, %v522_v5  ;;  %v481_v16 = vadd.f32 %v4101_v19, %v5233_v2  ;;  %v528_v35 = vmax.f32 %v486_v63, 0.0  ;;  %v4655_v19 = vld [vmem:[#allocation5 + $0x58] sm:$0xff]  }
 0x141   : > { %v425_v28 = vadd.f32 %v5233_v2, %v424_v25  ;;  %v515_v3 = vmax.f32 %v433_v23, 0.0  ;;  %v489_v12 = vadd.f32 %v5233_v2, %v488_v7  ;;  %4166 = vmatprep.subr.bf16.mxu0 %v4655_v19 }
 0x142   : > { %v527_v23 = vmax.f32 %v481_v16, 0.0  ;;  %4167 = vmatpush3.bf16.msra.mxu0 %v4655_v19 }
 0x143   : > { %v513_v15 = vmax.f32 %v425_v28, 0.0  ;;  %v539_v47 = vpack.c.bf16 %v515_v3, %v514_v37  ;;  %v529_v18 = vmax.f32 %v489_v12, 0.0  ;;  %v497_v28 = vadd.f32 %v4105_v61, %v5233_v2  ;;  %v4658_v37 = vld [vmem:[#allocation5 + $0xc0] sm:$0xff]   ;;  %v4659_v2 = vld [vmem:[#allocation5 + $0xb8] sm:$0xff]  }
 0x144   : > { %v545_v25 = vpack.c.bf16 %v527_v23, %v526_v20 }
 0x145   : > { %v538_v39 = vpack.c.bf16 %v513_v15, %v512_v36  ;;  %v546_v24 = vpack.c.bf16 %v529_v18, %v528_v35  ;;  %v531_v3 = vmax.f32 %v497_v28, 0.0  ;;  %v4656_v36 = vld [vmem:[#allocation5 + $0x50] sm:$0xff]   ;;  %v4657_v15 = vld [vmem:[#allocation5 + $0xc8] sm:$0xff]  }
 0x146   : > { %4168 = vmatprep.subr.bf16.mxu0 %v4656_v36  ;;  %4202 = vmatprep.subr.bf16.mxu1 %v4657_v15 }
 0x147   : > { %4134 = vmatprep.mubr.bf16.mxu1 %v538_v39  ;;  %v547_v34 = vpack.c.bf16 %v531_v3, %v530_v30  ;;  %4169 = vmatpush3.bf16.msra.mxu0 %v4656_v36  ;;  %v4661_v39 = vld [vmem:[#allocation5 + $0xa8] sm:$0xff]  }
 0x148   : > { %4135 = vmatmul.mubr.bf16.gmra.mxu1 %v539_v47 }
 0x149   : > { %4138 = vmatprep.mubr.bf16.mxu1 %v540_v40  ;;  %4203 = vmatpush3.bf16.msra.mxu1 %v4657_v15  ;;  %v4662_v40 = vld [vmem:[#allocation5 + $0xa0] sm:$0xff]  }
 0x14a   : > { %4204 = vmatprep.subr.bf16.mxu1 %v4658_v37 }
 0x14d   : > { %4205 = vmatpush3.bf16.msra.mxu1 %v4658_v37 }
 0x14e   : > { %4206 = vmatprep.subr.bf16.mxu1 %v4659_v2 }
 0x150   : > { %4139 = vmatmul.mubr.bf16.gmra.mxu1 %v541_v60 }
 0x151   : > { %4142 = vmatprep.mubr.bf16.mxu1 %v542_v59  ;;  %4207 = vmatpush3.bf16.msra.mxu1 %v4659_v2 }
 0x152   : > { %4208 = vmatprep.subr.bf16.mxu1 %v4660_v38 }
 0x155   : > { %4209 = vmatpush3.bf16.msra.mxu1 %v4660_v38 }
 0x156   : > { %4210 = vmatprep.subr.bf16.mxu1 %v4661_v39 }
 0x158   : > { %4143 = vmatmul.mubr.bf16.gmra.mxu1 %v543_v14 }
 0x159   : > { %4146 = vmatprep.mubr.bf16.mxu1 %v544_v11  ;;  %4211 = vmatpush3.bf16.msra.mxu1 %v4661_v39 }
 0x15a   : > { %4212 = vmatprep.subr.bf16.mxu1 %v4662_v40 }
 0x15d   : > { %4213 = vmatpush3.bf16.msra.mxu1 %v4662_v40 }
 0x15e   : > { %4214 = vmatprep.subr.bf16.mxu1 %v4663_v42 }
 0x160   : > { %4147 = vmatmul.mubr.bf16.gmra.mxu1 %v545_v25 }
 0x161   : > { %4150 = vmatprep.mubr.bf16.mxu1 %v546_v24  ;;  %4215 = vmatpush3.bf16.msra.mxu1 %v4663_v42 }
 0x168   : > { %4151 = vmatmul.mubr.bf16.gmra.mxu1 %v547_v34 }
 0x1f0   : > { %v4124_v43 = vpop.f32.mrf.mxu1 }
 0x1f1   : > { %v660_v56 = vadd.f32 %v4124_v43, %v5280_v49 }
 0x1f2   : > { %v651_v47 = vpop.f32.mrf.mxu1 }
 0x1f3   : > { %v652_v51 = vadd.f32 %v5280_v49, %v651_v47  ;;  %v780_v0 = vmax.f32 %v660_v56, 0.0 }
 0x1f4   : > { %v4125_v50 = vpop.f32.mrf.mxu1 }
 0x1f5   : > { %v663_v52 = vadd.f32 %v4125_v50, %v5280_v49  ;;  %v778_v41 = vmax.f32 %v652_v51, 0.0 }
 0x1f6   : > { %v654_v57 = vpop.f32.mrf.mxu1 }
 0x1f7   : > { %v655_v26 = vadd.f32 %v5280_v49, %v654_v57  ;;  %v781_v58 = vmax.f32 %v663_v52, 0.0 }
 0x1f8   : > { %v4128_v59 = vpop.f32.mrf.mxu1 }
 0x1f9   : > { %v779_v60 = vmax.f32 %v655_v26, 0.0  ;;  %v811_v62 = vpack.c.bf16 %v781_v58, %v780_v0  ;;  %v676_v7 = vadd.f32 %v4128_v59, %v5280_v49 }
 0x1fa   : > { %v667_v8 = vpop.f32.mrf.mxu1 }
 0x1fb   : > { %v810_v61 = vpack.c.bf16 %v779_v60, %v778_v41  ;;  %v668_v5 = vadd.f32 %v5280_v49, %v667_v8  ;;  %v784_v35 = vmax.f32 %v676_v7, 0.0 }
 0x1fc   : > { %v4129_v1 = vpop.f32.mrf.mxu1 }
 0x1fd   : > { %v679_v6 = vadd.f32 %v4129_v1, %v5280_v49  ;;  %4170 = vmatprep.mubr.bf16.mxu0 %v810_v61  ;;  %v782_v21 = vmax.f32 %v668_v5, 0.0 }
 0x1fe   : > { %v670_v63 = vpop.f32.mrf.mxu1  ;;  %4171 = vmatmul.mubr.bf16.vlgmr.msra.gmra.mxu0 %v811_v62 }
 0x1ff   : > { %v671_v11 = vadd.f32 %v5280_v49, %v670_v63  ;;  %v785_v12 = vmax.f32 %v679_v6, 0.0 }
 0x200   : > { %v4132_v14 = vpop.f32.mrf.mxu1 }
 0x201   : > { %v783_v16 = vmax.f32 %v671_v11, 0.0  ;;  %v813_v23 = vpack.c.bf16 %v785_v12, %v784_v35  ;;  %v692_v28 = vadd.f32 %v4132_v14, %v5280_v49 }
 0x202   : > { %v683_v18 = vpop.f32.mrf.mxu1 }
 0x203   : > { %v812_v20 = vpack.c.bf16 %v783_v16, %v782_v21  ;;  %v684_v25 = vadd.f32 %v5280_v49, %v683_v18  ;;  %v788_v15 = vmax.f32 %v692_v28, 0.0 }
 0x204   : > { %v4133_v24 = vpop.f32.mrf.mxu1 }
 0x205   : > { %v695_v27 = vadd.f32 %v4133_v24, %v5280_v49  ;;  %4174 = vmatprep.mubr.bf16.mxu0 %v812_v20  ;;  %v786_v19 = vmax.f32 %v684_v25, 0.0 }
 0x206   : > { %v686_v30 = vpop.f32.mrf.mxu1  ;;  %4175 = vmatmul.mubr.bf16.gmra.mxu0 %v813_v23 }
 0x207   : > { %v687_v3 = vadd.f32 %v5280_v49, %v686_v30  ;;  %v789_v34 = vmax.f32 %v695_v27, 0.0 }
 0x208   : > { %v4136_v55 = vpop.f32.mrf.mxu1 }
 0x209   : > { %v787_v36 = vmax.f32 %v687_v3, 0.0  ;;  %v815_v38 = vpack.c.bf16 %v789_v34, %v788_v15  ;;  %v708_v43 = vadd.f32 %v4136_v55, %v5280_v49 }
 0x20a   : > { %v699_v37 = vpop.f32.mrf.mxu1 }
 0x20b   : > { %v814_v2 = vpack.c.bf16 %v787_v36, %v786_v19  ;;  %v700_v40 = vadd.f32 %v5280_v49, %v699_v37  ;;  %v792_v26 = vmax.f32 %v708_v43, 0.0 }
 0x20c   : > { %v4137_v39 = vpop.f32.mrf.mxu1 }
 0x20d   : > { %v711_v42 = vadd.f32 %v4137_v39, %v5280_v49  ;;  %4178 = vmatprep.mubr.bf16.mxu0 %v814_v2  ;;  %v790_v56 = vmax.f32 %v700_v40, 0.0 }
 0x20e   : > { %v702_v47 = vpop.f32.mrf.mxu1  ;;  %4179 = vmatmul.mubr.bf16.gmra.mxu0 %v815_v38 }
 0x20f   : > { %v703_v50 = vadd.f32 %v5280_v49, %v702_v47  ;;  %v793_v51 = vmax.f32 %v711_v42, 0.0 }
 0x210   : > { %v4140_v52 = vpop.f32.mrf.mxu1 }
 0x211   : > { %v791_v57 = vmax.f32 %v703_v50, 0.0  ;;  %v817_v41 = vpack.c.bf16 %v793_v51, %v792_v26  ;;  %v724_v61 = vadd.f32 %v4140_v52, %v5280_v49 }
 0x212   : > { %v715_v58 = vpop.f32.mrf.mxu1 }
 0x213   : > { %v816_v59 = vpack.c.bf16 %v791_v57, %v790_v56  ;;  %v716_v0 = vadd.f32 %v5280_v49, %v715_v58  ;;  %v796_v11 = vmax.f32 %v724_v61, 0.0 }
 0x214   : > { %v4141_v60 = vpop.f32.mrf.mxu1 }
 0x215   : > { %v727_v8 = vadd.f32 %v4141_v60, %v5280_v49  ;;  %4182 = vmatprep.mubr.bf16.mxu0 %v816_v59  ;;  %v794_v7 = vmax.f32 %v716_v0, 0.0 }
 0x216   : > { %v718_v62 = vpop.f32.mrf.mxu1  ;;  %4183 = vmatmul.mubr.bf16.gmra.mxu0 %v817_v41 }
 0x217   : > { %v719_v1 = vadd.f32 %v5280_v49, %v718_v62  ;;  %v797_v5 = vmax.f32 %v727_v8, 0.0 }
 0x218   : > { %v4144_v6 = vpop.f32.mrf.mxu1 }
 0x219   : > { %v795_v63 = vmax.f32 %v719_v1, 0.0  ;;  %v819_v21 = vpack.c.bf16 %v797_v5, %v796_v11  ;;  %v740_v20 = vadd.f32 %v4144_v6, %v5280_v49  ;;  %v4664_v6 = vld [vmem:[#allocation5 + $0x90] sm:$0xff]   ;;  %v4667_v11 = vld [vmem:[#allocation5 + $0xf8] sm:$0xff]  }
 0x21a   : > { %v731_v12 = vpop.f32.mrf.mxu1  ;;  %4216 = vmatprep.subr.bf16.mxu1 %v4664_v6 }
 0x21b   : > { %v818_v14 = vpack.c.bf16 %v795_v63, %v794_v7  ;;  %v732_v35 = vadd.f32 %v5280_v49, %v731_v12  ;;  %v800_v3 = vmax.f32 %v740_v20, 0.0  ;;  %4217 = vmatpush3.bf16.msra.mxu1 %v4664_v6  ;;  %v4665_v7 = vld [vmem:[#allocation5 + $0x108] sm:$0xff]   ;;  %v4666_v63 = vld [vmem:[#allocation5 + $0x100] sm:$0xff]  }
 0x21c   : > { %v4145_v16 = vpop.f32.mrf.mxu1  ;;  %4250 = vmatprep.subr.bf16.mxu0 %v4665_v7  ;;  %v4669_v12 = vld [vmem:[#allocation5 + $0xe8] sm:$0xff]  }
 0x21d   : > { %v743_v18 = vadd.f32 %v4145_v16, %v5280_v49  ;;  %4186 = vmatprep.mubr.bf16.mxu0 %v818_v14  ;;  %v798_v28 = vmax.f32 %v732_v35, 0.0  ;;  %4251 = vmatpush3.bf16.msra.mxu0 %v4665_v7  ;;  %v4670_v14 = vld [vmem:[#allocation5 + $0xe0] sm:$0xff]  }
 0x21e   : > { %v734_v23 = vpop.f32.mrf.mxu1  ;;  %4187 = vmatmul.mubr.bf16.gmra.mxu0 %v819_v21  ;;  %4252 = vmatprep.subr.bf16.mxu0 %v4666_v63  ;;  %v4671_v21 = vld [vmem:[#allocation5 + $0xd8] sm:$0xff]  }
 0x21f   : > { %v735_v24 = vadd.f32 %v5280_v49, %v734_v23  ;;  %v801_v25 = vmax.f32 %v743_v18, 0.0  ;;  %v5314_v18 = vld [vmem:[#allocation7 + $0x2] ss:$0 sm:$0xff] }
 0x220   : > { %v4148_v27 = vpop.f32.mrf.mxu1 }
 0x221   : > { %v799_v30 = vmax.f32 %v735_v24, 0.0  ;;  %v821_v19 = vpack.c.bf16 %v801_v25, %v800_v3  ;;  %v756_v2 = vadd.f32 %v4148_v27, %v5280_v49  ;;  %4253 = vmatpush3.bf16.msra.mxu0 %v4666_v63 }
 0x222   : > { %v747_v34 = vpop.f32.mrf.mxu1  ;;  %4254 = vmatprep.subr.bf16.mxu0 %v4667_v11 }
 0x223   : > { %v820_v55 = vpack.c.bf16 %v799_v30, %v798_v28  ;;  %v748_v15 = vadd.f32 %v5280_v49, %v747_v34  ;;  %v804_v50 = vmax.f32 %v756_v2, 0.0 }
 0x224   : > { %v4149_v36 = vpop.f32.mrf.mxu1 }
 0x225   : > { %v759_v37 = vadd.f32 %v4149_v36, %v5280_v49  ;;  %4190 = vmatprep.mubr.bf16.mxu0 %v820_v55  ;;  %v802_v43 = vmax.f32 %v748_v15, 0.0  ;;  %4255 = vmatpush3.bf16.msra.mxu0 %v4667_v11 }
 0x226   : > { %v750_v38 = vpop.f32.mrf.mxu1  ;;  %4191 = vmatmul.mubr.bf16.gmra.mxu0 %v821_v19 }
 0x227   : > { %v751_v39 = vadd.f32 %v5280_v49, %v750_v38  ;;  %v805_v40 = vmax.f32 %v759_v37, 0.0 }
 0x228   : > { %v4152_v42 = vpop.f32.mrf.mxu1 }
 0x229   : > { %v803_v47 = vmax.f32 %v751_v39, 0.0  ;;  %v823_v56 = vpack.c.bf16 %v805_v40, %v804_v50  ;;  %v772_v59 = vadd.f32 %v4152_v42, %v5280_v49 }
 0x22a   : > { %v763_v51 = vpop.f32.mrf.mxu1 }
 0x22b   : > { %v822_v52 = vpack.c.bf16 %v803_v47, %v802_v43  ;;  %v764_v26 = vadd.f32 %v5280_v49, %v763_v51  ;;  %v808_v62 = vmax.f32 %v772_v59, 0.0 }
 0x22c   : > { %v4153_v57 = vpop.f32.mrf.mxu1 }
 0x22d   : > { %v775_v58 = vadd.f32 %v4153_v57, %v5280_v49  ;;  %4194 = vmatprep.mubr.bf16.mxu0 %v822_v52  ;;  %v806_v8 = vmax.f32 %v764_v26, 0.0 }
 0x22e   : > { %v766_v41 = vpop.f32.mrf.mxu1  ;;  %4195 = vmatmul.mubr.bf16.gmra.mxu0 %v823_v56 }
 0x22f   : > { %v767_v60 = vadd.f32 %v5280_v49, %v766_v41  ;;  %v809_v0 = vmax.f32 %v775_v58, 0.0  ;;  %v4668_v49 = vld [vmem:[#allocation5 + $0xf0] sm:$0xff]  }
 0x230   : > { %4256 = vmatprep.subr.bf16.mxu0 %v4668_v49 }
 0x231   : > { %v807_v61 = vmax.f32 %v767_v60, 0.0  ;;  %v825_v5 = vpack.c.bf16 %v809_v0, %v808_v62  ;;  %4257 = vmatpush3.bf16.msra.mxu0 %v4668_v49 }
 0x232   : > { %4258 = vmatprep.subr.bf16.mxu0 %v4669_v12 }
 0x233   : > { %v824_v1 = vpack.c.bf16 %v807_v61, %v806_v8 }
 0x235   : > { %4198 = vmatprep.mubr.bf16.mxu0 %v824_v1  ;;  %4259 = vmatpush3.bf16.msra.mxu0 %v4669_v12 }
 0x236   : > { %4199 = vmatmul.mubr.bf16.gmra.mxu0 %v825_v5  ;;  %4260 = vmatprep.subr.bf16.mxu0 %v4670_v14 }
 0x239   : > { %4261 = vmatpush3.bf16.msra.mxu0 %v4670_v14 }
 0x23a   : > { %4262 = vmatprep.subr.bf16.mxu0 %v4671_v21 }
 0x23d   : > { %4263 = vmatpush3.bf16.msra.mxu0 %v4671_v21 }
 0x2be   : > { %v4172_v16 = vpop.f32.mrf.mxu0 }
 0x2bf   : > { %v938_v25 = vadd.f32 %v4172_v16, %v5314_v18 }
 0x2c0   : > { %v929_v35 = vpop.f32.mrf.mxu0 }
 0x2c1   : > { %v930_v23 = vadd.f32 %v5314_v18, %v929_v35  ;;  %v1058_v19 = vmax.f32 %v938_v25, 0.0 }
 0x2c2   : > { %v4173_v20 = vpop.f32.mrf.mxu0 }
 0x2c3   : > { %v941_v24 = vadd.f32 %v4173_v20, %v5314_v18  ;;  %v1056_v34 = vmax.f32 %v930_v23, 0.0 }
 0x2c4   : > { %v932_v27 = vpop.f32.mrf.mxu0 }
 0x2c5   : > { %v933_v28 = vadd.f32 %v5314_v18, %v932_v27  ;;  %v1059_v30 = vmax.f32 %v941_v24, 0.0 }
 0x2c6   : > { %v4176_v3 = vpop.f32.mrf.mxu0 }
 0x2c7   : > { %v1057_v55 = vmax.f32 %v933_v28, 0.0  ;;  %v1089_v37 = vpack.c.bf16 %v1059_v30, %v1058_v19  ;;  %v954_v40 = vadd.f32 %v4176_v3, %v5314_v18 }
 0x2c8   : > { %v945_v36 = vpop.f32.mrf.mxu0 }
 0x2c9   : > { %v1088_v15 = vpack.c.bf16 %v1057_v55, %v1056_v34  ;;  %v946_v38 = vadd.f32 %v5314_v18, %v945_v36  ;;  %v1062_v56 = vmax.f32 %v954_v40, 0.0 }
 0x2ca   : > { %v4177_v2 = vpop.f32.mrf.mxu0 }
 0x2cb   : > { %v957_v39 = vadd.f32 %v4177_v2, %v5314_v18  ;;  %4218 = vmatprep.mubr.bf16.mxu1 %v1088_v15  ;;  %v1060_v51 = vmax.f32 %v946_v38, 0.0 }
 0x2cc   : > { %v948_v42 = vpop.f32.mrf.mxu0  ;;  %4219 = vmatmul.mubr.bf16.vlgmr.msra.gmra.mxu1 %v1089_v37 }
 0x2cd   : > { %v949_v43 = vadd.f32 %v5314_v18, %v948_v42  ;;  %v1063_v47 = vmax.f32 %v957_v39, 0.0 }
 0x2ce   : > { %v4180_v50 = vpop.f32.mrf.mxu0 }
 0x2cf   : > { %v1061_v52 = vmax.f32 %v949_v43, 0.0  ;;  %v1091_v58 = vpack.c.bf16 %v1063_v47, %v1062_v56  ;;  %v970_v0 = vadd.f32 %v4180_v50, %v5314_v18 }
 0x2d0   : > { %v961_v57 = vpop.f32.mrf.mxu0 }
 0x2d1   : > { %v1090_v26 = vpack.c.bf16 %v1061_v52, %v1060_v51  ;;  %v962_v41 = vadd.f32 %v5314_v18, %v961_v57  ;;  %v1066_v7 = vmax.f32 %v970_v0, 0.0 }
 0x2d2   : > { %v4181_v59 = vpop.f32.mrf.mxu0 }
 0x2d3   : > { %v973_v60 = vadd.f32 %v4181_v59, %v5314_v18  ;;  %4222 = vmatprep.mubr.bf16.mxu1 %v1090_v26  ;;  %v1064_v5 = vmax.f32 %v962_v41, 0.0 }
 0x2d4   : > { %v964_v8 = vpop.f32.mrf.mxu0  ;;  %4223 = vmatmul.mubr.bf16.gmra.mxu1 %v1091_v58 }
 0x2d5   : > { %v965_v61 = vadd.f32 %v5314_v18, %v964_v8  ;;  %v1067_v62 = vmax.f32 %v973_v60, 0.0 }
 0x2d6   : > { %v4184_v1 = vpop.f32.mrf.mxu0 }
 0x2d7   : > { %v1065_v6 = vmax.f32 %v965_v61, 0.0  ;;  %v1093_v49 = vpack.c.bf16 %v1067_v62, %v1066_v7  ;;  %v986_v16 = vadd.f32 %v4184_v1, %v5314_v18 }
 0x2d8   : > { %v977_v63 = vpop.f32.mrf.mxu0 }
 0x2d9   : > { %v1092_v11 = vpack.c.bf16 %v1065_v6, %v1064_v5  ;;  %v978_v14 = vadd.f32 %v5314_v18, %v977_v63  ;;  %v1070_v28 = vmax.f32 %v986_v16, 0.0 }
 0x2da   : > { %v4185_v12 = vpop.f32.mrf.mxu0 }
 0x2db   : > { %v989_v21 = vadd.f32 %v4185_v12, %v5314_v18  ;;  %4226 = vmatprep.mubr.bf16.mxu1 %v1092_v11  ;;  %v1068_v25 = vmax.f32 %v978_v14, 0.0 }
 0x2dc   : > { %v980_v35 = vpop.f32.mrf.mxu0  ;;  %4227 = vmatmul.mubr.bf16.gmra.mxu1 %v1093_v49 }
 0x2dd   : > { %v981_v20 = vadd.f32 %v5314_v18, %v980_v35  ;;  %v1071_v23 = vmax.f32 %v989_v21, 0.0 }
 0x2de   : > { %v4188_v24 = vpop.f32.mrf.mxu0 }
 0x2df   : > { %v1069_v27 = vmax.f32 %v981_v20, 0.0  ;;  %v1095_v34 = vpack.c.bf16 %v1071_v23, %v1070_v28  ;;  %v1002_v15 = vadd.f32 %v4188_v24, %v5314_v18 }
 0x2e0   : > { %v993_v30 = vpop.f32.mrf.mxu0 }
 0x2e1   : > { %v1094_v3 = vpack.c.bf16 %v1069_v27, %v1068_v25  ;;  %v994_v19 = vadd.f32 %v5314_v18, %v993_v30  ;;  %v1074_v43 = vmax.f32 %v1002_v15, 0.0 }
 0x2e2   : > { %v4189_v55 = vpop.f32.mrf.mxu0 }
 0x2e3   : > { %v1005_v36 = vadd.f32 %v4189_v55, %v5314_v18  ;;  %4230 = vmatprep.mubr.bf16.mxu1 %v1094_v3  ;;  %v1072_v40 = vmax.f32 %v994_v19, 0.0 }
 0x2e4   : > { %v996_v37 = vpop.f32.mrf.mxu0  ;;  %4231 = vmatmul.mubr.bf16.gmra.mxu1 %v1095_v34 }
 0x2e5   : > { %v997_v2 = vadd.f32 %v5314_v18, %v996_v37  ;;  %v1075_v38 = vmax.f32 %v1005_v36, 0.0 }
 0x2e6   : > { %v4192_v39 = vpop.f32.mrf.mxu0 }
 0x2e7   : > { %v1073_v42 = vmax.f32 %v997_v2, 0.0  ;;  %v1097_v51 = vpack.c.bf16 %v1075_v38, %v1074_v43  ;;  %v1018_v26 = vadd.f32 %v4192_v39, %v5314_v18  ;;  %v4672_v39 = vld [vmem:[#allocation5 + $0xd0] sm:$0xff]   ;;  %v5348_v43 = vld [vmem:[#allocation7 + $0x3] ss:$0 sm:$0xff] }
 0x2e8   : > { %v1009_v47 = vpop.f32.mrf.mxu0  ;;  %4264 = vmatprep.subr.bf16.mxu0 %v4672_v39 }
 0x2e9   : > { %v1096_v50 = vpack.c.bf16 %v1073_v42, %v1072_v40  ;;  %v1010_v56 = vadd.f32 %v5314_v18, %v1009_v47  ;;  %v1078_v61 = vmax.f32 %v1018_v26, 0.0  ;;  %4265 = vmatpush3.bf16.msra.mxu0 %v4672_v39 }
 0x2ea   : > { %v4193_v52 = vpop.f32.mrf.mxu0 }
 0x2eb   : > { %v1021_v57 = vadd.f32 %v4193_v52, %v5314_v18  ;;  %4234 = vmatprep.mubr.bf16.mxu1 %v1096_v50  ;;  %v1076_v0 = vmax.f32 %v1010_v56, 0.0 }
 0x2ec   : > { %v1012_v58 = vpop.f32.mrf.mxu0  ;;  %4235 = vmatmul.mubr.bf16.gmra.mxu1 %v1097_v51 }
 0x2ed   : > { %v1013_v59 = vadd.f32 %v5314_v18, %v1012_v58  ;;  %v1079_v41 = vmax.f32 %v1021_v57, 0.0 }
 0x2ee   : > { %v4196_v60 = vpop.f32.mrf.mxu0 }
 0x2ef   : > { %v1077_v8 = vmax.f32 %v1013_v59, 0.0  ;;  %v1099_v5 = vpack.c.bf16 %v1079_v41, %v1078_v61  ;;  %v1034_v11 = vadd.f32 %v4196_v60, %v5314_v18 }
 0x2f0   : > { %v1025_v62 = vpop.f32.mrf.mxu0 }
 0x2f1   : > { %v1098_v1 = vpack.c.bf16 %v1077_v8, %v1076_v0  ;;  %v1026_v7 = vadd.f32 %v5314_v18, %v1025_v62  ;;  %v1082_v20 = vmax.f32 %v1034_v11, 0.0 }
 0x2f2   : > { %v4197_v6 = vpop.f32.mrf.mxu0 }
 0x2f3   : > { %v1037_v63 = vadd.f32 %v4197_v6, %v5314_v18  ;;  %4238 = vmatprep.mubr.bf16.mxu1 %v1098_v1  ;;  %v1080_v16 = vmax.f32 %v1026_v7, 0.0 }
 0x2f4   : > { %v1028_v49 = vpop.f32.mrf.mxu0  ;;  %4239 = vmatmul.mubr.bf16.gmra.mxu1 %v1099_v5 }
 0x2f5   : > { %v1029_v12 = vadd.f32 %v5314_v18, %v1028_v49  ;;  %v1083_v14 = vmax.f32 %v1037_v63, 0.0 }
 0x2f6   : > { %v4200_v21 = vpop.f32.mrf.mxu0 }
 0x2f7   : > { %v1081_v35 = vmax.f32 %v1029_v12, 0.0  ;;  %v1101_v25 = vpack.c.bf16 %v1083_v14, %v1082_v20  ;;  %v1050_v3 = vadd.f32 %v4200_v21, %v5314_v18 }
 0x2f8   : > { %v1041_v23 = vpop.f32.mrf.mxu0 }
 0x2f9   : > { %v1100_v24 = vpack.c.bf16 %v1081_v35, %v1080_v16  ;;  %v1042_v28 = vadd.f32 %v5314_v18, %v1041_v23  ;;  %v1086_v37 = vmax.f32 %v1050_v3, 0.0 }
 0x2fa   : > { %v4201_v27 = vpop.f32.mrf.mxu0 }
 0x2fb   : > { %v1053_v30 = vadd.f32 %v4201_v27, %v5314_v18  ;;  %4242 = vmatprep.mubr.bf16.mxu1 %v1100_v24  ;;  %v1084_v36 = vmax.f32 %v1042_v28, 0.0 }
 0x2fc   : > { %v1044_v34 = vpop.f32.mrf.mxu0  ;;  %4243 = vmatmul.mubr.bf16.gmra.mxu1 %v1101_v25 }
 0x2fd   : > { %v1045_v55 = vadd.f32 %v5314_v18, %v1044_v34  ;;  %v1087_v19 = vmax.f32 %v1053_v30, 0.0 }
 0x2ff   : > { %v1085_v15 = vmax.f32 %v1045_v55, 0.0  ;;  %v1103_v38 = vpack.c.bf16 %v1087_v19, %v1086_v37 }
 0x301   : > { %v1102_v2 = vpack.c.bf16 %v1085_v15, %v1084_v36 }
 0x303   : > { %4246 = vmatprep.mubr.bf16.mxu1 %v1102_v2 }
 0x304   : > { %4247 = vmatmul.mubr.bf16.gmra.mxu1 %v1103_v38 }
 0x305   : > { %4300 = vmatprep.mubr.msk.bf16.mxu1 %vm1933_vm1, %v5137_v4 }
 0x38c   : > { %v4220_v40 = vpop.f32.mrf.mxu1 }
 0x38d   : > { %v1216_v51 = vadd.f32 %v4220_v40, %v5348_v43 }
 0x38e   : > { %v1207_v42 = vpop.f32.mrf.mxu1 }
 0x38f   : > { %v1208_v50 = vadd.f32 %v5348_v43, %v1207_v42  ;;  %v1336_v41 = vmax.f32 %v1216_v51, 0.0 }
 0x390   : > { %v4221_v47 = vpop.f32.mrf.mxu1 }
 0x391   : > { %v1219_v18 = vadd.f32 %v4221_v47, %v5348_v43  ;;  %v1334_v58 = vmax.f32 %v1208_v50, 0.0 }
 0x392   : > { %v1210_v52 = vpop.f32.mrf.mxu1 }
 0x393   : > { %v1211_v56 = vadd.f32 %v5348_v43, %v1210_v52  ;;  %v1337_v57 = vmax.f32 %v1219_v18, 0.0 }
 0x394   : > { %v4224_v26 = vpop.f32.mrf.mxu1 }
 0x395   : > { %v1335_v59 = vmax.f32 %v1211_v56, 0.0  ;;  %v1367_v8 = vpack.c.bf16 %v1337_v57, %v1336_v41  ;;  %v1232_v5 = vadd.f32 %v4224_v26, %v5348_v43 }
 0x396   : > { %v1223_v60 = vpop.f32.mrf.mxu1 }
 0x397   : > { %v1366_v0 = vpack.c.bf16 %v1335_v59, %v1334_v58  ;;  %v1224_v62 = vadd.f32 %v5348_v43, %v1223_v60  ;;  %v1340_v14 = vmax.f32 %v1232_v5, 0.0 }
 0x398   : > { %v4225_v61 = vpop.f32.mrf.mxu1 }
 0x399   : > { %v1235_v1 = vadd.f32 %v4225_v61, %v5348_v43  ;;  %4266 = vmatprep.mubr.bf16.mxu0 %v1366_v0  ;;  %v1338_v49 = vmax.f32 %v1224_v62, 0.0 }
 0x39a   : > { %v1226_v6 = vpop.f32.mrf.mxu1  ;;  %4267 = vmatmul.mubr.bf16.vlgmr.msra.gmra.mxu0 %v1367_v8 }
 0x39b   : > { %v1227_v7 = vadd.f32 %v5348_v43, %v1226_v6  ;;  %v1341_v63 = vmax.f32 %v1235_v1, 0.0 }
 0x39c   : > { %v4228_v11 = vpop.f32.mrf.mxu1 }
 0x39d   : > { %v1339_v12 = vmax.f32 %v1227_v7, 0.0  ;;  %v1369_v35 = vpack.c.bf16 %v1341_v63, %v1340_v14  ;;  %v1248_v25 = vadd.f32 %v4228_v11, %v5348_v43 }
 0x39e   : > { %v1239_v21 = vpop.f32.mrf.mxu1 }
 0x39f   : > { %v1368_v16 = vpack.c.bf16 %v1339_v12, %v1338_v49  ;;  %v1240_v23 = vadd.f32 %v5348_v43, %v1239_v21  ;;  %v1344_v19 = vmax.f32 %v1248_v25, 0.0 }
 0x3a0   : > { %v4229_v20 = vpop.f32.mrf.mxu1 }
 0x3a1   : > { %v1251_v24 = vadd.f32 %v4229_v20, %v5348_v43  ;;  %4270 = vmatprep.mubr.bf16.mxu0 %v1368_v16  ;;  %v1342_v34 = vmax.f32 %v1240_v23, 0.0 }
 0x3a2   : > { %v1242_v27 = vpop.f32.mrf.mxu1  ;;  %4271 = vmatmul.mubr.bf16.gmra.mxu0 %v1369_v35 }
 0x3a3   : > { %v1243_v28 = vadd.f32 %v5348_v43, %v1242_v27  ;;  %v1345_v30 = vmax.f32 %v1251_v24, 0.0 }
 0x3a4   : > { %v4232_v3 = vpop.f32.mrf.mxu1 }
 0x3a5   : > { %v1343_v55 = vmax.f32 %v1243_v28, 0.0  ;;  %v1371_v37 = vpack.c.bf16 %v1345_v30, %v1344_v19  ;;  %v1264_v40 = vadd.f32 %v4232_v3, %v5348_v43 }
 0x3a6   : > { %v1255_v36 = vpop.f32.mrf.mxu1 }
 0x3a7   : > { %v1370_v15 = vpack.c.bf16 %v1343_v55, %v1342_v34  ;;  %v1256_v38 = vadd.f32 %v5348_v43, %v1255_v36  ;;  %v1348_v56 = vmax.f32 %v1264_v40, 0.0 }
 0x3a8   : > { %v4233_v2 = vpop.f32.mrf.mxu1 }
 0x3a9   : > { %v1267_v39 = vadd.f32 %v4233_v2, %v5348_v43  ;;  %4274 = vmatprep.mubr.bf16.mxu0 %v1370_v15  ;;  %v1346_v51 = vmax.f32 %v1256_v38, 0.0 }
 0x3aa   : > { %v1258_v42 = vpop.f32.mrf.mxu1  ;;  %4275 = vmatmul.mubr.bf16.gmra.mxu0 %v1371_v37 }
 0x3ab   : > { %v1259_v47 = vadd.f32 %v5348_v43, %v1258_v42  ;;  %v1349_v50 = vmax.f32 %v1267_v39, 0.0 }
 0x3ac   : > { %v4236_v18 = vpop.f32.mrf.mxu1 }
 0x3ad   : > { %v1347_v52 = vmax.f32 %v1259_v47, 0.0  ;;  %v1373_v58 = vpack.c.bf16 %v1349_v50, %v1348_v56  ;;  %v1280_v0 = vadd.f32 %v4236_v18, %v5348_v43 }
 0x3ae   : > { %v1271_v57 = vpop.f32.mrf.mxu1 }
 0x3af   : > { %v1372_v26 = vpack.c.bf16 %v1347_v52, %v1346_v51  ;;  %v1272_v41 = vadd.f32 %v5348_v43, %v1271_v57  ;;  %v1352_v7 = vmax.f32 %v1280_v0, 0.0 }
 0x3b0   : > { %v4237_v59 = vpop.f32.mrf.mxu1 }
 0x3b1   : > { %v1283_v60 = vadd.f32 %v4237_v59, %v5348_v43  ;;  %4278 = vmatprep.mubr.bf16.mxu0 %v1372_v26  ;;  %v1350_v5 = vmax.f32 %v1272_v41, 0.0 }
 0x3b2   : > { %v1274_v8 = vpop.f32.mrf.mxu1  ;;  %4279 = vmatmul.mubr.bf16.gmra.mxu0 %v1373_v58 }
 0x3b3   : > { %v1275_v61 = vadd.f32 %v5348_v43, %v1274_v8  ;;  %v1353_v62 = vmax.f32 %v1283_v60, 0.0 }
 0x3b4   : > { %v4240_v1 = vpop.f32.mrf.mxu1 }
 0x3b5   : > { %v1351_v6 = vmax.f32 %v1275_v61, 0.0  ;;  %v1375_v49 = vpack.c.bf16 %v1353_v62, %v1352_v7  ;;  %v1296_v16 = vadd.f32 %v4240_v1, %v5348_v43  ;;  %v5382_v1 = vld [vmem:[#allocation7 + $0x4] ss:$0 sm:$0xff] }
 0x3b6   : > { %v1287_v63 = vpop.f32.mrf.mxu1 }
 0x3b7   : > { %v1374_v11 = vpack.c.bf16 %v1351_v6, %v1350_v5  ;;  %v1288_v14 = vadd.f32 %v5348_v43, %v1287_v63  ;;  %v1356_v28 = vmax.f32 %v1296_v16, 0.0 }
 0x3b8   : > { %v4241_v12 = vpop.f32.mrf.mxu1 }
 0x3b9   : > { %v1299_v21 = vadd.f32 %v4241_v12, %v5348_v43  ;;  %4282 = vmatprep.mubr.bf16.mxu0 %v1374_v11  ;;  %v1354_v25 = vmax.f32 %v1288_v14, 0.0 }
 0x3ba   : > { %v1290_v35 = vpop.f32.mrf.mxu1  ;;  %4283 = vmatmul.mubr.bf16.gmra.mxu0 %v1375_v49 }
 0x3bb   : > { %v1291_v20 = vadd.f32 %v5348_v43, %v1290_v35  ;;  %v1357_v23 = vmax.f32 %v1299_v21, 0.0 }
 0x3bc   : > { %v4244_v24 = vpop.f32.mrf.mxu1 }
 0x3bd   : > { %v1355_v27 = vmax.f32 %v1291_v20, 0.0  ;;  %v1377_v34 = vpack.c.bf16 %v1357_v23, %v1356_v28  ;;  %v1312_v15 = vadd.f32 %v4244_v24, %v5348_v43 }
 0x3be   : > { %v1303_v30 = vpop.f32.mrf.mxu1 }
 0x3bf   : > { %v1376_v3 = vpack.c.bf16 %v1355_v27, %v1354_v25  ;;  %v1304_v19 = vadd.f32 %v5348_v43, %v1303_v30  ;;  %v1360_v47 = vmax.f32 %v1312_v15, 0.0 }
 0x3c0   : > { %v4245_v55 = vpop.f32.mrf.mxu1 }
 0x3c1   : > { %v1315_v36 = vadd.f32 %v4245_v55, %v5348_v43  ;;  %4286 = vmatprep.mubr.bf16.mxu0 %v1376_v3  ;;  %v1358_v40 = vmax.f32 %v1304_v19, 0.0 }
 0x3c2   : > { %v1306_v37 = vpop.f32.mrf.mxu1  ;;  %4287 = vmatmul.mubr.bf16.gmra.mxu0 %v1377_v34 }
 0x3c3   : > { %v1307_v2 = vadd.f32 %v5348_v43, %v1306_v37  ;;  %v1361_v38 = vmax.f32 %v1315_v36, 0.0 }
 0x3c4   : > { %v4248_v39 = vpop.f32.mrf.mxu1 }
 0x3c5   : > { %v1359_v42 = vmax.f32 %v1307_v2, 0.0  ;;  %v1379_v51 = vpack.c.bf16 %v1361_v38, %v1360_v47  ;;  %v1328_v26 = vadd.f32 %v4248_v39, %v5348_v43 }
 0x3c6   : > { %v1319_v50 = vpop.f32.mrf.mxu1 }
 0x3c7   : > { %v1378_v18 = vpack.c.bf16 %v1359_v42, %v1358_v40  ;;  %v1320_v56 = vadd.f32 %v5348_v43, %v1319_v50  ;;  %v1364_v8 = vmax.f32 %v1328_v26, 0.0 }
 0x3c8   : > { %v4249_v52 = vpop.f32.mrf.mxu1 }
 0x3c9   : > { %v1331_v57 = vadd.f32 %v4249_v52, %v5348_v43  ;;  %4290 = vmatprep.mubr.bf16.mxu0 %v1378_v18  ;;  %v1362_v60 = vmax.f32 %v1320_v56, 0.0 }
 0x3ca   : > { %v1322_v58 = vpop.f32.mrf.mxu1  ;;  %4291 = vmatmul.mubr.bf16.gmra.mxu0 %v1379_v51 }
 0x3cb   : > { %v1323_v59 = vadd.f32 %v5348_v43, %v1322_v58  ;;  %v1365_v41 = vmax.f32 %v1331_v57, 0.0 }
 0x3cd   : > { %v1363_v0 = vmax.f32 %v1323_v59, 0.0  ;;  %v1381_v62 = vpack.c.bf16 %v1365_v41, %v1364_v8 }
 0x3cf   : > { %v1380_v61 = vpack.c.bf16 %v1363_v0, %v1362_v60 }
 0x3d1   : > { %4294 = vmatprep.mubr.bf16.mxu0 %v1380_v61 }
 0x3d2   : > { %4295 = vmatmul.mubr.bf16.gmra.mxu0 %v1381_v62 }
 0x45a   : > { %v4268_v5 = vpop.f32.mrf.mxu0 }
 0x45b   : > { %v5385_v6 = vadd.f32 %v4268_v5, %v5382_v1 }
 0x45c   : > { %v1485_v7 = vpop.f32.mrf.mxu0 }
 0x45d   : > { %v5388_v63 = vadd.f32 %v5382_v1, %v1485_v7  ;;  %1776 = vrot.lane.b32.xlu1 %v5385_v6, %s4961_s18 }
 0x45e   : > { %v4269_v43 = vpop.f32.mrf.mxu0 }
 0x45f   : > { %v5393_v11 = vadd.f32 %v4269_v43, %v5382_v1  ;;  %1772 = vrot.lane.b32.xlu0 %v5388_v63, %s4961_s18 }
 0x460   : > { %v1488_v49 = vpop.f32.mrf.mxu0 }
 0x461   : > { %v5398_v12 = vadd.f32 %v5382_v1, %v1488_v49  ;;  %1778 = vrot.lane.b32.xlu1 %v5393_v11, %s4961_s18 }
 0x462   : > { %v4272_v14 = vpop.f32.mrf.mxu0 }
 0x463   : > { %1774 = vrot.lane.b32.xlu0 %v5398_v12, %s4961_s18  ;;  %v5410_v23 = vadd.f32 %v4272_v14, %v5382_v1 }
 0x464   : > { %v1501_v21 = vpop.f32.mrf.mxu0 }
 0x465   : > { %v5405_v16 = vadd.f32 %v5382_v1, %v1501_v21 }
 0x466   : > { %v4273_v35 = vpop.f32.mrf.mxu0 }
 0x467   : > { %1780 = vrot.lane.b32.xlu0 %v5405_v16, %s4961_s18  ;;  %v5420_v28 = vadd.f32 %v4273_v35, %v5382_v1  ;;  %v4673_v35 = vld [vmem:[#allocation5 + $0x120] sm:$0xff]  }
 0x468   : > { %v1504_v20 = vpop.f32.mrf.mxu0  ;;  %4298 = vmatprep.subr.bf16.mxu1 %v4673_v35 }
 0x469   : > { %v5413_v24 = vadd.f32 %v5382_v1, %v1504_v20  ;;  %v4674_v20 = vld [vmem:[#allocation5 + $0x118] sm:$0xff]   ;;  %4299 = vmatpush3.bf16.msra.mxu1 %v4673_v35 }
 0x46a   : > { %v4276_v25 = vpop.f32.mrf.mxu0  ;;  %4332 = vmatprep.subr.bf16.mxu0 %v4674_v20 }
 0x46b   : > { %1782 = vrot.lane.b32.xlu1 %v5413_v24, %s4961_s18  ;;  %1784 = vrot.lane.b32.xlu0 %v5410_v23, %s4961_s18  ;;  %v5430_v55 = vadd.f32 %v4276_v25, %v5382_v1 }
 0x46c   : > { %v1517_v27 = vpop.f32.mrf.mxu0  ;;  %4333 = vmatpush3.bf16.msra.mxu0 %v4674_v20  ;;  %4301 = vmatmul.mubr.msk.bf16.vlgmr.msra.gmra.mxu1 %vm1933_vm1, %v5145_v9  ;;  %v1614_v9 = vmul.f32 0.5, %v5385_v6 }
 0x46d   : > { %v5423_v30 = vadd.f32 %v5382_v1, %v1517_v27  ;;  %4304 = vmatprep.mubr.msk.bf16.mxu1 %vm1933_vm1, %v5147_v10  ;;  %v1612_v10 = vmul.f32 0.5, %v5388_v63 }
 0x46e   : > { %v4277_v3 = vpop.f32.mrf.mxu0 }
 0x46f   : > { %1786 = vrot.lane.b32.xlu1 %v5420_v28, %s4961_s18  ;;  %1788 = vrot.lane.b32.xlu0 %v5423_v30, %s4961_s18  ;;  %v5440_v37 = vadd.f32 %v4277_v3, %v5382_v1 }
 0x470   : > { %v1520_v34 = vpop.f32.mrf.mxu0 }
 0x471   : > { %v5433_v19 = vadd.f32 %v5382_v1, %v1520_v34 }
 0x472   : > { %v4280_v36 = vpop.f32.mrf.mxu0 }
 0x473   : > { %1790 = vrot.lane.b32.xlu1 %v5433_v19, %s4961_s18  ;;  %1792 = vrot.lane.b32.xlu0 %v5430_v55, %s4961_s18  ;;  %v5450_v40 = vadd.f32 %v4280_v36, %v5382_v1 }
 0x474   : > { %v1533_v15 = vpop.f32.mrf.mxu0  ;;  %4305 = vmatmul.mubr.msk.bf16.gmra.mxu1 %vm1933_vm1, %v5179_v29  ;;  %v1615_v29 = vmul.f32 0.5, %v5393_v11 }
 0x475   : > { %v5443_v2 = vadd.f32 %v5382_v1, %v1533_v15  ;;  %4308 = vmatprep.mubr.msk.bf16.mxu1 %vm1933_vm1, %v5181_v31  ;;  %v1613_v31 = vmul.f32 0.5, %v5398_v12 }
 0x476   : > { %v4281_v38 = vpop.f32.mrf.mxu0 }
 0x477   : > { %1794 = vrot.lane.b32.xlu1 %v5440_v37, %s4961_s18  ;;  %1796 = vrot.lane.b32.xlu0 %v5443_v2, %s4961_s18  ;;  %v5460_v18 = vadd.f32 %v4281_v38, %v5382_v1 }
 0x478   : > { %v1536_v39 = vpop.f32.mrf.mxu0 }
 0x479   : > { %v5453_v42 = vadd.f32 %v5382_v1, %v1536_v39  ;;  %v4675_v39 = vld [vmem:[#allocation5 + $0x110] sm:$0xff]  }
 0x47a   : > { %v4284_v47 = vpop.f32.mrf.mxu0  ;;  %4334 = vmatprep.subr.bf16.mxu0 %v4675_v39 }
 0x47b   : > { %1798 = vrot.lane.b32.xlu1 %v5453_v42, %s4961_s18  ;;  %1800 = vrot.lane.b32.xlu0 %v5450_v40, %s4961_s18  ;;  %v5470_v57 = vadd.f32 %v4284_v47, %v5382_v1 }
 0x47c   : > { %v1549_v50 = vpop.f32.mrf.mxu0  ;;  %4335 = vmatpush3.bf16.msra.mxu0 %v4675_v39  ;;  %4309 = vmatmul.mubr.msk.bf16.gmra.mxu1 %vm1933_vm1, %v5203_v44  ;;  %v1648_v44 = vmul.f32 1.442695, %v1614_v9  ;;  %v4772_v39 = vld [vmem:[%s5125_s30 + $0x10] sm:$0xff]  ;;  %v4773_v9 = vld [vmem:[%s5125_s30] sm:$0xff] }
 0x47d   : > { %v5463_v51 = vadd.f32 %v5382_v1, %v1549_v50  ;;  %4312 = vmatprep.mubr.msk.bf16.mxu1 %vm1933_vm1, %v5205_v45  ;;  %v1644_v45 = vmul.f32 1.442695, %v1612_v10 }
 0x47e   : > { %v4285_v52 = vpop.f32.mrf.mxu0  ;;  %4708 = vpow2.f32 %v1648_v44 }
 0x47f   : > { %1802 = vrot.lane.b32.xlu1 %v5460_v18, %s4961_s18  ;;  %1804 = vrot.lane.b32.xlu0 %v5463_v51, %s4961_s18  ;;  %v5480_v41 = vadd.f32 %v4285_v52, %v5382_v1  ;;  %4710 = vpow2.f32 %v1644_v45  ;;  %v1624_v45 = vmul.f32 0.5, %v5443_v2 }
 0x480   : > { %v1552_v56 = vpop.f32.mrf.mxu0 }
 0x481   : > { %v5473_v26 = vadd.f32 %v5382_v1, %v1552_v56 }
 0x482   : > { %v4288_v58 = vpop.f32.mrf.mxu0 }
 0x483   : > { %1806 = vrot.lane.b32.xlu1 %v5473_v26, %s4961_s18  ;;  %1808 = vrot.lane.b32.xlu0 %v5470_v57, %s4961_s18  ;;  %v5490_v61 = vadd.f32 %v4288_v58, %v5382_v1  ;;  %v1619_v58 = vmul.f32 0.5, %v5420_v28 }
 0x484   : > { %v1565_v59 = vpop.f32.mrf.mxu0  ;;  %4313 = vmatmul.mubr.msk.bf16.gmra.mxu1 %vm1933_vm1, %v5223_v53  ;;  %v1650_v53 = vmul.f32 1.442695, %v1615_v29  ;;  %v4774_v29 = vld [vmem:[%s5125_s30 + $0x18] sm:$0xff] }
 0x485   : > { %v5483_v60 = vadd.f32 %v5382_v1, %v1565_v59  ;;  %4316 = vmatprep.mubr.msk.bf16.mxu1 %vm1933_vm1, %v5151_v13  ;;  %v1616_v13 = vmul.f32 0.5, %v5405_v16 }
 0x486   : > { %v4289_v0 = vpop.f32.mrf.mxu0  ;;  %4712 = vpow2.f32 %v1650_v53 }
 0x487   : > { %1810 = vrot.lane.b32.xlu1 %v5480_v41, %s4961_s18  ;;  %1812 = vrot.lane.b32.xlu0 %v5483_v60, %s4961_s18  ;;  %v5500_v43 = vadd.f32 %v4289_v0, %v5382_v1  ;;  %v1652_v56 = vmul.f32 1.442695, %v1616_v13  ;;  %v1658_v0 = vmul.f32 1.442695, %v1619_v58 }
 0x488   : > { %v1568_v8 = vpop.f32.mrf.mxu0 }
 0x489   : > { %v5493_v62 = vadd.f32 %v5382_v1, %v1568_v8  ;;  %v1621_v8 = vmul.f32 0.5, %v5433_v19 }
 0x48a   : > { %v4292_v5 = vpop.f32.mrf.mxu0 }
 0x48b   : > { %1814 = vrot.lane.b32.xlu1 %v5493_v62, %s4961_s18  ;;  %1816 = vrot.lane.b32.xlu0 %v5490_v61, %s4961_s18  ;;  %v5510_v25 = vadd.f32 %v4292_v5, %v5382_v1  ;;  %v4709_v5 = vpop.eup %4708 }
 0x48c   : > { %v1581_v7 = vpop.f32.mrf.mxu0  ;;  %4317 = vmatmul.mubr.msk.bf16.gmra.mxu1 %vm1933_vm1, %v5156_v17  ;;  %v1617_v17 = vmul.f32 0.5, %v5413_v24 }
 0x48d   : > { %v5503_v49 = vadd.f32 %v5382_v1, %v1581_v7  ;;  %4320 = vmatprep.mubr.msk.bf16.mxu1 %vm1933_vm1, %v5166_v22  ;;  %v1618_v22 = vmul.f32 0.5, %v5410_v23  ;;  %v4711_v7 = vpop.eup %4710 }
 0x48e   : > { %v4293_v14 = vpop.f32.mrf.mxu0  ;;  %v1654_v59 = vmul.f32 1.442695, %v1617_v17  ;;  %v1708_v10 = vmul.f32 %v4773_v9, %v4711_v7  ;;  %v1625_v17 = vmul.f32 0.5, %v5453_v42 }
 0x48f   : > { %1818 = vrot.lane.b32.xlu1 %v5500_v43, %s4961_s18  ;;  %1820 = vrot.lane.b32.xlu0 %v5503_v49, %s4961_s18  ;;  %v5520_v36 = vadd.f32 %v4293_v14, %v5382_v1  ;;  %v1622_v14 = vmul.f32 0.5, %v5430_v55 }
 0x490   : > { %v1584_v21 = vpop.f32.mrf.mxu0  ;;  %v1670_v7 = vmul.f32 1.442695, %v1625_v17  ;;  %v4778_v17 = vld [vmem:[%s5125_s30 + $0x30] sm:$0xff] }
 0x491   : > { %v5513_v27 = vadd.f32 %v5382_v1, %v1584_v21  ;;  %6016 = vst [vmem:[#allocation13_spill] sm:$0xff] %v5520_v36 }
 0x492   : > { %v4296_v3 = vpop.f32.mrf.mxu0 }
 0x493   : > { %6015 = vst [vmem:[#allocation12_spill] sm:$0xff] %v5513_v27  ;;  %1822 = vrot.lane.b32.xlu1 %v5513_v27, %s4961_s18  ;;  %1824 = vrot.lane.b32.xlu0 %v5510_v25, %s4961_s18  ;;  %v5532_v50 = vadd.f32 %v4296_v3, %v5382_v1  ;;  %v4713_v21 = vpop.eup %4712  ;;  %v1662_v3 = vmul.f32 1.442695, %v1621_v8 }
 0x494   : > { %v1597_v34 = vpop.f32.mrf.mxu0  ;;  %4321 = vmatmul.mubr.msk.bf16.gmra.mxu1 %vm1933_vm1, %v5183_v32  ;;  %v1656_v32 = vmul.f32 1.442695, %v1618_v22 }
 0x495   : > { %v5523_v15 = vadd.f32 %v5382_v1, %v1597_v34  ;;  %6018 = vst [vmem:[#allocation15_spill] sm:$0xff] %v5532_v50  ;;  %4324 = vmatprep.mubr.msk.bf16.mxu1 %vm1933_vm1, %v5185_v33  ;;  %v1620_v33 = vmul.f32 0.5, %v5423_v30 }
 0x496   : > { %v4297_v38 = vpop.f32.mrf.mxu0 }
 0x497   : > { %6017 = vst [vmem:[#allocation14_spill] sm:$0xff] %v5523_v15  ;;  %1826 = vrot.lane.b32.xlu1 %v5520_v36, %s4961_s18  ;;  %1828 = vrot.lane.b32.xlu0 %v5523_v15, %s4961_s18  ;;  %v5546_v4 = vadd.f32 %v4297_v38, %v5382_v1  ;;  %v1664_v38 = vmul.f32 1.442695, %v1622_v14 }
 0x498   : > { %v1600_v47 = vpop.f32.mrf.mxu0 }
 0x499   : > { %v5535_v52 = vadd.f32 %v5382_v1, %v1600_v47  ;;  %6020 = vst [vmem:[#allocation17_spill] sm:$0xff] %v5546_v4  ;;  %v1646_v1 = vmul.f32 1.442695, %v1613_v31  ;;  %v1710_v47 = vmul.f32 %v4772_v39, %v4709_v5  ;;  %v1711_v31 = vmul.f32 %v4774_v29, %v4713_v21 }
 0x49a   : > { %v1627_v5 = vmul.f32 0.5, %v5460_v18  ;;  %v1629_v39 = vmul.f32 0.5, %v5473_v26 }
 0x49b   : > { %6019 = vst [vmem:[#allocation16_spill] sm:$0xff] %v5535_v52  ;;  %1830 = vrot.lane.b32.xlu1 %v5535_v52, %s4961_s18  ;;  %1832 = vrot.lane.b32.xlu0 %v5532_v50, %s4961_s18  ;;  %4714 = vpow2.f32 %v1646_v1  ;;  %v4775_v1 = vld [vmem:[%s5125_s30 + $0x8] sm:$0xff] }
 0x49c   : > { %4325 = vmatmul.mubr.msk.bf16.gmra.mxu1 %vm1933_vm1, %v5207_v46  ;;  %4716 = vpow2.f32 %v1652_v56  ;;  %v1660_v46 = vmul.f32 1.442695, %v1620_v33  ;;  %v1626_v33 = vmul.f32 0.5, %v5450_v40 }
 0x49d   : > { %4328 = vmatprep.mubr.msk.bf16.mxu1 %vm1933_vm1, %v5209_v48  ;;  %4718 = vpow2.f32 %v1654_v59  ;;  %v1623_v48 = vmul.f32 0.5, %v5440_v37 }
 0x49e   : > { %4720 = vpow2.f32 %v1656_v32 }
 0x49f   : > { %1834 = vrot.lane.b32.xlu1 %v5546_v4, %s4961_s18  ;;  %4722 = vpow2.f32 %v1658_v0  ;;  %v1666_v44 = vmul.f32 1.442695, %v1623_v48  ;;  %v1668_v0 = vmul.f32 1.442695, %v1624_v45  ;;  %v1672_v48 = vmul.f32 1.442695, %v1626_v33 }
 0x4a0   : > { %4724 = vpow2.f32 %v1660_v46 }
 0x4a1   : > { %4726 = vpow2.f32 %v1662_v3 }
 0x4a2   : > { %4728 = vpow2.f32 %v1664_v38  ;;  %v1674_v38 = vmul.f32 1.442695, %v1627_v5 }
 0x4a3   : > { %4730 = vpow2.f32 %v1666_v44  ;;  %v1630_v44 = vmul.f32 0.5, %v5470_v57 }
 0x4a4   : > { %4329 = vmatmul.mubr.msk.bf16.gmra.mxu1 %vm1933_vm1, %v5225_v54  ;;  %4732 = vpow2.f32 %v1668_v0 }
 0x4a5   : > { %4734 = vpow2.f32 %v1670_v7  ;;  %v1680_v5 = vmul.f32 1.442695, %v1630_v44 }
 0x4a6   : > { %4736 = vpow2.f32 %v1672_v48  ;;  %v4780_v48 = vld [vmem:[%s5125_s30 + $0x40] sm:$0xff] }
 0x4a7   : > { %4738 = vpow2.f32 %v1674_v38  ;;  %v4781_v38 = vld [vmem:[%s5125_s30 + $0x48] sm:$0xff] }
 0x4a8   : > { %v4715_v20 = vpop.eup %4714 }
 0x4a9   : > { %v1709_v13 = vmul.f32 %v4775_v1, %v4715_v20  ;;  %v4717_v8 = vpop.eup %4716  ;;  %v4776_v20 = vld [vmem:[%s5125_s30 + $0x20] sm:$0xff] }
 0x4aa   : > { %v4719_v21 = vpop.eup %4718  ;;  %v1712_v3 = vmul.f32 %v4776_v20, %v4717_v8 }
 0x4cf   : > { %v1777_v35 = vpop.permute.xlu1 %1776 }
 0x4d0   : > { %v1870_v22 = vadd.f32 %v1777_v35, %v1710_v47  ;;  %v1628_v35 = vmul.f32 0.5, %v5463_v51  ;;  %v4777_v47 = vld [vmem:[%s5125_s30 + $0x28] sm:$0xff] }
 0x4d1   : > { %v1773_v34 = vpop.permute.xlu0 %1772  ;;  %v1713_v9 = vmul.f32 %v4777_v47, %v4719_v21 }
 0x4d2   : > { %v1868_v58 = vadd.f32 %v1773_v34, %v1708_v10  ;;  %v4721_v34 = vpop.eup %4720  ;;  %v1676_v1 = vmul.f32 1.442695, %v1628_v35 }
 0x4d3   : > { %v1779_v53 = vpop.permute.xlu1 %1778  ;;  %v4723_v10 = vpop.eup %4722 }
 0x4d4   : > { %v1871_v56 = vadd.f32 %v1779_v53, %v1711_v31  ;;  %4740 = vpow2.f32 %v1676_v1 }
 0x4d5   : > { %v1775_v54 = vpop.permute.xlu0 %1774 }
 0x4d6   : > { %v1905_v59 = vpack.c.bf16 %v1871_v56, %v1870_v22  ;;  %v1869_v32 = vadd.f32 %v1775_v54, %v1709_v13  ;;  %v1631_v13 = vmul.f32 0.5, %v5480_v41  ;;  %v1714_v22 = vmul.f32 %v4778_v17, %v4721_v34  ;;  %v4725_v56 = vpop.eup %4724 }
 0x4d7   : > { %v1678_v54 = vmul.f32 1.442695, %v1629_v39  ;;  %v4727_v33 = vpop.eup %4726  ;;  %v1716_v35 = vmul.f32 %v4780_v48, %v4725_v56 }
 0x4d8   : > { %v1904_v14 = vpack.c.bf16 %v1869_v32, %v1868_v58  ;;  %2145 = vrot.lane.b32.xlu1 %v1905_v59, %s4962_s20  ;;  %v4779_v59 = vld [vmem:[%s5125_s30 + $0x38] sm:$0xff]  ;;  %v1682_v21 = vmul.f32 1.442695, %v1631_v13  ;;  %v4729_v20 = vpop.eup %4728  ;;  %v1717_v39 = vmul.f32 %v4781_v38, %v4727_v33 }
 0x4d9   : > { %v1781_v46 = vpop.permute.xlu0 %1780  ;;  %v1715_v32 = vmul.f32 %v4779_v59, %v4723_v10  ;;  %4742 = vpow2.f32 %v1678_v54  ;;  %v4731_v47 = vpop.eup %4730  ;;  %v4783_v54 = vld [vmem:[%s5125_s30 + $0x58] sm:$0xff] }
 0x4da   : > { %2143 = vrot.lane.b32.xlu0 %v1904_v14, %s4962_s20  ;;  %v1872_v45 = vadd.f32 %v1781_v46, %v1712_v3  ;;  %v1632_v46 = vmul.f32 0.5, %v5483_v60  ;;  %v1633_v3 = vmul.f32 0.5, %v5493_v62  ;;  %4744 = vpow2.f32 %v1680_v5  ;;  %v4733_v1 = vpop.eup %4732 }
 0x4db   : > { %4746 = vpow2.f32 %v1682_v21  ;;  %v4735_v59 = vpop.eup %4734  ;;  %v4784_v21 = vld [vmem:[%s5125_s30 + $0x60] sm:$0xff] }
 0x4dc   : > { %v1686_v13 = vmul.f32 1.442695, %v1633_v3  ;;  %v4737_v48 = vpop.eup %4736  ;;  %v4785_v3 = vld [vmem:[%s5125_s30 + $0x68] sm:$0xff] }
 0x4dd   : > { %v1783_v29 = vpop.permute.xlu1 %1782  ;;  %v1785_v31 = vpop.permute.xlu0 %1784 }
 0x4de   : > { %v1873_v53 = vadd.f32 %v1783_v29, %v1713_v9  ;;  %v1874_v7 = vadd.f32 %v1785_v31, %v1714_v22  ;;  %v1634_v29 = vmul.f32 0.5, %v5490_v61  ;;  %v4782_v22 = vld [vmem:[%s5125_s30 + $0x50] sm:$0xff]  ;;  %v4739_v38 = vpop.eup %4738 }
 0x4df   : > { %v1718_v56 = vmul.f32 %v4782_v22, %v4729_v20  ;;  %v4787_v22 = vld [vmem:[%s5125_s30 + $0x78] sm:$0xff] }
 0x4e0   : > { %v1906_v58 = vpack.c.bf16 %v1873_v53, %v1872_v45  ;;  %v1684_v45 = vmul.f32 1.442695, %v1632_v46  ;;  %v1635_v53 = vmul.f32 0.5, %v5500_v43  ;;  %v1720_v46 = vmul.f32 %v4784_v21, %v4733_v1 }
 0x4e1   : > { %v1787_v0 = vpop.permute.xlu1 %1786  ;;  %v1789_v8 = vpop.permute.xlu0 %1788 }
 0x4e2   : > { %v1875_v14 = vadd.f32 %v1787_v0, %v1715_v32  ;;  %2147 = vrot.lane.b32.xlu0 %v1906_v58, %s4962_s20  ;;  %v1876_v31 = vadd.f32 %v1789_v8, %v1716_v35  ;;  %v1719_v58 = vmul.f32 %v4783_v54, %v4731_v47  ;;  %v1688_v0 = vmul.f32 1.442695, %v1634_v29  ;;  %v4741_v1 = vpop.eup %4740 }
 0x4e3   : > { %4748 = vpow2.f32 %v1684_v45  ;;  %v1637_v35 = vmul.f32 0.5, %v5513_v27  ;;  %v4786_v45 = vld [vmem:[%s5125_s30 + $0x70] sm:$0xff] }
 0x4e4   : > { %v1907_v34 = vpack.c.bf16 %v1875_v14, %v1874_v7  ;;  %v1690_v7 = vmul.f32 1.442695, %v1635_v53  ;;  %v1636_v14 = vmul.f32 0.5, %v5503_v49  ;;  %4750 = vpow2.f32 %v1686_v13 }
 0x4e5   : > { %v1791_v9 = vpop.permute.xlu1 %1790  ;;  %v1793_v10 = vpop.permute.xlu0 %1792  ;;  %4752 = vpow2.f32 %v1688_v0  ;;  %v1722_v53 = vmul.f32 %v4786_v45, %v4737_v48  ;;  %v1694_v13 = vmul.f32 1.442695, %v1637_v35  ;;  %v1641_v48 = vmul.f32 0.5, %v5535_v52 }
 0x4e6   : > { %v1877_v44 = vadd.f32 %v1791_v9, %v1717_v39  ;;  %2149 = vrot.lane.b32.xlu1 %v1907_v34, %s4962_s20  ;;  %v1878_v8 = vadd.f32 %v1793_v10, %v1718_v56  ;;  %v1721_v34 = vmul.f32 %v4785_v3, %v4735_v59  ;;  %v1638_v9 = vmul.f32 0.5, %v5510_v25  ;;  %v4743_v54 = vpop.eup %4742 }
 0x4e7   : > { %4754 = vpow2.f32 %v1690_v7  ;;  %v1723_v56 = vmul.f32 %v4787_v22, %v4739_v38  ;;  %v4745_v0 = vpop.eup %4744  ;;  %v1640_v7 = vmul.f32 0.5, %v5523_v15 }
 0x4e8   : > { %v1908_v17 = vpack.c.bf16 %v1877_v44, %v1876_v31  ;;  %v1692_v31 = vmul.f32 1.442695, %v1636_v14  ;;  %v1639_v44 = vmul.f32 0.5, %v5520_v36  ;;  %v4788_v14 = vld [vmem:[%s5125_s30 + $0x80] sm:$0xff] }
 0x4e9   : > { %v1795_v32 = vpop.permute.xlu1 %1794  ;;  %v1797_v33 = vpop.permute.xlu0 %1796  ;;  %v1724_v21 = vmul.f32 %v4788_v14, %v4741_v1  ;;  %v1643_v1 = vmul.f32 0.5, %v5546_v4  ;;  %v4793_v14 = vld [vmem:[%s5125_s30 + $0xa8] sm:$0xff] }
 0x4ea   : > { %v1879_v5 = vadd.f32 %v1795_v32, %v1719_v58  ;;  %2151 = vrot.lane.b32.xlu0 %v1908_v17, %s4962_s20  ;;  %v1880_v10 = vadd.f32 %v1797_v33, %v1720_v46  ;;  %v1696_v32 = vmul.f32 1.442695, %v1638_v9  ;;  %4756 = vpow2.f32 %v1692_v31  ;;  %v4747_v46 = vpop.eup %4746  ;;  %v4790_v9 = vld [vmem:[%s5125_s30 + $0x90] sm:$0xff] }
 0x4eb   : > { %4758 = vpow2.f32 %v1694_v13  ;;  %v1700_v31 = vmul.f32 1.442695, %v1640_v7  ;;  %v1702_v13 = vmul.f32 1.442695, %v1641_v48  ;;  %v1706_v7 = vmul.f32 1.442695, %v1643_v1 }
 0x4ec   : > { %v1909_v20 = vpack.c.bf16 %v1879_v5, %v1878_v8  ;;  %v1698_v5 = vmul.f32 1.442695, %v1639_v44  ;;  %4760 = vpow2.f32 %v1696_v32  ;;  %v4791_v44 = vld [vmem:[%s5125_s30 + $0x98] sm:$0xff] }
 0x4ed   : > { %v1799_v39 = vpop.permute.xlu1 %1798  ;;  %v1801_v47 = vpop.permute.xlu0 %1800  ;;  %v1727_v45 = vmul.f32 %v4791_v44, %v4747_v46 }
 0x4ee   : > { %v1881_v29 = vadd.f32 %v1799_v39, %v1721_v34  ;;  %2153 = vrot.lane.b32.xlu1 %v1909_v20, %s4962_s20  ;;  %v1882_v33 = vadd.f32 %v1801_v47, %v1722_v53  ;;  %v4789_v20 = vld [vmem:[%s5125_s30 + $0x88] sm:$0xff]  ;;  %4762 = vpow2.f32 %v1698_v5 }
 0x4ef   : > { %v1725_v3 = vmul.f32 %v4789_v20, %v4743_v54  ;;  %4764 = vpow2.f32 %v1700_v31 }
 0x4f0   : > { %v1910_v17 = vpack.c.bf16 %v1881_v29, %v1880_v10  ;;  %v1726_v10 = vmul.f32 %v4790_v9, %v4745_v0  ;;  %v1642_v29 = vmul.f32 0.5, %v5532_v50  ;;  %v4749_v53 = vpop.eup %4748  ;;  %4766 = vpow2.f32 %v1702_v13  ;;  %v4795_v9 = vld [vmem:[%s5125_s30 + $0xb8] sm:$0xff] }
 0x4f1   : > { %v1803_v58 = vpop.permute.xlu1 %1802  ;;  %v1805_v59 = vpop.permute.xlu0 %1804 }
 0x4f2   : > { %v1883_v8 = vadd.f32 %v1803_v58, %v1723_v56  ;;  %2155 = vrot.lane.b32.xlu0 %v1910_v17, %s4962_s20  ;;  %v1884_v39 = vadd.f32 %v1805_v59, %v1724_v21  ;;  %v4751_v22 = vpop.eup %4750  ;;  %v1704_v32 = vmul.f32 1.442695, %v1642_v29 }
 0x4f3   : > { %v4753_v0 = vpop.eup %4752  ;;  %v1729_v21 = vmul.f32 %v4793_v14, %v4751_v22 }
 0x4f4   : > { %v1911_v35 = vpack.c.bf16 %v1883_v8, %v1882_v33  ;;  %v4792_v33 = vld [vmem:[%s5125_s30 + $0xa0] sm:$0xff]  ;;  %v4755_v46 = vpop.eup %4754  ;;  %4768 = vpow2.f32 %v1704_v32 }
 0x4f5   : > { %v1807_v34 = vpop.permute.xlu1 %1806  ;;  %v1809_v38 = vpop.permute.xlu0 %1808  ;;  %v1728_v8 = vmul.f32 %v4792_v33, %v4749_v53  ;;  %4770 = vpow2.f32 %v1706_v7 }
 0x4f6   : > { %v1885_v47 = vadd.f32 %v1807_v34, %v1725_v3  ;;  %2157 = vrot.lane.b32.xlu1 %v1911_v35, %s4962_s20  ;;  %v1886_v58 = vadd.f32 %v1809_v38, %v1726_v10  ;;  %v1731_v10 = vmul.f32 %v4795_v9, %v4755_v46 }
 0x4f7   : > { %v4757_v34 = vpop.eup %4756 }
 0x4f8   : > { %v1912_v17 = vpack.c.bf16 %v1885_v47, %v1884_v39  ;;  %v4794_v39 = vld [vmem:[%s5125_s30 + $0xb0] sm:$0xff]  ;;  %v4759_v29 = vpop.eup %4758 }
 0x4f9   : > { %v1811_v56 = vpop.permute.xlu1 %1810  ;;  %v1813_v54 = vpop.permute.xlu0 %1812  ;;  %v1730_v47 = vmul.f32 %v4794_v39, %v4753_v0 }
 0x4fa   : > { %v1887_v59 = vadd.f32 %v1811_v56, %v1727_v45  ;;  %2159 = vrot.lane.b32.xlu0 %v1912_v17, %s4962_s20  ;;  %v1888_v20 = vadd.f32 %v1813_v54, %v1728_v8  ;;  %v4761_v1 = vpop.eup %4760  ;;  %v4796_v17 = vld [vmem:[%s5125_s30 + $0xc0] sm:$0xff]  ;;  %v4797_v56 = vld [vmem:[%s5125_s30 + $0xc8] sm:$0xff] }
 0x4fb   : > { %v1732_v22 = vmul.f32 %v4796_v17, %v4757_v34  ;;  %v1733_v54 = vmul.f32 %v4797_v56, %v4759_v29  ;;  %v4677_v34 = vld [vmem:[#allocation5 + $0x158] sm:$0xff]  }
 0x4fc   : > { %v1913_v5 = vpack.c.bf16 %v1887_v59, %v1886_v58  ;;  %v4763_v58 = vpop.eup %4762 }
 0x4fd   : > { %v1815_v48 = vpop.permute.xlu1 %1814  ;;  %v1817_v35 = vpop.permute.xlu0 %1816 }
 0x4fe   : > { %v1889_v3 = vadd.f32 %v1815_v48, %v1729_v21  ;;  %2161 = vrot.lane.b32.xlu1 %v1913_v5, %s4962_s20  ;;  %v1890_v45 = vadd.f32 %v1817_v35, %v1730_v47  ;;  %v4765_v0 = vpop.eup %4764  ;;  %v4798_v5 = vld [vmem:[%s5125_s30 + $0xd0] sm:$0xff]  ;;  %v4799_v21 = vld [vmem:[%s5125_s30 + $0xd8] sm:$0xff] }
 0x4ff   : > { %v1734_v14 = vmul.f32 %v4798_v5, %v4761_v1  ;;  %v1735_v46 = vmul.f32 %v4799_v21, %v4763_v58  ;;  %v4767_v48 = vpop.eup %4766  ;;  %v4678_v1 = vld [vmem:[#allocation5 + $0x150] sm:$0xff]   ;;  %v4681_v21 = vld [vmem:[#allocation5 + $0x138] sm:$0xff]  }
 0x500   : > { %v1914_v38 = vpack.c.bf16 %v1889_v3, %v1888_v20  ;;  %v4676_v3 = vld [vmem:[#allocation5 + $0x160] sm:$0xff]  }
 0x501   : > { %v1819_v31 = vpop.permute.xlu1 %1818  ;;  %v1821_v44 = vpop.permute.xlu0 %1820  ;;  %4368 = vmatprep.subr.bf16.mxu1 %v4676_v3 }
 0x502   : > { %v1891_v53 = vadd.f32 %v1819_v31, %v1731_v10  ;;  %2163 = vrot.lane.b32.xlu0 %v1914_v38, %s4962_s20  ;;  %v1892_v33 = vadd.f32 %v1821_v44, %v1732_v22  ;;  %v4769_v47 = vpop.eup %4768  ;;  %v4800_v10 = vld [vmem:[%s5125_s30 + $0xe0] sm:$0xff]  ;;  %v4801_v31 = vld [vmem:[%s5125_s30 + $0xe8] sm:$0xff]  ;;  %4369 = vmatpush3.bf16.msra.mxu1 %v4676_v3 }
 0x503   : > { %v1736_v29 = vmul.f32 %v4800_v10, %v4765_v0  ;;  %v1737_v44 = vmul.f32 %v4801_v31, %v4767_v48  ;;  %4370 = vmatprep.subr.bf16.mxu1 %v4677_v34 }
 0x504   : > { %v1915_v13 = vpack.c.bf16 %v1891_v53, %v1890_v45  ;;  %v4771_v45 = vpop.eup %4770 }
 0x505   : > { %v1823_v59 = vpop.permute.xlu1 %1822  ;;  %v1825_v32 = vpop.permute.xlu0 %1824 }
 0x506   : > { %v1893_v8 = vadd.f32 %v1823_v59, %v1733_v54  ;;  %2165 = vrot.lane.b32.xlu1 %v1915_v13, %s4962_s20  ;;  %v1894_v38 = vadd.f32 %v1825_v32, %v1734_v14  ;;  %v4802_v54 = vld [vmem:[%s5125_s30 + $0xf0] sm:$0xff]  ;;  %v4803_v59 = vld [vmem:[%s5125_s30 + $0xf8] sm:$0xff]  ;;  %4371 = vmatpush3.bf16.msra.mxu1 %v4677_v34  ;;  %v4680_v14 = vld [vmem:[#allocation5 + $0x140] sm:$0xff]  }
 0x507   : > { %v1738_v58 = vmul.f32 %v4802_v54, %v4769_v47  ;;  %v1739_v32 = vmul.f32 %v4803_v59, %v4771_v45  ;;  %4372 = vmatprep.subr.bf16.mxu1 %v4678_v1  ;;  %v4684_v54 = vld [vmem:[#allocation5 + $0x1a0] sm:$0xff]  }
 0x508   : > { %v1916_v7 = vpack.c.bf16 %v1893_v8, %v1892_v33  ;;  %v4679_v8 = vld [vmem:[#allocation5 + $0x148] sm:$0xff]   ;;  %4416 = vmatprep.subr.bf16.mxu0 %v4684_v54 }
 0x509   : > { %v1827_v35 = vpop.permute.xlu1 %1826  ;;  %v1829_v20 = vpop.permute.xlu0 %1828 }
 0x50a   : > { %v1895_v39 = vadd.f32 %v1827_v35, %v1735_v46  ;;  %2167 = vrot.lane.b32.xlu0 %v1916_v7, %s4962_s20  ;;  %v1896_v13 = vadd.f32 %v1829_v20, %v1736_v29  ;;  %4373 = vmatpush3.bf16.msra.mxu1 %v4678_v1  ;;  %v4682_v1 = vld [vmem:[#allocation5 + $0x130] sm:$0xff]  }
 0x50b   : > { %4374 = vmatprep.subr.bf16.mxu1 %v4679_v8 }
 0x50c   : > { %v1917_v9 = vpack.c.bf16 %v1895_v39, %v1894_v38 }
 0x50d   : > { %v1831_v53 = vpop.permute.xlu1 %1830  ;;  %v1833_v22 = vpop.permute.xlu0 %1832 }
 0x50e   : > { %v1897_v17 = vadd.f32 %v1831_v53, %v1737_v44  ;;  %2169 = vrot.lane.b32.xlu1 %v1917_v9, %s4962_s20  ;;  %v1898_v0 = vadd.f32 %v1833_v22, %v1738_v58  ;;  %4375 = vmatpush3.bf16.msra.mxu1 %v4679_v8  ;;  %v4685_v58 = vld [vmem:[#allocation5 + $0x198] sm:$0xff]   ;;  %v4687_v8 = vld [vmem:[#allocation5 + $0x188] sm:$0xff]  }
 0x50f   : > { %4376 = vmatprep.subr.bf16.mxu1 %v4680_v14 }
 0x510   : > { %v1918_v56 = vpack.c.bf16 %v1897_v17, %v1896_v13  ;;  %v4683_v13 = vld [vmem:[#allocation5 + $0x128] sm:$0xff]  }
 0x511   : > { %v1835_v33 = vpop.permute.xlu1 %1834 }
 0x512   : > { %v1899_v7 = vadd.f32 %v1835_v33, %v1739_v32  ;;  %2171 = vrot.lane.b32.xlu0 %v1918_v56, %s4962_s20  ;;  %4377 = vmatpush3.bf16.msra.mxu1 %v4680_v14  ;;  %v4686_v32 = vld [vmem:[#allocation5 + $0x190] sm:$0xff]   ;;  %v4689_v14 = vld [vmem:[#allocation5 + $0x178] sm:$0xff]  }
 0x513   : > { %4378 = vmatprep.subr.bf16.mxu1 %v4681_v21 }
 0x514   : > { %v1919_v5 = vpack.c.bf16 %v1899_v7, %v1898_v0  ;;  %v4688_v7 = vld [vmem:[#allocation5 + $0x180] sm:$0xff]  }
 0x516   : > { %2173 = vrot.lane.b32.xlu1 %v1919_v5, %s4962_s20  ;;  %4379 = vmatpush3.bf16.msra.mxu1 %v4681_v21 }
 0x517   : > { %4380 = vmatprep.subr.bf16.mxu1 %v4682_v1 }
 0x51a   : > { %4381 = vmatpush3.bf16.msra.mxu1 %v4682_v1 }
 0x51b   : > { %4382 = vmatprep.subr.bf16.mxu1 %v4683_v13 }
 0x51e   : > { %4383 = vmatpush3.bf16.msra.mxu1 %v4683_v13 }
 0x52c   : > { %v4302_v17 = vpop.f32.mrf.mxu1 }
 0x52e   : > { %v2000_v22 = vpop.f32.mrf.mxu1 }
 0x530   : > { %v4303_v56 = vpop.f32.mrf.mxu1 }
 0x532   : > { %v2003_v59 = vpop.f32.mrf.mxu1 }
 0x534   : > { %v4306_v33 = vpop.f32.mrf.mxu1 }
 0x536   : > { %v2016_v0 = vpop.f32.mrf.mxu1 }
 0x538   : > { %v4307_v5 = vpop.f32.mrf.mxu1 }
 0x53a   : > { %v2019_v21 = vpop.f32.mrf.mxu1 }
 0x54a   : > { %v2146_v48 = vpop.permute.xlu1 %2145 }
 0x54c   : > { %v2144_v46 = vpop.permute.xlu0 %2143 }
 0x54d   : > { %4336 = vmatprep.mubr.msk.bf16.mxu0 %vm290_vm0, %v2144_v46  ;;  %v4310_v46 = vpop.f32.mrf.mxu1 }
 0x54e   : > { %4337 = vmatmul.mubr.msk.bf16.vlgmr.msra.gmra.mxu0 %vm290_vm0, %v2146_v48 }
 0x54f   : > { %4417 = vmatpush3.bf16.msra.mxu0 %v4684_v54  ;;  %v2032_v48 = vpop.f32.mrf.mxu1 }
 0x550   : > { %4418 = vmatprep.subr.bf16.mxu0 %v4685_v58 }
 0x553   : > { %4419 = vmatpush3.bf16.msra.mxu0 %v4685_v58 }
 0x554   : > { %v2148_v35 = vpop.permute.xlu0 %2147  ;;  %4420 = vmatprep.subr.bf16.mxu0 %v4686_v32 }
 0x555   : > { %4340 = vmatprep.mubr.msk.bf16.mxu0 %vm290_vm0, %v2148_v35  ;;  %v4311_v35 = vpop.f32.mrf.mxu1 }
 0x557   : > { %4421 = vmatpush3.bf16.msra.mxu0 %v4686_v32 }
 0x558   : > { %v2150_v20 = vpop.permute.xlu1 %2149  ;;  %4422 = vmatprep.subr.bf16.mxu0 %v4687_v8 }
 0x559   : > { %4341 = vmatmul.mubr.msk.bf16.gmra.mxu0 %vm290_vm0, %v2150_v20  ;;  %v2035_v20 = vpop.f32.mrf.mxu1 }
 0x55b   : > { %4423 = vmatpush3.bf16.msra.mxu0 %v4687_v8 }
 0x55c   : > { %v2152_v3 = vpop.permute.xlu0 %2151  ;;  %4424 = vmatprep.subr.bf16.mxu0 %v4688_v7 }
 0x55d   : > { %4344 = vmatprep.mubr.msk.bf16.mxu0 %vm290_vm0, %v2152_v3  ;;  %v5672_v3 = vpop.f32.mrf.mxu1 }
 0x55f   : > { %4425 = vmatpush3.bf16.msra.mxu0 %v4688_v7 }
 0x560   : > { %v2154_v34 = vpop.permute.xlu1 %2153  ;;  %4426 = vmatprep.subr.bf16.mxu0 %v4689_v14 }
 0x561   : > { %4345 = vmatmul.mubr.msk.bf16.gmra.mxu0 %vm290_vm0, %v2154_v34  ;;  %v5674_v34 = vpop.f32.mrf.mxu1 }
 0x563   : > { %4427 = vmatpush3.bf16.msra.mxu0 %v4689_v14 }
 0x564   : > { %v2156_v38 = vpop.permute.xlu0 %2155 }
 0x565   : > { %4348 = vmatprep.mubr.msk.bf16.mxu0 %vm290_vm0, %v2156_v38  ;;  %v5676_v38 = vpop.f32.mrf.mxu1 }
 0x568   : > { %v2158_v39 = vpop.permute.xlu1 %2157 }
 0x569   : > { %4349 = vmatmul.mubr.msk.bf16.gmra.mxu0 %vm290_vm0, %v2158_v39  ;;  %v5678_v39 = vpop.f32.mrf.mxu1 }
 0x56c   : > { %v2160_v47 = vpop.permute.xlu0 %2159 }
 0x56d   : > { %4352 = vmatprep.mubr.msk.bf16.mxu0 %vm290_vm0, %v2160_v47  ;;  %v5680_v47 = vld [vmem:[#allocation7 + $0x5] ss:$0 sm:$0xff] }
 0x56e   : > { %v2004_v1 = vadd.f32 %v5680_v47, %v2003_v59  ;;  %v2025_v27 = vadd.f32 %v4306_v33, %v5680_v47 }
 0x570   : > { %v2162_v9 = vpop.permute.xlu1 %2161 }
 0x571   : > { %4353 = vmatmul.mubr.msk.bf16.gmra.mxu0 %vm290_vm0, %v2162_v9 }
 0x574   : > { %v2164_v10 = vpop.permute.xlu0 %2163 }
 0x575   : > { %4356 = vmatprep.mubr.msk.bf16.mxu0 %vm290_vm0, %v2164_v10  ;;  %v2001_v10 = vadd.f32 %v5680_v47, %v2000_v22 }
 0x578   : > { %v2166_v29 = vpop.permute.xlu1 %2165 }
 0x579   : > { %4357 = vmatmul.mubr.msk.bf16.gmra.mxu0 %vm290_vm0, %v2166_v29  ;;  %v2012_v29 = vadd.f32 %v4303_v56, %v5680_v47 }
 0x57c   : > { %v2168_v31 = vpop.permute.xlu0 %2167 }
 0x57d   : > { %4360 = vmatprep.mubr.msk.bf16.mxu0 %vm290_vm0, %v2168_v31  ;;  %v5684_v31 = vpop.f32.mrf.mxu1 }
 0x57f   : > { %v5688_v58 = vpop.f32.mrf.mxu1 }
 0x580   : > { %v2170_v44 = vpop.permute.xlu1 %2169 }
 0x581   : > { %4361 = vmatmul.mubr.msk.bf16.gmra.mxu0 %vm290_vm0, %v2170_v44  ;;  %v2009_v44 = vadd.f32 %v4302_v17, %v5680_v47  ;;  %v5690_v4 = vpop.f32.mrf.mxu1 }
 0x583   : > { %v5693_v59 = vpop.f32.mrf.mxu1 }
 0x584   : > { %v2172_v45 = vpop.permute.xlu0 %2171 }
 0x585   : > { %4364 = vmatprep.mubr.msk.bf16.mxu0 %vm290_vm0, %v2172_v45 }
 0x588   : > { %v2174_v53 = vpop.permute.xlu1 %2173 }
 0x589   : > { %4365 = vmatmul.mubr.msk.bf16.gmra.mxu0 %vm290_vm0, %v2174_v53 }
 0x60e   : > { %v4338_v9 = vpop.f32.mrf.mxu0 }
 0x60f   : > { %v2278_v32 = vadd.f32 %v4338_v9, %v2009_v44  ;;  %v2028_v9 = vadd.f32 %v4307_v5, %v5680_v47  ;;  %v2020_v44 = vadd.f32 %v5680_v47, %v2019_v21 }
 0x610   : > { %v2269_v45 = vpop.f32.mrf.mxu0 }
 0x611   : > { %v2270_v13 = vadd.f32 %v2269_v45, %v2001_v10  ;;  %v2398_v56 = vmax.f32 %v2278_v32, 0.0  ;;  %v2017_v10 = vadd.f32 %v5680_v47, %v2016_v0 }
 0x612   : > { %v4339_v53 = vpop.f32.mrf.mxu0 }
 0x613   : > { %v2281_v54 = vadd.f32 %v4339_v53, %v2012_v29  ;;  %v2396_v52 = vmax.f32 %v2270_v13, 0.0  ;;  %v5698_v13 = vpop.f32.mrf.mxu1 }
 0x614   : > { %v2272_v8 = vpop.f32.mrf.mxu0 }
 0x615   : > { %v2273_v7 = vadd.f32 %v2272_v8, %v2004_v1  ;;  %v2399_v14 = vmax.f32 %v2281_v54, 0.0  ;;  %v5701_v5 = vpop.f32.mrf.mxu1 }
 0x617   : > { %v2397_v22 = vmax.f32 %v2273_v7, 0.0  ;;  %v2429_v17 = vpack.c.bf16 %v2399_v14, %v2398_v56  ;;  %v2041_v7 = vadd.f32 %v4310_v46, %v5680_v47  ;;  %v2036_v56 = vadd.f32 %v5680_v47, %v2035_v20  ;;  %v4323_v46 = vpop.f32.mrf.mxu1 }
 0x618   : > { %v2049_v20 = vadd.f32 %v5680_v47, %v5674_v34 }
 0x619   : > { %v2428_v15 = vpack.c.bf16 %v2397_v22, %v2396_v52  ;;  %v4342_v50 = vpop.f32.mrf.mxu0  ;;  %v2033_v22 = vadd.f32 %v5680_v47, %v2032_v48  ;;  %v2057_v48 = vadd.f32 %v5672_v3, %v5680_v47 }
 0x61a   : > { %v2294_v1 = vadd.f32 %v4342_v50, %v2025_v27 }
 0x61b   : > { %v2285_v36 = vpop.f32.mrf.mxu0  ;;  %4384 = vmatprep.mubr.bf16.mxu1 %v2428_v15 }
 0x61c   : > { %4385 = vmatmul.mubr.bf16.vlgmr.msra.gmra.mxu1 %v2429_v17  ;;  %v2286_v45 = vadd.f32 %v2285_v36, %v2017_v10  ;;  %v2402_v0 = vmax.f32 %v2294_v1, 0.0  ;;  %v2044_v36 = vadd.f32 %v4311_v35, %v5680_v47 }
 0x61d   : > { %v4343_v29 = vpop.f32.mrf.mxu0 }
 0x61e   : > { %v2297_v53 = vadd.f32 %v4343_v29, %v2028_v9  ;;  %v2400_v15 = vmax.f32 %v2286_v45, 0.0 }
 0x61f   : > { %v2288_v52 = vpop.f32.mrf.mxu0 }
 0x620   : > { %v2289_v54 = vadd.f32 %v2288_v52, %v2020_v44  ;;  %v2403_v33 = vmax.f32 %v2297_v53, 0.0 }
 0x621   : > { %v4346_v32 = vpop.f32.mrf.mxu0 }
 0x622   : > { %v2401_v8 = vmax.f32 %v2289_v54, 0.0  ;;  %v2431_v27 = vpack.c.bf16 %v2403_v33, %v2402_v0  ;;  %v2310_v9 = vadd.f32 %v4346_v32, %v2041_v7  ;;  %v2083_v33 = vpop.f32.mrf.mxu1  ;;  %v2060_v32 = vadd.f32 %v5676_v38, %v5680_v47 }
 0x623   : > { %v2301_v14 = vpop.f32.mrf.mxu0  ;;  %v2052_v0 = vadd.f32 %v5680_v47, %v5678_v39  ;;  %v2073_v38 = vadd.f32 %v5684_v31, %v5680_v47  ;;  %v2065_v39 = vadd.f32 %v5680_v47, %v5688_v58 }
 0x624   : > { %v2430_v21 = vpack.c.bf16 %v2401_v8, %v2400_v15  ;;  %v2302_v17 = vadd.f32 %v2301_v14, %v2033_v22  ;;  %v2406_v35 = vmax.f32 %v2310_v9, 0.0 }
 0x625   : > { %v4347_v50 = vpop.f32.mrf.mxu0 }
 0x626   : > { %v2313_v10 = vadd.f32 %v4347_v50, %v2044_v36  ;;  %4388 = vmatprep.mubr.bf16.mxu1 %v2430_v21  ;;  %v2404_v1 = vmax.f32 %v2302_v17, 0.0  ;;  %v4326_v21 = vpop.f32.mrf.mxu1 }
 0x627   : > { %v2304_v29 = vpop.f32.mrf.mxu0  ;;  %4389 = vmatmul.mubr.bf16.gmra.mxu1 %v2431_v27 }
 0x628   : > { %v2305_v44 = vadd.f32 %v2304_v29, %v2036_v56  ;;  %v2407_v45 = vmax.f32 %v2313_v10, 0.0  ;;  %v2096_v29 = vpop.f32.mrf.mxu1 }
 0x629   : > { %v4350_v53 = vpop.f32.mrf.mxu0 }
 0x62a   : > { %v2405_v52 = vmax.f32 %v2305_v44, 0.0  ;;  %v2433_v8 = vpack.c.bf16 %v2407_v45, %v2406_v35  ;;  %v2326_v36 = vadd.f32 %v4350_v53, %v2057_v48  ;;  %v2076_v44 = vadd.f32 %v5690_v4, %v5680_v47 }
 0x62b   : > { %v2317_v54 = vpop.f32.mrf.mxu0  ;;  %v2089_v4 = vadd.f32 %v5698_v13, %v5680_v47 }
 0x62c   : > { %v2432_v15 = vpack.c.bf16 %v2405_v52, %v2404_v1  ;;  %v2318_v14 = vadd.f32 %v2317_v54, %v2049_v20  ;;  %v2410_v10 = vmax.f32 %v2326_v36, 0.0  ;;  %v2068_v52 = vadd.f32 %v5680_v47, %v5693_v59  ;;  %v4327_v20 = vpop.f32.mrf.mxu1 }
 0x62d   : > { %v4351_v7 = vpop.f32.mrf.mxu0  ;;  %v2081_v59 = vadd.f32 %v5680_v47, %v5701_v5  ;;  %v2092_v36 = vadd.f32 %v4323_v46, %v5680_v47  ;;  %v2105_v5 = vadd.f32 %v4326_v21, %v5680_v47 }
 0x62e   : > { %v2329_v22 = vadd.f32 %v4351_v7, %v2060_v32  ;;  %4392 = vmatprep.mubr.bf16.mxu1 %v2432_v15  ;;  %v2408_v34 = vmax.f32 %v2318_v14, 0.0 }
 0x62f   : > { %v2320_v3 = vpop.f32.mrf.mxu0  ;;  %4393 = vmatmul.mubr.bf16.gmra.mxu1 %v2433_v8 }
 0x630   : > { %v2321_v27 = vadd.f32 %v2320_v3, %v2052_v0  ;;  %v2411_v50 = vmax.f32 %v2329_v22, 0.0  ;;  %v2099_v22 = vpop.f32.mrf.mxu1 }
 0x631   : > { %v4354_v56 = vpop.f32.mrf.mxu0 }
 0x632   : > { %v2409_v17 = vmax.f32 %v2321_v27, 0.0  ;;  %v2435_v53 = vpack.c.bf16 %v2411_v50, %v2410_v10  ;;  %v2342_v54 = vadd.f32 %v4354_v56, %v2073_v38  ;;  %v2084_v56 = vadd.f32 %v5680_v47, %v2083_v33  ;;  %v4330_v13 = vpop.f32.mrf.mxu1 }
 0x633   : > { %v2333_v9 = vpop.f32.mrf.mxu0  ;;  %v2108_v33 = vadd.f32 %v4327_v20, %v5680_v47 }
 0x634   : > { %v2434_v45 = vpack.c.bf16 %v2409_v17, %v2408_v34  ;;  %v2334_v48 = vadd.f32 %v2333_v9, %v2065_v39  ;;  %v2414_v0 = vmax.f32 %v2342_v54, 0.0 }
 0x635   : > { %v4355_v1 = vpop.f32.mrf.mxu0 }
 0x636   : > { %v2345_v35 = vadd.f32 %v4355_v1, %v2076_v44  ;;  %4396 = vmatprep.mubr.bf16.mxu1 %v2434_v45  ;;  %v2412_v58 = vmax.f32 %v2334_v48, 0.0  ;;  %v2112_v1 = vpop.f32.mrf.mxu1  ;;  %v2097_v48 = vadd.f32 %v5680_v47, %v2096_v29  ;;  %v2121_v29 = vadd.f32 %v4330_v13, %v5680_v47 }
 0x637   : > { %v2336_v31 = vpop.f32.mrf.mxu0  ;;  %4397 = vmatmul.mubr.bf16.gmra.mxu1 %v2435_v53 }
 0x638   : > { %v2337_v32 = vadd.f32 %v2336_v31, %v2068_v52  ;;  %v2415_v15 = vmax.f32 %v2345_v35, 0.0 }
 0x639   : > { %v4358_v8 = vpop.f32.mrf.mxu0 }
 0x63a   : > { %v2413_v7 = vmax.f32 %v2337_v32, 0.0  ;;  %v2437_v27 = vpack.c.bf16 %v2415_v15, %v2414_v0  ;;  %v2358_v38 = vadd.f32 %v4358_v8, %v2089_v4  ;;  %v2100_v32 = vadd.f32 %v5680_v47, %v2099_v22 }
 0x63b   : > { %v2349_v14 = vpop.f32.mrf.mxu0 }
 0x63c   : > { %v2436_v3 = vpack.c.bf16 %v2413_v7, %v2412_v58  ;;  %v2350_v34 = vadd.f32 %v2349_v14, %v2081_v59  ;;  %v2418_v46 = vmax.f32 %v2358_v38, 0.0  ;;  %v4331_v7 = vpop.f32.mrf.mxu1 }
 0x63d   : > { %v4359_v50 = vpop.f32.mrf.mxu0  ;;  %v2124_v22 = vadd.f32 %v4331_v7, %v5680_v47  ;;  %v5736_v7 = vld [vmem:[#allocation7 + $0x6] ss:$0 sm:$0xff] }
 0x63e   : > { %v2361_v17 = vadd.f32 %v4359_v50, %v2092_v36  ;;  %4400 = vmatprep.mubr.bf16.mxu1 %v2436_v3  ;;  %v2416_v45 = vmax.f32 %v2350_v34, 0.0  ;;  %v2115_v3 = vpop.f32.mrf.mxu1  ;;  %v2113_v50 = vadd.f32 %v5680_v47, %v2112_v1 }
 0x63f   : > { %v2352_v10 = vpop.f32.mrf.mxu0  ;;  %4401 = vmatmul.mubr.bf16.gmra.mxu1 %v2437_v27  ;;  %v2116_v38 = vadd.f32 %v5680_v47, %v2115_v3  ;;  %v4692_v47 = vld [vmem:[#allocation5 + $0x1e0] sm:$0xff]  }
 0x640   : > { %v2353_v9 = vadd.f32 %v2352_v10, %v2084_v56  ;;  %v2419_v39 = vmax.f32 %v2361_v17, 0.0  ;;  %4464 = vmatprep.subr.bf16.mxu1 %v4692_v47 }
 0x641   : > { %v4362_v44 = vpop.f32.mrf.mxu0  ;;  %4465 = vmatpush3.bf16.msra.mxu1 %v4692_v47 }
 0x642   : > { %v2417_v53 = vmax.f32 %v2353_v9, 0.0  ;;  %v2439_v54 = vpack.c.bf16 %v2419_v39, %v2418_v46  ;;  %v2374_v58 = vadd.f32 %v4362_v44, %v2105_v5 }
 0x643   : > { %v2365_v52 = vpop.f32.mrf.mxu0 }
 0x644   : > { %v2438_v35 = vpack.c.bf16 %v2417_v53, %v2416_v45  ;;  %v2366_v15 = vadd.f32 %v2365_v52, %v2097_v48  ;;  %v2422_v20 = vmax.f32 %v2374_v58, 0.0  ;;  %v4690_v48 = vld [vmem:[#allocation5 + $0x170] sm:$0xff]  }
 0x645   : > { %v4363_v31 = vpop.f32.mrf.mxu0  ;;  %4428 = vmatprep.subr.bf16.mxu0 %v4690_v48 }
 0x646   : > { %v2377_v8 = vadd.f32 %v4363_v31, %v2108_v33  ;;  %4404 = vmatprep.mubr.bf16.mxu1 %v2438_v35  ;;  %v2420_v59 = vmax.f32 %v2366_v15, 0.0  ;;  %4429 = vmatpush3.bf16.msra.mxu0 %v4690_v48  ;;  %v4691_v33 = vld [vmem:[#allocation5 + $0x168] sm:$0xff]   ;;  %v4693_v35 = vld [vmem:[#allocation5 + $0x1d8] sm:$0xff]  }
 0x647   : > { %v2368_v4 = vpop.f32.mrf.mxu0  ;;  %4405 = vmatmul.mubr.bf16.gmra.mxu1 %v2439_v54  ;;  %4430 = vmatprep.subr.bf16.mxu0 %v4691_v33  ;;  %v4694_v54 = vld [vmem:[#allocation5 + $0x1d0] sm:$0xff]   ;;  %v4695_v31 = vld [vmem:[#allocation5 + $0x1c8] sm:$0xff]   ;;  %v4697_v15 = vld [vmem:[#allocation5 + $0x1b8] sm:$0xff]  }
 0x648   : > { %v2369_v21 = vadd.f32 %v2368_v4, %v2100_v32  ;;  %v2423_v0 = vmax.f32 %v2377_v8, 0.0  ;;  %4466 = vmatprep.subr.bf16.mxu1 %v4693_v35  ;;  %v4696_v32 = vld [vmem:[#allocation5 + $0x1c0] sm:$0xff]  }
 0x649   : > { %v4366_v14 = vpop.f32.mrf.mxu0  ;;  %4467 = vmatpush3.bf16.msra.mxu1 %v4693_v35 }
 0x64a   : > { %v2421_v36 = vmax.f32 %v2369_v21, 0.0  ;;  %v2441_v34 = vpack.c.bf16 %v2423_v0, %v2422_v20  ;;  %v2390_v39 = vadd.f32 %v4366_v14, %v2121_v29  ;;  %4431 = vmatpush3.bf16.msra.mxu0 %v4691_v33  ;;  %4468 = vmatprep.subr.bf16.mxu1 %v4694_v54 }
 0x64b   : > { %v2381_v27 = vpop.f32.mrf.mxu0 }
 0x64c   : > { %v2440_v56 = vpack.c.bf16 %v2421_v36, %v2420_v59  ;;  %v2382_v10 = vadd.f32 %v2381_v27, %v2113_v50  ;;  %v2426_v46 = vmax.f32 %v2390_v39, 0.0 }
 0x64d   : > { %v4367_v17 = vpop.f32.mrf.mxu0  ;;  %4469 = vmatpush3.bf16.msra.mxu1 %v4694_v54 }
 0x64e   : > { %v2393_v9 = vadd.f32 %v4367_v17, %v2124_v22  ;;  %4408 = vmatprep.mubr.bf16.mxu1 %v2440_v56  ;;  %v2424_v53 = vmax.f32 %v2382_v10, 0.0  ;;  %4470 = vmatprep.subr.bf16.mxu1 %v4695_v31 }
 0x64f   : > { %v2384_v44 = vpop.f32.mrf.mxu0  ;;  %4409 = vmatmul.mubr.bf16.gmra.mxu1 %v2441_v34 }
 0x650   : > { %v2385_v45 = vadd.f32 %v2384_v44, %v2116_v38  ;;  %v2427_v13 = vmax.f32 %v2393_v9, 0.0 }
 0x651   : > { %4471 = vmatpush3.bf16.msra.mxu1 %v4695_v31 }
 0x652   : > { %v2425_v5 = vmax.f32 %v2385_v45, 0.0  ;;  %v2443_v1 = vpack.c.bf16 %v2427_v13, %v2426_v46  ;;  %4472 = vmatprep.subr.bf16.mxu1 %v4696_v32 }
 0x654   : > { %v2442_v52 = vpack.c.bf16 %v2425_v5, %v2424_v53 }
 0x655   : > { %4473 = vmatpush3.bf16.msra.mxu1 %v4696_v32 }
 0x656   : > { %4412 = vmatprep.mubr.bf16.mxu1 %v2442_v52  ;;  %4474 = vmatprep.subr.bf16.mxu1 %v4697_v15 }
 0x657   : > { %4413 = vmatmul.mubr.bf16.gmra.mxu1 %v2443_v1 }
 0x659   : > { %4475 = vmatpush3.bf16.msra.mxu1 %v4697_v15 }
 0x6dc   : > { %v4386_v8 = vpop.f32.mrf.mxu1 }
 0x6dd   : > { %v2556_v14 = vadd.f32 %v4386_v8, %v5736_v7 }
 0x6de   : > { %v2547_v58 = vpop.f32.mrf.mxu1 }
 0x6df   : > { %v2548_v21 = vadd.f32 %v5736_v7, %v2547_v58  ;;  %v2676_v27 = vmax.f32 %v2556_v14, 0.0 }
 0x6e0   : > { %v4387_v4 = vpop.f32.mrf.mxu1 }
 0x6e1   : > { %v2559_v0 = vadd.f32 %v4387_v4, %v5736_v7  ;;  %v2674_v20 = vmax.f32 %v2548_v21, 0.0 }
 0x6e2   : > { %v2550_v59 = vpop.f32.mrf.mxu1 }
 0x6e3   : > { %v2551_v36 = vadd.f32 %v5736_v7, %v2550_v59  ;;  %v2677_v29 = vmax.f32 %v2559_v0, 0.0 }
 0x6e5   : > { %v2675_v3 = vmax.f32 %v2551_v36, 0.0  ;;  %v2707_v56 = vpack.c.bf16 %v2677_v29, %v2676_v27 }
 0x6e7   : > { %v2706_v50 = vpack.c.bf16 %v2675_v3, %v2674_v20  ;;  %v4390_v22 = vpop.f32.mrf.mxu1 }
 0x6e8   : > { %v2572_v9 = vadd.f32 %v4390_v22, %v5736_v7 }
 0x6e9   : > { %v2563_v34 = vpop.f32.mrf.mxu1  ;;  %4432 = vmatprep.mubr.bf16.mxu0 %v2706_v50 }
 0x6ea   : > { %4433 = vmatmul.mubr.bf16.vlgmr.msra.gmra.mxu0 %v2707_v56  ;;  %v2564_v38 = vadd.f32 %v5736_v7, %v2563_v34  ;;  %v2680_v46 = vmax.f32 %v2572_v9, 0.0 }
 0x6eb   : > { %v4391_v17 = vpop.f32.mrf.mxu1 }
 0x6ec   : > { %v2575_v10 = vadd.f32 %v4391_v17, %v5736_v7  ;;  %v2678_v53 = vmax.f32 %v2564_v38, 0.0 }
 0x6ed   : > { %v2566_v39 = vpop.f32.mrf.mxu1 }
 0x6ee   : > { %v2567_v44 = vadd.f32 %v5736_v7, %v2566_v39  ;;  %v2681_v45 = vmax.f32 %v2575_v10, 0.0 }
 0x6ef   : > { %v4394_v13 = vpop.f32.mrf.mxu1 }
 0x6f0   : > { %v2679_v5 = vmax.f32 %v2567_v44, 0.0  ;;  %v2709_v48 = vpack.c.bf16 %v2681_v45, %v2680_v46  ;;  %v2588_v54 = vadd.f32 %v4394_v13, %v5736_v7 }
 0x6f1   : > { %v2579_v52 = vpop.f32.mrf.mxu1 }
 0x6f2   : > { %v2708_v1 = vpack.c.bf16 %v2679_v5, %v2678_v53  ;;  %v2580_v47 = vadd.f32 %v5736_v7, %v2579_v52  ;;  %v2684_v21 = vmax.f32 %v2588_v54, 0.0 }
 0x6f3   : > { %v4395_v33 = vpop.f32.mrf.mxu1 }
 0x6f4   : > { %v2591_v35 = vadd.f32 %v4395_v33, %v5736_v7  ;;  %4436 = vmatprep.mubr.bf16.mxu0 %v2708_v1  ;;  %v2682_v58 = vmax.f32 %v2580_v47, 0.0 }
 0x6f5   : > { %v2582_v31 = vpop.f32.mrf.mxu1  ;;  %4437 = vmatmul.mubr.bf16.gmra.mxu0 %v2709_v48 }
 0x6f6   : > { %v2583_v32 = vadd.f32 %v5736_v7, %v2582_v31  ;;  %v2685_v15 = vmax.f32 %v2591_v35, 0.0 }
 0x6f7   : > { %v4398_v8 = vpop.f32.mrf.mxu1 }
 0x6f8   : > { %v2683_v4 = vmax.f32 %v2583_v32, 0.0  ;;  %v2711_v59 = vpack.c.bf16 %v2685_v15, %v2684_v21  ;;  %v2604_v3 = vadd.f32 %v4398_v8, %v5736_v7 }
 0x6f9   : > { %v2595_v0 = vpop.f32.mrf.mxu1 }
 0x6fa   : > { %v2710_v14 = vpack.c.bf16 %v2683_v4, %v2682_v58  ;;  %v2596_v29 = vadd.f32 %v5736_v7, %v2595_v0  ;;  %v2688_v38 = vmax.f32 %v2604_v3, 0.0 }
 0x6fb   : > { %v4399_v36 = vpop.f32.mrf.mxu1 }
 0x6fc   : > { %v2607_v20 = vadd.f32 %v4399_v36, %v5736_v7  ;;  %4440 = vmatprep.mubr.bf16.mxu0 %v2710_v14  ;;  %v2686_v34 = vmax.f32 %v2596_v29, 0.0 }
 0x6fd   : > { %v2598_v27 = vpop.f32.mrf.mxu1  ;;  %4441 = vmatmul.mubr.bf16.gmra.mxu0 %v2711_v59 }
 0x6fe   : > { %v2599_v50 = vadd.f32 %v5736_v7, %v2598_v27  ;;  %v2689_v22 = vmax.f32 %v2607_v20, 0.0 }
 0x6ff   : > { %v4402_v56 = vpop.f32.mrf.mxu1 }
 0x700   : > { %v2687_v17 = vmax.f32 %v2599_v50, 0.0  ;;  %v2713_v39 = vpack.c.bf16 %v2689_v22, %v2688_v38  ;;  %v2620_v53 = vadd.f32 %v4402_v56, %v5736_v7 }
 0x701   : > { %v2611_v10 = vpop.f32.mrf.mxu1 }
 0x702   : > { %v2712_v9 = vpack.c.bf16 %v2687_v17, %v2686_v34  ;;  %v2612_v45 = vadd.f32 %v5736_v7, %v2611_v10  ;;  %v2692_v47 = vmax.f32 %v2620_v53, 0.0 }
 0x703   : > { %v4403_v44 = vpop.f32.mrf.mxu1 }
 0x704   : > { %v2623_v13 = vadd.f32 %v4403_v44, %v5736_v7  ;;  %4444 = vmatprep.mubr.bf16.mxu0 %v2712_v9  ;;  %v2690_v48 = vmax.f32 %v2612_v45, 0.0 }
 0x705   : > { %v2614_v5 = vpop.f32.mrf.mxu1  ;;  %4445 = vmatmul.mubr.bf16.gmra.mxu0 %v2713_v39 }
 0x706   : > { %v2615_v46 = vadd.f32 %v5736_v7, %v2614_v5  ;;  %v2693_v52 = vmax.f32 %v2623_v13, 0.0 }
 0x707   : > { %v4406_v1 = vpop.f32.mrf.mxu1 }
 0x708   : > { %v2691_v33 = vmax.f32 %v2615_v46, 0.0  ;;  %v2715_v31 = vpack.c.bf16 %v2693_v52, %v2692_v47  ;;  %v2636_v58 = vadd.f32 %v4406_v1, %v5736_v7 }
 0x709   : > { %v2627_v35 = vpop.f32.mrf.mxu1 }
 0x70a   : > { %v2714_v54 = vpack.c.bf16 %v2691_v33, %v2690_v48  ;;  %v2628_v15 = vadd.f32 %v5736_v7, %v2627_v35  ;;  %v2696_v29 = vmax.f32 %v2636_v58, 0.0  ;;  %v4698_v58 = vld [vmem:[#allocation5 + $0x1b0] sm:$0xff]  }
 0x70b   : > { %v4407_v32 = vpop.f32.mrf.mxu1  ;;  %4476 = vmatprep.subr.bf16.mxu1 %v4698_v58 }
 0x70c   : > { %v2639_v8 = vadd.f32 %v4407_v32, %v5736_v7  ;;  %4448 = vmatprep.mubr.bf16.mxu0 %v2714_v54  ;;  %v2694_v59 = vmax.f32 %v2628_v15, 0.0  ;;  %4477 = vmatpush3.bf16.msra.mxu1 %v4698_v58 }
 0x70d   : > { %v2630_v4 = vpop.f32.mrf.mxu1  ;;  %4449 = vmatmul.mubr.bf16.gmra.mxu0 %v2715_v31 }
 0x70e   : > { %v2631_v21 = vadd.f32 %v5736_v7, %v2630_v4  ;;  %v2697_v0 = vmax.f32 %v2639_v8, 0.0  ;;  %v4699_v4 = vld [vmem:[#allocation5 + $0x1a8] sm:$0xff]  }
 0x70f   : > { %v4410_v14 = vpop.f32.mrf.mxu1  ;;  %4478 = vmatprep.subr.bf16.mxu1 %v4699_v4 }
 0x710   : > { %v2695_v36 = vmax.f32 %v2631_v21, 0.0  ;;  %v2717_v27 = vpack.c.bf16 %v2697_v0, %v2696_v29  ;;  %v2652_v34 = vadd.f32 %v4410_v14, %v5736_v7  ;;  %4479 = vmatpush3.bf16.msra.mxu1 %v4699_v4  ;;  %v4700_v21 = vld [vmem:[#allocation5 + $0x220] sm:$0xff]   ;;  %v4701_v0 = vld [vmem:[#allocation5 + $0x218] sm:$0xff]   ;;  %v4703_v14 = vld [vmem:[#allocation5 + $0x208] sm:$0xff]  }
 0x711   : > { %v2643_v20 = vpop.f32.mrf.mxu1  ;;  %4512 = vmatprep.subr.bf16.mxu0 %v4700_v21 }
 0x712   : > { %v2716_v3 = vpack.c.bf16 %v2695_v36, %v2694_v59  ;;  %v2644_v22 = vadd.f32 %v5736_v7, %v2643_v20  ;;  %v2700_v45 = vmax.f32 %v2652_v34, 0.0  ;;  %4513 = vmatpush3.bf16.msra.mxu0 %v4700_v21  ;;  %v4704_v59 = vld [vmem:[#allocation5 + $0x200] sm:$0xff]   ;;  %v4705_v36 = vld [vmem:[#allocation5 + $0x1f8] sm:$0xff]  }
 0x713   : > { %v4411_v50 = vpop.f32.mrf.mxu1  ;;  %4514 = vmatprep.subr.bf16.mxu0 %v4701_v0 }
 0x714   : > { %v2655_v56 = vadd.f32 %v4411_v50, %v5736_v7  ;;  %4452 = vmatprep.mubr.bf16.mxu0 %v2716_v3  ;;  %v2698_v39 = vmax.f32 %v2644_v22, 0.0  ;;  %v5770_v3 = vld [vmem:[#allocation7 + $0x7] ss:$0 sm:$0xff] }
 0x715   : > { %v2646_v17 = vpop.f32.mrf.mxu1  ;;  %4453 = vmatmul.mubr.bf16.gmra.mxu0 %v2717_v27 }
 0x716   : > { %v2647_v38 = vadd.f32 %v5736_v7, %v2646_v17  ;;  %v2701_v10 = vmax.f32 %v2655_v56, 0.0  ;;  %4515 = vmatpush3.bf16.msra.mxu0 %v4701_v0 }
 0x717   : > { %v4414_v9 = vpop.f32.mrf.mxu1 }
 0x718   : > { %v2699_v44 = vmax.f32 %v2647_v38, 0.0  ;;  %v2719_v5 = vpack.c.bf16 %v2701_v10, %v2700_v45  ;;  %v2668_v48 = vadd.f32 %v4414_v9, %v5736_v7 }
 0x719   : > { %v2659_v13 = vpop.f32.mrf.mxu1 }
 0x71a   : > { %v2718_v53 = vpack.c.bf16 %v2699_v44, %v2698_v39  ;;  %v2660_v52 = vadd.f32 %v5736_v7, %v2659_v13  ;;  %v2704_v32 = vmax.f32 %v2668_v48, 0.0 }
 0x71b   : > { %v4415_v46 = vpop.f32.mrf.mxu1 }
 0x71c   : > { %v2671_v1 = vadd.f32 %v4415_v46, %v5736_v7  ;;  %4456 = vmatprep.mubr.bf16.mxu0 %v2718_v53  ;;  %v2702_v54 = vmax.f32 %v2660_v52, 0.0 }
 0x71d   : > { %v2662_v33 = vpop.f32.mrf.mxu1  ;;  %4457 = vmatmul.mubr.bf16.gmra.mxu0 %v2719_v5 }
 0x71e   : > { %v2663_v47 = vadd.f32 %v5736_v7, %v2662_v33  ;;  %v2705_v35 = vmax.f32 %v2671_v1, 0.0  ;;  %v4702_v7 = vld [vmem:[#allocation5 + $0x210] sm:$0xff]  }
 0x71f   : > { %4516 = vmatprep.subr.bf16.mxu0 %v4702_v7 }
 0x720   : > { %v2703_v31 = vmax.f32 %v2663_v47, 0.0  ;;  %v2721_v8 = vpack.c.bf16 %v2705_v35, %v2704_v32  ;;  %4517 = vmatpush3.bf16.msra.mxu0 %v4702_v7 }
 0x721   : > { %4518 = vmatprep.subr.bf16.mxu0 %v4703_v14 }
 0x722   : > { %v2720_v15 = vpack.c.bf16 %v2703_v31, %v2702_v54 }
 0x724   : > { %4460 = vmatprep.mubr.bf16.mxu0 %v2720_v15  ;;  %4519 = vmatpush3.bf16.msra.mxu0 %v4703_v14 }
 0x725   : > { %4461 = vmatmul.mubr.bf16.gmra.mxu0 %v2721_v8  ;;  %4520 = vmatprep.subr.bf16.mxu0 %v4704_v59 }
 0x728   : > { %4521 = vmatpush3.bf16.msra.mxu0 %v4704_v59 }
 0x729   : > { %4522 = vmatprep.subr.bf16.mxu0 %v4705_v36 }
 0x72c   : > { %4523 = vmatpush3.bf16.msra.mxu0 %v4705_v36 }
 0x7aa   : > { %v4434_v29 = vpop.f32.mrf.mxu0 }
 0x7ab   : > { %v2834_v56 = vadd.f32 %v4434_v29, %v5770_v3 }
 0x7ac   : > { %v2825_v20 = vpop.f32.mrf.mxu0 }
 0x7ad   : > { %v2826_v50 = vadd.f32 %v5770_v3, %v2825_v20  ;;  %v2954_v39 = vmax.f32 %v2834_v56, 0.0 }
 0x7ae   : > { %v4435_v27 = vpop.f32.mrf.mxu0 }
 0x7af   : > { %v2837_v22 = vadd.f32 %v4435_v27, %v5770_v3  ;;  %v2952_v10 = vmax.f32 %v2826_v50, 0.0 }
 0x7b0   : > { %v2828_v34 = vpop.f32.mrf.mxu0 }
 0x7b1   : > { %v2829_v17 = vadd.f32 %v5770_v3, %v2828_v34  ;;  %v2955_v38 = vmax.f32 %v2837_v22, 0.0 }
 0x7b3   : > { %v2953_v9 = vmax.f32 %v2829_v17, 0.0  ;;  %v2985_v13 = vpack.c.bf16 %v2955_v38, %v2954_v39 }
 0x7b5   : > { %v2984_v44 = vpack.c.bf16 %v2953_v9, %v2952_v10  ;;  %v4438_v45 = vpop.f32.mrf.mxu0 }
 0x7b6   : > { %v2850_v1 = vadd.f32 %v4438_v45, %v5770_v3 }
 0x7b7   : > { %v2841_v53 = vpop.f32.mrf.mxu0  ;;  %4480 = vmatprep.mubr.bf16.mxu1 %v2984_v44 }
 0x7b8   : > { %4481 = vmatmul.mubr.bf16.vlgmr.msra.gmra.mxu1 %v2985_v13  ;;  %v2842_v46 = vadd.f32 %v5770_v3, %v2841_v53  ;;  %v2958_v32 = vmax.f32 %v2850_v1, 0.0 }
 0x7b9   : > { %v4439_v5 = vpop.f32.mrf.mxu0 }
 0x7ba   : > { %v2853_v52 = vadd.f32 %v4439_v5, %v5770_v3  ;;  %v2956_v54 = vmax.f32 %v2842_v46, 0.0 }
 0x7bb   : > { %v2844_v48 = vpop.f32.mrf.mxu0 }
 0x7bc   : > { %v2845_v33 = vadd.f32 %v5770_v3, %v2844_v48  ;;  %v2959_v47 = vmax.f32 %v2853_v52, 0.0 }
 0x7bd   : > { %v4442_v35 = vpop.f32.mrf.mxu0 }
 0x7be   : > { %v2957_v31 = vmax.f32 %v2845_v33, 0.0  ;;  %v2987_v58 = vpack.c.bf16 %v2959_v47, %v2958_v32  ;;  %v2866_v7 = vadd.f32 %v4442_v35, %v5770_v3 }
 0x7bf   : > { %v2857_v15 = vpop.f32.mrf.mxu0 }
 0x7c0   : > { %v2986_v8 = vpack.c.bf16 %v2957_v31, %v2956_v54  ;;  %v2858_v21 = vadd.f32 %v5770_v3, %v2857_v15  ;;  %v2962_v50 = vmax.f32 %v2866_v7, 0.0 }
 0x7c1   : > { %v4443_v4 = vpop.f32.mrf.mxu0 }
 0x7c2   : > { %v2869_v0 = vadd.f32 %v4443_v4, %v5770_v3  ;;  %4484 = vmatprep.mubr.bf16.mxu1 %v2986_v8  ;;  %v2960_v20 = vmax.f32 %v2858_v21, 0.0 }
 0x7c3   : > { %v2860_v14 = vpop.f32.mrf.mxu0  ;;  %4485 = vmatmul.mubr.bf16.gmra.mxu1 %v2987_v58 }
 0x7c4   : > { %v2861_v59 = vadd.f32 %v5770_v3, %v2860_v14  ;;  %v2963_v36 = vmax.f32 %v2869_v0, 0.0 }
 0x7c5   : > { %v4446_v29 = vpop.f32.mrf.mxu0 }
 0x7c6   : > { %v2961_v27 = vmax.f32 %v2861_v59, 0.0  ;;  %v2989_v34 = vpack.c.bf16 %v2963_v36, %v2962_v50  ;;  %v2882_v9 = vadd.f32 %v4446_v29, %v5770_v3 }
 0x7c7   : > { %v2873_v22 = vpop.f32.mrf.mxu0 }
 0x7c8   : > { %v2988_v56 = vpack.c.bf16 %v2961_v27, %v2960_v20  ;;  %v2874_v38 = vadd.f32 %v5770_v3, %v2873_v22  ;;  %v2966_v46 = vmax.f32 %v2882_v9, 0.0 }
 0x7c9   : > { %v4447_v17 = vpop.f32.mrf.mxu0 }
 0x7ca   : > { %v2885_v10 = vadd.f32 %v4447_v17, %v5770_v3  ;;  %4488 = vmatprep.mubr.bf16.mxu1 %v2988_v56  ;;  %v2964_v53 = vmax.f32 %v2874_v38, 0.0 }
 0x7cb   : > { %v2876_v39 = vpop.f32.mrf.mxu0  ;;  %4489 = vmatmul.mubr.bf16.gmra.mxu1 %v2989_v34 }
 0x7cc   : > { %v2877_v44 = vadd.f32 %v5770_v3, %v2876_v39  ;;  %v2967_v45 = vmax.f32 %v2885_v10, 0.0 }
 0x7cd   : > { %v4450_v13 = vpop.f32.mrf.mxu0 }
 0x7ce   : > { %v2965_v5 = vmax.f32 %v2877_v44, 0.0  ;;  %v2991_v48 = vpack.c.bf16 %v2967_v45, %v2966_v46  ;;  %v2898_v54 = vadd.f32 %v4450_v13, %v5770_v3 }
 0x7cf   : > { %v2889_v52 = vpop.f32.mrf.mxu0 }
 0x7d0   : > { %v2990_v1 = vpack.c.bf16 %v2965_v5, %v2964_v53  ;;  %v2890_v47 = vadd.f32 %v5770_v3, %v2889_v52  ;;  %v2970_v21 = vmax.f32 %v2898_v54, 0.0 }
 0x7d1   : > { %v4451_v33 = vpop.f32.mrf.mxu0 }
 0x7d2   : > { %v2901_v35 = vadd.f32 %v4451_v33, %v5770_v3  ;;  %4492 = vmatprep.mubr.bf16.mxu1 %v2990_v1  ;;  %v2968_v58 = vmax.f32 %v2890_v47, 0.0 }
 0x7d3   : > { %v2892_v31 = vpop.f32.mrf.mxu0  ;;  %4493 = vmatmul.mubr.bf16.gmra.mxu1 %v2991_v48 }
 0x7d4   : > { %v2893_v32 = vadd.f32 %v5770_v3, %v2892_v31  ;;  %v2971_v15 = vmax.f32 %v2901_v35, 0.0 }
 0x7d5   : > { %v4454_v8 = vpop.f32.mrf.mxu0 }
 0x7d6   : > { %v2969_v4 = vmax.f32 %v2893_v32, 0.0  ;;  %v2993_v14 = vpack.c.bf16 %v2971_v15, %v2970_v21  ;;  %v2914_v20 = vadd.f32 %v4454_v8, %v5770_v3 }
 0x7d7   : > { %v2905_v0 = vpop.f32.mrf.mxu0 }
 0x7d8   : > { %v2992_v7 = vpack.c.bf16 %v2969_v4, %v2968_v58  ;;  %v2906_v36 = vadd.f32 %v5770_v3, %v2905_v0  ;;  %v2974_v38 = vmax.f32 %v2914_v20, 0.0  ;;  %v4706_v20 = vld [vmem:[#allocation5 + $0x1f0] sm:$0xff]  }
 0x7d9   : > { %v4455_v59 = vpop.f32.mrf.mxu0  ;;  %4524 = vmatprep.subr.bf16.mxu0 %v4706_v20 }
 0x7da   : > { %v2917_v29 = vadd.f32 %v4455_v59, %v5770_v3  ;;  %4496 = vmatprep.mubr.bf16.mxu1 %v2992_v7  ;;  %v2972_v34 = vmax.f32 %v2906_v36, 0.0  ;;  %4525 = vmatpush3.bf16.msra.mxu0 %v4706_v20 }
 0x7db   : > { %v2908_v27 = vpop.f32.mrf.mxu0  ;;  %4497 = vmatmul.mubr.bf16.gmra.mxu1 %v2993_v14 }
 0x7dc   : > { %v2909_v50 = vadd.f32 %v5770_v3, %v2908_v27  ;;  %v2975_v22 = vmax.f32 %v2917_v29, 0.0  ;;  %v4707_v27 = vld [vmem:[#allocation5 + $0x1e8] sm:$0xff]  }
 0x7dd   : > { %v4458_v56 = vpop.f32.mrf.mxu0  ;;  %4526 = vmatprep.subr.bf16.mxu0 %v4707_v27 }
 0x7de   : > { %v2973_v17 = vmax.f32 %v2909_v50, 0.0  ;;  %v2995_v39 = vpack.c.bf16 %v2975_v22, %v2974_v38  ;;  %v2930_v53 = vadd.f32 %v4458_v56, %v5770_v3  ;;  %4527 = vmatpush3.bf16.msra.mxu0 %v4707_v27  ;;  %v5804_v56 = vld [vmem:[#allocation7 + $0x8] ss:$0 sm:$0xff] }
 0x7df   : > { %v2921_v10 = vpop.f32.mrf.mxu0 }
 0x7e0   : > { %v2994_v9 = vpack.c.bf16 %v2973_v17, %v2972_v34  ;;  %v2922_v45 = vadd.f32 %v5770_v3, %v2921_v10  ;;  %v2978_v47 = vmax.f32 %v2930_v53, 0.0 }
 0x7e1   : > { %v4459_v44 = vpop.f32.mrf.mxu0 }
 0x7e2   : > { %v2933_v13 = vadd.f32 %v4459_v44, %v5770_v3  ;;  %4500 = vmatprep.mubr.bf16.mxu1 %v2994_v9  ;;  %v2976_v48 = vmax.f32 %v2922_v45, 0.0 }
 0x7e3   : > { %v2924_v5 = vpop.f32.mrf.mxu0  ;;  %4501 = vmatmul.mubr.bf16.gmra.mxu1 %v2995_v39 }
 0x7e4   : > { %v2925_v46 = vadd.f32 %v5770_v3, %v2924_v5  ;;  %v2979_v52 = vmax.f32 %v2933_v13, 0.0 }
 0x7e5   : > { %v4462_v1 = vpop.f32.mrf.mxu0 }
 0x7e6   : > { %v2977_v33 = vmax.f32 %v2925_v46, 0.0  ;;  %v2997_v31 = vpack.c.bf16 %v2979_v52, %v2978_v47  ;;  %v2946_v58 = vadd.f32 %v4462_v1, %v5770_v3 }
 0x7e7   : > { %v2937_v35 = vpop.f32.mrf.mxu0 }
 0x7e8   : > { %v2996_v54 = vpack.c.bf16 %v2977_v33, %v2976_v48  ;;  %v2938_v15 = vadd.f32 %v5770_v3, %v2937_v35  ;;  %v2982_v59 = vmax.f32 %v2946_v58, 0.0 }
 0x7e9   : > { %v4463_v32 = vpop.f32.mrf.mxu0 }
 0x7ea   : > { %v2949_v8 = vadd.f32 %v4463_v32, %v5770_v3  ;;  %4504 = vmatprep.mubr.bf16.mxu1 %v2996_v54  ;;  %v2980_v7 = vmax.f32 %v2938_v15, 0.0 }
 0x7eb   : > { %v2940_v4 = vpop.f32.mrf.mxu0  ;;  %4505 = vmatmul.mubr.bf16.gmra.mxu1 %v2997_v31 }
 0x7ec   : > { %v2941_v21 = vadd.f32 %v5770_v3, %v2940_v4  ;;  %v2983_v0 = vmax.f32 %v2949_v8, 0.0 }
 0x7ee   : > { %v2981_v14 = vmax.f32 %v2941_v21, 0.0  ;;  %v2999_v29 = vpack.c.bf16 %v2983_v0, %v2982_v59 }
 0x7f0   : > { %v2998_v36 = vpack.c.bf16 %v2981_v14, %v2980_v7 }
 0x7f2   : > { %4508 = vmatprep.mubr.bf16.mxu1 %v2998_v36 }
 0x7f3   : > { %4509 = vmatmul.mubr.bf16.gmra.mxu1 %v2999_v29 }
 0x878   : > { %v4482_v50 = vpop.f32.mrf.mxu1 }
 0x879   : > { %v3112_v38 = vadd.f32 %v4482_v50, %v5804_v56 }
 0x87a   : > { %v3103_v22 = vpop.f32.mrf.mxu1 }
 0x87b   : > { %v3104_v3 = vadd.f32 %v5804_v56, %v3103_v22  ;;  %v3232_v13 = vmax.f32 %v3112_v38, 0.0 }
 0x87c   : > { %v4483_v34 = vpop.f32.mrf.mxu1 }
 0x87d   : > { %v3115_v17 = vadd.f32 %v4483_v34, %v5804_v56  ;;  %v3230_v44 = vmax.f32 %v3104_v3, 0.0 }
 0x87e   : > { %v3106_v10 = vpop.f32.mrf.mxu1 }
 0x87f   : > { %v3107_v9 = vadd.f32 %v5804_v56, %v3106_v10  ;;  %v3233_v39 = vmax.f32 %v3115_v17, 0.0 }
 0x881   : > { %v3231_v45 = vmax.f32 %v3107_v9, 0.0  ;;  %v3263_v46 = vpack.c.bf16 %v3233_v39, %v3232_v13 }
 0x883   : > { %v3262_v53 = vpack.c.bf16 %v3231_v45, %v3230_v44  ;;  %v4486_v5 = vpop.f32.mrf.mxu1 }
 0x884   : > { %v3128_v47 = vadd.f32 %v4486_v5, %v5804_v56 }
 0x885   : > { %v3119_v52 = vpop.f32.mrf.mxu1  ;;  %4528 = vmatprep.mubr.bf16.mxu0 %v3262_v53 }
 0x886   : > { %4529 = vmatmul.mubr.bf16.vlgmr.msra.gmra.mxu0 %v3263_v46  ;;  %v3120_v48 = vadd.f32 %v5804_v56, %v3119_v52  ;;  %v3236_v58 = vmax.f32 %v3128_v47, 0.0 }
 0x887   : > { %v4487_v1 = vpop.f32.mrf.mxu1 }
 0x888   : > { %v3131_v33 = vadd.f32 %v4487_v1, %v5804_v56  ;;  %v3234_v15 = vmax.f32 %v3120_v48, 0.0 }
 0x889   : > { %v3122_v35 = vpop.f32.mrf.mxu1 }
 0x88a   : > { %v3123_v54 = vadd.f32 %v5804_v56, %v3122_v35  ;;  %v3237_v31 = vmax.f32 %v3131_v33, 0.0 }
 0x88b   : > { %v4490_v32 = vpop.f32.mrf.mxu1 }
 0x88c   : > { %v3235_v8 = vmax.f32 %v3123_v54, 0.0  ;;  %v3265_v0 = vpack.c.bf16 %v3237_v31, %v3236_v58  ;;  %v3144_v36 = vadd.f32 %v4490_v32, %v5804_v56 }
 0x88d   : > { %v3135_v4 = vpop.f32.mrf.mxu1 }
 0x88e   : > { %v3264_v21 = vpack.c.bf16 %v3235_v8, %v3234_v15  ;;  %v3136_v14 = vadd.f32 %v5804_v56, %v3135_v4  ;;  %v3240_v3 = vmax.f32 %v3144_v36, 0.0 }
 0x88f   : > { %v4491_v7 = vpop.f32.mrf.mxu1 }
 0x890   : > { %v3147_v59 = vadd.f32 %v4491_v7, %v5804_v56  ;;  %4532 = vmatprep.mubr.bf16.mxu0 %v3264_v21  ;;  %v3238_v22 = vmax.f32 %v3136_v14, 0.0 }
 0x891   : > { %v3138_v29 = vpop.f32.mrf.mxu1  ;;  %4533 = vmatmul.mubr.bf16.gmra.mxu0 %v3265_v0 }
 0x892   : > { %v3139_v20 = vadd.f32 %v5804_v56, %v3138_v29  ;;  %v3241_v27 = vmax.f32 %v3147_v59, 0.0 }
 0x893   : > { %v4494_v50 = vpop.f32.mrf.mxu1 }
 0x894   : > { %v3239_v34 = vmax.f32 %v3139_v20, 0.0  ;;  %v3267_v10 = vpack.c.bf16 %v3241_v27, %v3240_v3  ;;  %v3160_v45 = vadd.f32 %v4494_v50, %v5804_v56 }
 0x895   : > { %v3151_v17 = vpop.f32.mrf.mxu1 }
 0x896   : > { %v3266_v38 = vpack.c.bf16 %v3239_v34, %v3238_v22  ;;  %v3152_v39 = vadd.f32 %v5804_v56, %v3151_v17  ;;  %v3244_v48 = vmax.f32 %v3160_v45, 0.0 }
 0x897   : > { %v4495_v9 = vpop.f32.mrf.mxu1 }
 0x898   : > { %v3163_v44 = vadd.f32 %v4495_v9, %v5804_v56  ;;  %4536 = vmatprep.mubr.bf16.mxu0 %v3266_v38  ;;  %v3242_v52 = vmax.f32 %v3152_v39, 0.0 }
 0x899   : > { %v3154_v13 = vpop.f32.mrf.mxu1  ;;  %4537 = vmatmul.mubr.bf16.gmra.mxu0 %v3267_v10 }
 0x89a   : > { %v3155_v53 = vadd.f32 %v5804_v56, %v3154_v13  ;;  %v3245_v5 = vmax.f32 %v3163_v44, 0.0 }
 0x89b   : > { %v4498_v46 = vpop.f32.mrf.mxu1 }
 0x89c   : > { %v3243_v1 = vmax.f32 %v3155_v53, 0.0  ;;  %v3269_v35 = vpack.c.bf16 %v3245_v5, %v3244_v48  ;;  %v3176_v15 = vadd.f32 %v4498_v46, %v5804_v56 }
 0x89d   : > { %v3167_v33 = vpop.f32.mrf.mxu1 }
 0x89e   : > { %v3268_v47 = vpack.c.bf16 %v3243_v1, %v3242_v52  ;;  %v3168_v31 = vadd.f32 %v5804_v56, %v3167_v33  ;;  %v3248_v14 = vmax.f32 %v3176_v15, 0.0 }
 0x89f   : > { %v4499_v54 = vpop.f32.mrf.mxu1 }
 0x8a0   : > { %v3179_v32 = vadd.f32 %v4499_v54, %v5804_v56  ;;  %4540 = vmatprep.mubr.bf16.mxu0 %v3268_v47  ;;  %v3246_v0 = vmax.f32 %v3168_v31, 0.0 }
 0x8a1   : > { %v3170_v8 = vpop.f32.mrf.mxu1  ;;  %4541 = vmatmul.mubr.bf16.gmra.mxu0 %v3269_v35 }
 0x8a2   : > { %v3171_v58 = vadd.f32 %v5804_v56, %v3170_v8  ;;  %v3249_v4 = vmax.f32 %v3179_v32, 0.0 }
 0x8a3   : > { %v4502_v21 = vpop.f32.mrf.mxu1 }
 0x8a4   : > { %v3247_v7 = vmax.f32 %v3171_v58, 0.0  ;;  %v3271_v29 = vpack.c.bf16 %v3249_v4, %v3248_v14  ;;  %v3192_v22 = vadd.f32 %v4502_v21, %v5804_v56 }
 0x8a5   : > { %v3183_v59 = vpop.f32.mrf.mxu1 }
 0x8a6   : > { %v3270_v36 = vpack.c.bf16 %v3247_v7, %v3246_v0  ;;  %v3184_v27 = vadd.f32 %v5804_v56, %v3183_v59  ;;  %v3252_v39 = vmax.f32 %v3192_v22, 0.0  ;;  %v5838_v22 = vld [vmem:[#allocation7 + $0x9] ss:$0 sm:$0xff] }
 0x8a7   : > { %v4503_v20 = vpop.f32.mrf.mxu1 }
 0x8a8   : > { %v3195_v50 = vadd.f32 %v4503_v20, %v5804_v56  ;;  %4544 = vmatprep.mubr.bf16.mxu0 %v3270_v36  ;;  %v3250_v10 = vmax.f32 %v3184_v27, 0.0 }
 0x8a9   : > { %v3186_v34 = vpop.f32.mrf.mxu1  ;;  %4545 = vmatmul.mubr.bf16.gmra.mxu0 %v3271_v29 }
 0x8aa   : > { %v3187_v3 = vadd.f32 %v5804_v56, %v3186_v34  ;;  %v3253_v17 = vmax.f32 %v3195_v50, 0.0 }
 0x8ab   : > { %v4506_v38 = vpop.f32.mrf.mxu1 }
 0x8ac   : > { %v3251_v9 = vmax.f32 %v3187_v3, 0.0  ;;  %v3273_v13 = vpack.c.bf16 %v3253_v17, %v3252_v39  ;;  %v3208_v52 = vadd.f32 %v4506_v38, %v5804_v56 }
 0x8ad   : > { %v3199_v44 = vpop.f32.mrf.mxu1 }
 0x8ae   : > { %v3272_v45 = vpack.c.bf16 %v3251_v9, %v3250_v10  ;;  %v3200_v5 = vadd.f32 %v5804_v56, %v3199_v44  ;;  %v3256_v31 = vmax.f32 %v3208_v52, 0.0 }
 0x8af   : > { %v4507_v53 = vpop.f32.mrf.mxu1 }
 0x8b0   : > { %v3211_v46 = vadd.f32 %v4507_v53, %v5804_v56  ;;  %4548 = vmatprep.mubr.bf16.mxu0 %v3272_v45  ;;  %v3254_v35 = vmax.f32 %v3200_v5, 0.0 }
 0x8b1   : > { %v3202_v1 = vpop.f32.mrf.mxu1  ;;  %4549 = vmatmul.mubr.bf16.gmra.mxu0 %v3273_v13 }
 0x8b2   : > { %v3203_v48 = vadd.f32 %v5804_v56, %v3202_v1  ;;  %v3257_v33 = vmax.f32 %v3211_v46, 0.0 }
 0x8b3   : > { %v4510_v47 = vpop.f32.mrf.mxu1 }
 0x8b4   : > { %v3255_v54 = vmax.f32 %v3203_v48, 0.0  ;;  %v3275_v8 = vpack.c.bf16 %v3257_v33, %v3256_v31  ;;  %v3224_v0 = vadd.f32 %v4510_v47, %v5804_v56 }
 0x8b5   : > { %v3215_v32 = vpop.f32.mrf.mxu1 }
 0x8b6   : > { %v3274_v15 = vpack.c.bf16 %v3255_v54, %v3254_v35  ;;  %v3216_v4 = vadd.f32 %v5804_v56, %v3215_v32  ;;  %v3260_v20 = vmax.f32 %v3224_v0, 0.0 }
 0x8b7   : > { %v4511_v58 = vpop.f32.mrf.mxu1 }
 0x8b8   : > { %v3227_v21 = vadd.f32 %v4511_v58, %v5804_v56  ;;  %4552 = vmatprep.mubr.bf16.mxu0 %v3274_v15  ;;  %v3258_v36 = vmax.f32 %v3216_v4, 0.0 }
 0x8b9   : > { %v3218_v7 = vpop.f32.mrf.mxu1  ;;  %4553 = vmatmul.mubr.bf16.gmra.mxu0 %v3275_v8 }
 0x8ba   : > { %v3219_v14 = vadd.f32 %v5804_v56, %v3218_v7  ;;  %v3261_v59 = vmax.f32 %v3227_v21, 0.0 }
 0x8bc   : > { %v3259_v29 = vmax.f32 %v3219_v14, 0.0  ;;  %v3277_v50 = vpack.c.bf16 %v3261_v59, %v3260_v20 }
 0x8be   : > { %v3276_v27 = vpack.c.bf16 %v3259_v29, %v3258_v36 }
 0x8c0   : > { %4556 = vmatprep.mubr.bf16.mxu0 %v3276_v27 }
 0x8c1   : > { %4557 = vmatmul.mubr.bf16.gmra.mxu0 %v3277_v50 }
 0x946   : > { %v4530_v34 = vpop.f32.mrf.mxu0 }
 0x947   : > { %v3390_v3 = vadd.f32 %v4530_v34, %v5838_v22 }
 0x948   : > { %v3381_v17 = vpop.f32.mrf.mxu0 }
 0x949   : > { %v3510_v38 = vadd.f32 %v3390_v3, %v5385_v6  ;;  %v3382_v10 = vadd.f32 %v5838_v22, %v3381_v17 }
 0x94a   : > { %v4531_v56 = vpop.f32.mrf.mxu0 }
 0x94b   : > { %3542 = vst [vmem:[%s5845_s5 + $0x10] sm:$0xff] %v3510_v38  ;;  %v3508_v9 = vadd.f32 %v3382_v10, %v5388_v63  ;;  %v3393_v39 = vadd.f32 %v4531_v56, %v5838_v22 }
 0x94c   : > { %v3384_v44 = vpop.f32.mrf.mxu0 }
 0x94d   : > { %3540 = vst [vmem:[%s5845_s5] sm:$0xff] %v3508_v9  ;;  %v3511_v6 = vadd.f32 %v3393_v39, %v5393_v11  ;;  %v3385_v45 = vadd.f32 %v5838_v22, %v3384_v44 }
 0x94f   : > { %3543 = vst [vmem:[%s5845_s5 + $0x18] sm:$0xff] %v3511_v6  ;;  %v3509_v13 = vadd.f32 %v3385_v45, %v5398_v12 }
 0x951   : > { %3541 = vst [vmem:[%s5845_s5 + $0x8] sm:$0xff] %v3509_v13  ;;  %v4534_v53 = vpop.f32.mrf.mxu0 }
 0x952   : > { %v3406_v5 = vadd.f32 %v4534_v53, %v5838_v22 }
 0x953   : > { %v3397_v46 = vpop.f32.mrf.mxu0 }
 0x954   : > { %v3514_v63 = vadd.f32 %v3406_v5, %v5410_v23  ;;  %v3398_v52 = vadd.f32 %v5838_v22, %v3397_v46 }
 0x955   : > { %v4535_v1 = vpop.f32.mrf.mxu0 }
 0x956   : > { %3546 = vst [vmem:[%s5845_s5 + $0x30] sm:$0xff] %v3514_v63  ;;  %v3512_v11 = vadd.f32 %v3398_v52, %v5405_v16  ;;  %v3409_v48 = vadd.f32 %v4535_v1, %v5838_v22 }
 0x957   : > { %v3400_v33 = vpop.f32.mrf.mxu0 }
 0x958   : > { %3544 = vst [vmem:[%s5845_s5 + $0x20] sm:$0xff] %v3512_v11  ;;  %v3515_v12 = vadd.f32 %v3409_v48, %v5420_v28  ;;  %v3401_v47 = vadd.f32 %v5838_v22, %v3400_v33 }
 0x959   : > { %v4538_v35 = vpop.f32.mrf.mxu0 }
 0x95a   : > { %3547 = vst [vmem:[%s5845_s5 + $0x38] sm:$0xff] %v3515_v12  ;;  %v3513_v23 = vadd.f32 %v3401_v47, %v5413_v24  ;;  %v3422_v54 = vadd.f32 %v4538_v35, %v5838_v22 }
 0x95b   : > { %v3413_v31 = vpop.f32.mrf.mxu0 }
 0x95c   : > { %3545 = vst [vmem:[%s5845_s5 + $0x28] sm:$0xff] %v3513_v23  ;;  %v3518_v16 = vadd.f32 %v3422_v54, %v5430_v55  ;;  %v3414_v32 = vadd.f32 %v5838_v22, %v3413_v31 }
 0x95d   : > { %v4539_v15 = vpop.f32.mrf.mxu0 }
 0x95e   : > { %3550 = vst [vmem:[%s5845_s5 + $0x50] sm:$0xff] %v3518_v16  ;;  %v3516_v28 = vadd.f32 %v3414_v32, %v5423_v30  ;;  %v3425_v8 = vadd.f32 %v4539_v15, %v5838_v22 }
 0x95f   : > { %v3416_v58 = vpop.f32.mrf.mxu0 }
 0x960   : > { %3548 = vst [vmem:[%s5845_s5 + $0x40] sm:$0xff] %v3516_v28  ;;  %v3519_v24 = vadd.f32 %v3425_v8, %v5440_v37  ;;  %v3417_v4 = vadd.f32 %v5838_v22, %v3416_v58  ;;  %v6024_v28 = vld [vmem:[#allocation14_spill] sm:$0xff] }
 0x961   : > { %v4542_v21 = vpop.f32.mrf.mxu0 }
 0x962   : > { %3551 = vst [vmem:[%s5845_s5 + $0x58] sm:$0xff] %v3519_v24  ;;  %v3517_v55 = vadd.f32 %v3417_v4, %v5433_v19  ;;  %v3438_v0 = vadd.f32 %v4542_v21, %v5838_v22  ;;  %v6025_v4 = vld [vmem:[#allocation17_spill] sm:$0xff] }
 0x963   : > { %v3429_v7 = vpop.f32.mrf.mxu0 }
 0x964   : > { %3549 = vst [vmem:[%s5845_s5 + $0x48] sm:$0xff] %v3517_v55  ;;  %v3522_v30 = vadd.f32 %v3438_v0, %v5450_v40  ;;  %v3430_v14 = vadd.f32 %v5838_v22, %v3429_v7  ;;  %v6026_v0 = vld [vmem:[#allocation16_spill] sm:$0xff] }
 0x965   : > { %v4543_v59 = vpop.f32.mrf.mxu0 }
 0x966   : > { %3554 = vst [vmem:[%s5845_s5 + $0x70] sm:$0xff] %v3522_v30  ;;  %v3520_v37 = vadd.f32 %v3430_v14, %v5443_v2  ;;  %v3441_v36 = vadd.f32 %v4543_v59, %v5838_v22 }
 0x967   : > { %v3432_v29 = vpop.f32.mrf.mxu0 }
 0x968   : > { %3552 = vst [vmem:[%s5845_s5 + $0x60] sm:$0xff] %v3520_v37  ;;  %v3523_v19 = vadd.f32 %v3441_v36, %v5460_v18  ;;  %v3433_v20 = vadd.f32 %v5838_v22, %v3432_v29 }
 0x969   : > { %v4546_v27 = vpop.f32.mrf.mxu0 }
 0x96a   : > { %3555 = vst [vmem:[%s5845_s5 + $0x78] sm:$0xff] %v3523_v19  ;;  %v3521_v40 = vadd.f32 %v3433_v20, %v5453_v42  ;;  %v3454_v50 = vadd.f32 %v4546_v27, %v5838_v22 }
 0x96b   : > { %v3445_v34 = vpop.f32.mrf.mxu0 }
 0x96c   : > { %3553 = vst [vmem:[%s5845_s5 + $0x68] sm:$0xff] %v3521_v40  ;;  %v3526_v2 = vadd.f32 %v3454_v50, %v5470_v57  ;;  %v3446_v3 = vadd.f32 %v5838_v22, %v3445_v34 }
 0x96d   : > { %v4547_v17 = vpop.f32.mrf.mxu0 }
 0x96e   : > { %3558 = vst [vmem:[%s5845_s5 + $0x90] sm:$0xff] %v3526_v2  ;;  %v3524_v18 = vadd.f32 %v3446_v3, %v5463_v51  ;;  %v3457_v38 = vadd.f32 %v4547_v17, %v5838_v22 }
 0x96f   : > { %v3448_v10 = vpop.f32.mrf.mxu0 }
 0x970   : > { %3556 = vst [vmem:[%s5845_s5 + $0x80] sm:$0xff] %v3524_v18  ;;  %v3527_v42 = vadd.f32 %v3457_v38, %v5480_v41  ;;  %v3449_v56 = vadd.f32 %v5838_v22, %v3448_v10 }
 0x971   : > { %v4550_v9 = vpop.f32.mrf.mxu0 }
 0x972   : > { %3559 = vst [vmem:[%s5845_s5 + $0x98] sm:$0xff] %v3527_v42  ;;  %v3525_v57 = vadd.f32 %v3449_v56, %v5473_v26  ;;  %v3470_v39 = vadd.f32 %v4550_v9, %v5838_v22 }
 0x973   : > { %v3461_v44 = vpop.f32.mrf.mxu0 }
 0x974   : > { %3557 = vst [vmem:[%s5845_s5 + $0x88] sm:$0xff] %v3525_v57  ;;  %v3530_v51 = vadd.f32 %v3470_v39, %v5490_v61  ;;  %v3462_v6 = vadd.f32 %v5838_v22, %v3461_v44 }
 0x975   : > { %v4551_v45 = vpop.f32.mrf.mxu0 }
 0x976   : > { %3562 = vst [vmem:[%s5845_s5 + $0xb0] sm:$0xff] %v3530_v51  ;;  %v3528_v41 = vadd.f32 %v3462_v6, %v5483_v60  ;;  %v3473_v13 = vadd.f32 %v4551_v45, %v5838_v22 }
 0x977   : > { %v3464_v53 = vpop.f32.mrf.mxu0 }
 0x978   : > { %3560 = vst [vmem:[%s5845_s5 + $0xa0] sm:$0xff] %v3528_v41  ;;  %v3531_v26 = vadd.f32 %v3473_v13, %v5500_v43  ;;  %v3465_v5 = vadd.f32 %v5838_v22, %v3464_v53 }
 0x979   : > { %v4554_v46 = vpop.f32.mrf.mxu0 }
 0x97a   : > { %3563 = vst [vmem:[%s5845_s5 + $0xb8] sm:$0xff] %v3531_v26  ;;  %v3529_v61 = vadd.f32 %v3465_v5, %v5493_v62  ;;  %v3486_v63 = vadd.f32 %v4554_v46, %v5838_v22  ;;  %v6021_v62 = vld [vmem:[#allocation13_spill] sm:$0xff] }
 0x97b   : > { %v3477_v52 = vpop.f32.mrf.mxu0 }
 0x97c   : > { %3561 = vst [vmem:[%s5845_s5 + $0xa8] sm:$0xff] %v3529_v61  ;;  %v3534_v60 = vadd.f32 %v3486_v63, %v5510_v25  ;;  %v3478_v1 = vadd.f32 %v5838_v22, %v3477_v52  ;;  %v6022_v25 = vld [vmem:[#allocation12_spill] sm:$0xff] }
 0x97d   : > { %v4555_v11 = vpop.f32.mrf.mxu0 }
 0x97e   : > { %3566 = vst [vmem:[%s5845_s5 + $0xd0] sm:$0xff] %v3534_v60  ;;  %v3532_v43 = vadd.f32 %v3478_v1, %v5503_v49  ;;  %v3489_v48 = vadd.f32 %v4555_v11, %v5838_v22  ;;  %v6023_v49 = vld [vmem:[#allocation15_spill] sm:$0xff] }
 0x97f   : > { %v3480_v33 = vpop.f32.mrf.mxu0 }
 0x980   : > { %3564 = vst [vmem:[%s5845_s5 + $0xc0] sm:$0xff] %v3532_v43  ;;  %v3535_v12 = vadd.f32 %v3489_v48, %v6021_v62  ;;  %v3481_v47 = vadd.f32 %v5838_v22, %v3480_v33 }
 0x981   : > { %v4558_v35 = vpop.f32.mrf.mxu0 }
 0x982   : > { %3567 = vst [vmem:[%s5845_s5 + $0xd8] sm:$0xff] %v3535_v12  ;;  %v3533_v23 = vadd.f32 %v3481_v47, %v6022_v25  ;;  %v3502_v54 = vadd.f32 %v4558_v35, %v5838_v22 }
 0x983   : > { %v3493_v31 = vpop.f32.mrf.mxu0 }
 0x984   : > { %3565 = vst [vmem:[%s5845_s5 + $0xc8] sm:$0xff] %v3533_v23  ;;  %v3538_v16 = vadd.f32 %v3502_v54, %v6023_v49  ;;  %v3494_v32 = vadd.f32 %v5838_v22, %v3493_v31 }
 0x985   : > { %v4559_v15 = vpop.f32.mrf.mxu0 }
 0x986   : > { %3570 = vst [vmem:[%s5845_s5 + $0xf0] sm:$0xff] %v3538_v16  ;;  %v3536_v8 = vadd.f32 %v3494_v32, %v6024_v28  ;;  %v3505_v58 = vadd.f32 %v4559_v15, %v5838_v22 }
 0x987   : > { %v3496_v24 = vpop.f32.mrf.mxu0 }
 0x988   : > { %3568 = vst [vmem:[%s5845_s5 + $0xe0] sm:$0xff] %v3536_v8  ;;  %v3539_v21 = vadd.f32 %v3505_v58, %v6025_v4  ;;  %v3497_v55 = vadd.f32 %v5838_v22, %v3496_v24 }
 0x98a   : > { %3571 = vst [vmem:[%s5845_s5 + $0xf8] sm:$0xff] %v3539_v21  ;;  %v3537_v7 = vadd.f32 %v3497_v55, %v6026_v0 }
 0x98c   : > { %3569 = vst [vmem:[%s5845_s5 + $0xe8] sm:$0xff] %v3537_v7 }
 0x98d   : > { %4897 = shalt.err (!%p4894_p9)
}
 0x98e   : > { %s4898_s26 = scalar_lea.hbm %s5942_s11, 4096  ;;  %s4902_s10 = scalar_lea.hbm %s5993_s3, 8192 }
 0x98f   : > { %p4899_p13 = scmp.ne.s32.totalorder %s5942_s11, %s4898_s26  ;;  %p4903_p4 = scmp.lt.s32.totalorder %s5942_s11, %s5993_s3 }
 0x990   : > { %p4904_p8 = scmp.lt.s32.totalorder %s4902_s10, %s4898_s26 }
 0x991   : > { %p4900_p5 = pnand %p4899_p13, %p6027_p10 }
 0x992   : > { %p4905_p7 = por %p4904_p8, %p4903_p4 }
 0x993   : > { %p4901_p0 = pneg %p4900_p5 }
 0x995   : > { %p4906_p11 = pnand %p4905_p7, %p4901_p0 }
 0x997   : > { %4909 = shalt.err (!%p4906_p11)
}
 0x998   : > { %s4964_s20 = smov 128   ;;  %s4965_s5 = smov 8  }
 0x999   : > { %4574 = dma.vmem_to_hbm [thread:$0]  (%p6027_p10), %s5944_s27, 4096, %s5942_s11, %s3573_s16, %s4964_s20, %s4964_s20, %s4965_s5  }
 0x99a PF: > { %s3601_s6 = sand.u32 1, %s4940_s12   ;;  %p6028_p1 = scmp.ne.s32.totalorder %s6005_s19, 0 }
 0x99b   : > { %p6029_p2 = scmp.ge.s32.totalorder %s4952_s15, 2  ;;  %s3602_s29 = scalar_lea.sflag [#allocation4], %s3601_s6 }
 0x99d   : > { %p4588_p6 = pnand %p6029_p2, %p6028_p1 }
 0x99f   : > { %p4589_p12 = pneg %p4588_p6 }
 0x9a1   : > { %4935 = dma.done.wait (%p4589_p12), %s3602_s29, 4096  }
 0x9a2   : > { %4937 = vsyncadd (%p4589_p12), %s3602_s29, 4294963200  ;;  %p17_p3 = scmp.ge.s32.totalorder %s5061_s9, 4   ;;  %s6030_s12 = smov %s4944_s13 }
 0x9a3   : > { %s6031_s13 = smov %s4948_s14  ;;  %s6032_s14 = smov %s5070_s17 }
 0x9a4   : > { %s6033_s15 = smov %s5061_s9  ;;  %19 = sbr.rel (!%p17_p3) target bundleno = 6 (0x6), region = 85 }
 0x9a9   :  { %3607 = vsyncpa [#allocation3], 1 }
 0x9aa   :  { %3609 = vsyncpa [#allocation3 + $0x1], 1 }
 0x9ab   :  { %3610 = vsyncpa [#allocation6], 1 }
 0x9ac   :  { %3611 = vsyncpa [#allocation4], 1 }
 0x9ad   :  { %3613 = vsyncpa [#allocation4 + $0x1], 1 }

</bundles_post_ra>
